<compile_context>
chip_gen: v5e
topology: v5e:2x2
jax: 0.10.0
libtpu: 0.0.40
codegen_flags: <defaults>
</compile_context>

<pallas_src>
import jax
import jax.numpy as jnp
from jax.experimental import pallas as pl
from jax.experimental.pallas import tpu as pltpu


# ----------------------------------------------------------------------------
# Pallas kernel: conv1(+folded bn2)+relu -> conv2 -> (+ residual), per batch tile
# ----------------------------------------------------------------------------
def _make_block_kernel(BB, S, Hpp, Wpp, Ho, Wo, Cin, Cout, has_downsample):
    N = Ho * Wo
    M = BB * N

    def kernel(*refs):
        if has_downsample:
            (ap_ref, res_ref, w1_ref, b1_ref, w2_ref, b2_ref,
             wd_ref, bd_ref, o_ref, hpad_ref) = refs
        else:
            (ap_ref, res_ref, w1_ref, b1_ref, w2_ref, b2_ref,
             o_ref, hpad_ref) = refs

        # ---- conv1 (3x3, stride folded into the polyphase layout).  The slab
        # already has bn1+relu applied once and is zero padded, so every tap is
        # a unit-stride window shared by the whole batch tile -> one bf16 MXU
        # matmul per tap with M = BB*Ho*Wo rows, f32 accumulation.
        ap = ap_ref[...]                                   # (BB, S*S*Hpp, Wpp, Cin) bf16
        acc1 = jnp.zeros((M, Cout), jnp.float32)
        for kh in range(3):
            for kw in range(3):
                r0 = ((kh % S) * S + (kw % S)) * Hpp + kh // S
                c0 = kw // S
                win = ap[:, r0:r0 + Ho, c0:c0 + Wo, :].reshape(M, Cin)
                acc1 = acc1 + jnp.dot(win, w1_ref[kh * 3 + kw],
                                      preferred_element_type=jnp.float32)
        # bn2 is folded into w1/bias1 -> only bias-add + relu remain.
        h = jnp.maximum(acc1 + b1_ref[...], 0.0)           # (M, Cout) f32

        # ---- conv2 (3x3, stride 1, pad 1) via a zero-halo VMEM scratch.
        # Interior is fully overwritten every step; only the 1-pixel halo strips
        # are re-zeroed (cheap), not the whole buffer.
        zr = jnp.zeros((BB, 1, Wo + 2, Cout), jnp.float32)
        zc = jnp.zeros((BB, Ho + 2, 1, Cout), jnp.float32)
        hpad_ref[:, 0:1, :, :] = zr
        hpad_ref[:, Ho + 1:Ho + 2, :, :] = zr
        hpad_ref[:, :, 0:1, :] = zc
        hpad_ref[:, :, Wo + 1:Wo + 2, :] = zc
        hpad_ref[:, 1:Ho + 1, 1:Wo + 1, :] = h.reshape(BB, Ho, Wo, Cout)

        # Single cast of the padded slab to bf16 (instead of 9 window casts).
        hp = hpad_ref[...].astype(jnp.bfloat16)            # (BB, Ho+2, Wo+2, Cout)
        acc2 = jnp.zeros((M, Cout), jnp.float32)
        for kh in range(3):
            for kw in range(3):
                win = hp[:, kh:kh + Ho, kw:kw + Wo, :].reshape(M, Cout)
                acc2 = acc2 + jnp.dot(win, w2_ref[kh * 3 + kw],
                                      preferred_element_type=jnp.float32)
        c2 = acc2 + b2_ref[...]                            # (M, Cout)

        # ---- residual branch (input already stride-subsampled by the wrapper).
        orig = res_ref[...].reshape(M, Cin)                # bf16 (downsample) / f32 (identity)
        if has_downsample:
            # 1x1 stride-2 conv with its BN folded into wd/bd.
            res = jnp.dot(orig, wd_ref[...],
                          preferred_element_type=jnp.float32) + bd_ref[...]
        else:
            res = orig                                     # Cin == Cout here
        o_ref[...] = (c2 + res).reshape(BB, N, Cout)

    return kernel


def _pick_batch_tile(B, N, target_rows=1024):
    """Largest divisor of B whose per-step matmul M = bb*N stays ~<= target_rows."""
    cap = max(1, min(B, max(1, target_rows // max(N, 1))))
    for bb in range(cap, 0, -1):
        if B % bb == 0:
            return bb
    return 1


# ----------------------------------------------------------------------------
# Wrapper: NCHW <-> NHWC glue, BN folding, polyphase packing, pallas_call
# ----------------------------------------------------------------------------
def block_forward(x_nchw, params, *, stride, activate_before_res, eps=1e-5):
    B, Cin, H, W = x_nchw.shape
    Cout = params["conv1_w"].shape[0]
    S = int(stride)
    has_downsample = (S == 2)
    Ho = (H + 2 - 3) // S + 1
    Wo = (W + 2 - 3) // S + 1
    N = Ho * Wo
    BB = _pick_batch_tile(B, N)

    x = jnp.transpose(x_nchw, (0, 2, 3, 1)).astype(jnp.float32)      # NHWC

    def fold_bn(g, b, m, v):
        s = g / jnp.sqrt(v + eps)
        return s, b - m * s

    s1, t1 = fold_bn(params["bn1_gamma"], params["bn1_beta"],
                     params["bn1_mean"], params["bn1_var"])
    s2, t2 = fold_bn(params["bn2_gamma"], params["bn2_beta"],
                     params["bn2_mean"], params["bn2_var"])

    # bn1 + relu applied exactly once; zero padding stays exactly zero afterwards.
    a = jnp.maximum(x * s1 + t1, 0.0)                                 # (B,H,W,Cin)
    ap = jnp.pad(a, ((0, 0), (1, 1), (1, 1), (0, 0)))                 # (B,H+2,W+2,Cin)

    # Polyphase packing (pure layout, 1x data, no 9x im2col):
    #   app[b, (pr*S+pc)*Hpp + qh, qw, c] = ap[b, qh*S+pr, qw*S+pc, c]
    # so every conv1 tap (also for stride 2) is a unit-stride in-kernel window.
    Hp, Wp = H + 2, W + 2
    Hpp, Wpp = -(-Hp // S), -(-Wp // S)
    ap = jnp.pad(ap, ((0, 0), (0, Hpp * S - Hp), (0, Wpp * S - Wp), (0, 0)))
    app = ap.reshape(B, Hpp, S, Wpp, S, Cin).transpose(0, 2, 4, 1, 3, 5)
    app = app.reshape(B, S * S * Hpp, Wpp, Cin).astype(jnp.bfloat16)

    # Residual-branch input (activated or raw per flag), stride-subsampled.
    # bf16 when it only feeds the bf16 downsample matmul, f32 for identity add.
    res_src = a if activate_before_res else x
    res_dtype = jnp.bfloat16 if has_downsample else jnp.float32
    res_in = res_src[:, ::S, ::S, :].reshape(B, N, Cin).astype(res_dtype)

    # Conv weights: torch OIHW -> per-tap (Cin, Cout); bn2 / bn_down folded in;
    # bf16 operands for the MXU (accumulation stays f32).
    w1 = jnp.transpose(params["conv1_w"], (2, 3, 1, 0)).reshape(9, Cin, Cout)
    w1 = (w1 * s2).astype(jnp.bfloat16)
    bias1 = (params["conv1_b"] * s2 + t2).reshape(1, Cout)
    w2 = jnp.transpose(params["conv2_w"], (2, 3, 1, 0)).reshape(9, Cout, Cout)
    w2 = w2.astype(jnp.bfloat16)
    b2 = params["conv2_b"].reshape(1, Cout)

    args = [app, res_in, w1, bias1, w2, b2]
    in_specs = [
        pl.BlockSpec((BB, S * S * Hpp, Wpp, Cin), lambda b: (b, 0, 0, 0)),
        pl.BlockSpec((BB, N, Cin), lambda b: (b, 0, 0)),
        pl.BlockSpec((9, Cin, Cout), lambda b: (0, 0, 0)),
        pl.BlockSpec((1, Cout), lambda b: (0, 0)),
        pl.BlockSpec((9, Cout, Cout), lambda b: (0, 0, 0)),
        pl.BlockSpec((1, Cout), lambda b: (0, 0)),
    ]
    if has_downsample:
        sd, td = fold_bn(params["bnd_gamma"], params["bnd_beta"],
                         params["bnd_mean"], params["bnd_var"])
        wd = jnp.transpose(params["ds_w"], (2, 3, 1, 0)).reshape(Cin, Cout)
        wd = (wd * sd).astype(jnp.bfloat16)
        bd = (params["ds_b"] * sd + td).reshape(1, Cout)
        args += [wd, bd]
        in_specs += [pl.BlockSpec((Cin, Cout), lambda b: (0, 0)),
                     pl.BlockSpec((1, Cout), lambda b: (0, 0))]

    kernel = _make_block_kernel(BB, S, Hpp, Wpp, Ho, Wo, Cin, Cout, has_downsample)
    out2d = pl.pallas_call(
        kernel,
        out_shape=jax.ShapeDtypeStruct((B, N, Cout), jnp.float32),
        grid=(B // BB,),
        in_specs=in_specs,
        out_specs=pl.BlockSpec((BB, N, Cout), lambda b: (b, 0, 0)),
        scratch_shapes=[pltpu.VMEM((BB, Ho + 2, Wo + 2, Cout), jnp.float32)],
        compiler_params=pltpu.CompilerParams(
            dimension_semantics=("parallel",)),
    )(*args)

    out = out2d.reshape(B, Ho, Wo, Cout)
    return jnp.transpose(out, (0, 3, 1, 2))                           # back to NCHW


# ----------------------------------------------------------------------------
# Deterministic parameter init (shapes follow the PyTorch module's __init__)
# ----------------------------------------------------------------------------
def init_params(key, inplane, outplane, stride):
    ks = jax.random.split(key, 9)

    def conv_init(kw, kb, co, ci, kh, kww):
        fan_in = ci * kh * kww
        bound = 1.0 / (fan_in ** 0.5)
        w = jax.random.uniform(kw, (co, ci, kh, kww), jnp.float32, -bound, bound)
        b = jax.random.uniform(kb, (co,), jnp.float32, -bound, bound)
        return w, b

    def bn_init(k, c):
        k1, k2, k3, k4 = jax.random.split(k, 4)
        gamma = jax.random.uniform(k1, (c,), jnp.float32, 0.7, 1.3)
        beta = 0.1 * jax.random.normal(k2, (c,), jnp.float32)
        mean = 0.1 * jax.random.normal(k3, (c,), jnp.float32)
        var = jax.random.uniform(k4, (c,), jnp.float32, 0.5, 1.5)
        return gamma, beta, mean, var

    p = {}
    p["conv1_w"], p["conv1_b"] = conv_init(ks[0], ks[1], outplane, inplane, 3, 3)
    p["conv2_w"], p["conv2_b"] = conv_init(ks[2], ks[3], outplane, outplane, 3, 3)
    (p["bn1_gamma"], p["bn1_beta"], p["bn1_mean"], p["bn1_var"]) = bn_init(ks[4], inplane)
    (p["bn2_gamma"], p["bn2_beta"], p["bn2_mean"], p["bn2_var"]) = bn_init(ks[5], outplane)
    if stride == 2:
        assert outplane == inplane * 2
        p["ds_w"], p["ds_b"] = conv_init(ks[6], ks[7], outplane, inplane, 1, 1)
        (p["bnd_gamma"], p["bnd_beta"], p["bnd_mean"], p["bnd_var"]) = bn_init(ks[8], outplane)
    return p


# ----------------------------------------------------------------------------
# Pure-JAX reference (mirrors the PyTorch forward, eval-mode BN)
# ----------------------------------------------------------------------------
def block_reference(x, params, *, stride, activate_before_res, eps=1e-5):
    def bn(v, g, b, m, var):
        s = (g / jnp.sqrt(var + eps))[None, :, None, None]
        return (v - m[None, :, None, None]) * s + b[None, :, None, None]

    def conv(v, w, b, s, pad):
        out = jax.lax.conv_general_dilated(
            v, w, window_strides=(s, s), padding=pad,
            dimension_numbers=("NCHW", "OIHW", "NCHW"))
        return out + b[None, :, None, None]

    relu = lambda v: jnp.maximum(v, 0.0)

    if activate_before_res:
        x = relu(bn(x, params["bn1_gamma"], params["bn1_beta"],
                    params["bn1_mean"], params["bn1_var"]))
        orig = x
    else:
        orig = x
        x = relu(bn(x, params["bn1_gamma"], params["bn1_beta"],
                    params["bn1_mean"], params["bn1_var"]))
    x = conv(x, params["conv1_w"], params["conv1_b"], stride, ((1, 1), (1, 1)))
    x = relu(bn(x, params["bn2_gamma"], params["bn2_beta"],
                params["bn2_mean"], params["bn2_var"]))
    x = conv(x, params["conv2_w"], params["conv2_b"], 1, ((1, 1), (1, 1)))
    if stride == 2:
        orig = conv(orig, params["ds_w"], params["ds_b"], 2, ((0, 0), (0, 0)))
        orig = bn(orig, params["bnd_gamma"], params["bnd_beta"],
                  params["bnd_mean"], params["bnd_var"])
    return x + orig


if __name__ == "__main__":
    root = jax.random.PRNGKey(0)
    kx, kp1, kp2 = jax.random.split(root, 3)

    fwd = jax.jit(block_forward, static_argnames=("stride", "activate_before_res"))

    B, inplane, H, W = 2, 8, 16, 16
    x = jax.random.normal(kx, (B, inplane, H, W), jnp.float32)

    # Config 1: stride=2 block (with 1x1 downsample), activate_before_res=True.
    params1 = init_params(kp1, inplane, 2 * inplane, stride=2)
    out1 = jax.block_until_ready(fwd(x, params1, stride=2, activate_before_res=True))
    ref1 = block_reference(x, params1, stride=2, activate_before_res=True)
    assert out1.shape == (B, 2 * inplane, H // 2, W // 2), out1.shape
    err1 = float(jnp.max(jnp.abs(out1 - ref1)))
    assert err1 < 5e-2, f"stride-2 block mismatch: max abs err = {err1}"

    # Config 2: stride=1 identity-residual block, activate_before_res=False.
    params2 = init_params(kp2, inplane, inplane, stride=1)
    out2 = jax.block_until_ready(fwd(x, params2, stride=1, activate_before_res=False))
    ref2 = block_reference(x, params2, stride=1, activate_before_res=False)
    assert out2.shape == (B, inplane, H, W), out2.shape
    err2 = float(jnp.max(jnp.abs(out2 - ref2)))
    assert err2 < 5e-2, f"stride-1 block mismatch: max abs err = {err2}"

    print("KERNEL_OK")
</pallas_src>

<mosaic_0001>
module attributes {stable_mosaic.version = 11 : i64} {
  func.func @kernel(%arg0: i32, %arg1: memref<2x36x9x8xbf16, #tpu.memory_space<vmem>>, %arg2: memref<2x64x8xbf16, #tpu.memory_space<vmem>>, %arg3: memref<9x8x16xbf16, #tpu.memory_space<vmem>>, %arg4: memref<1x16xf32, #tpu.memory_space<vmem>>, %arg5: memref<9x16x16xbf16, #tpu.memory_space<vmem>>, %arg6: memref<1x16xf32, #tpu.memory_space<vmem>>, %arg7: memref<8x16xbf16, #tpu.memory_space<vmem>>, %arg8: memref<1x16xf32, #tpu.memory_space<vmem>>, %arg9: memref<2x64x16xf32, #tpu.memory_space<vmem>>, %arg10: memref<2x10x10x16xf32, #tpu.memory_space<vmem>>) attributes {dimension_semantics = [#tpu.dimension_semantics<parallel>], iteration_bounds = array<i64: 1>, scalar_prefetch = 0 : i64, scratch_operands = 1 : i64, tpu.core_type = #tpu.core_type<tc>, window_params = [{transform_indices = @transform_0, window_bounds = array<i64: 2, 36, 9, 8>}, {transform_indices = @transform_1, window_bounds = array<i64: 2, 64, 8>}, {pipeline_mode = #tpu.pipeline_mode<synchronous>, transform_indices = @transform_2, window_bounds = array<i64: 9, 8, 16>}, {pipeline_mode = #tpu.pipeline_mode<synchronous>, transform_indices = @transform_3, window_bounds = array<i64: 1, 16>}, {pipeline_mode = #tpu.pipeline_mode<synchronous>, transform_indices = @transform_4, window_bounds = array<i64: 9, 16, 16>}, {pipeline_mode = #tpu.pipeline_mode<synchronous>, transform_indices = @transform_5, window_bounds = array<i64: 1, 16>}, {pipeline_mode = #tpu.pipeline_mode<synchronous>, transform_indices = @transform_6, window_bounds = array<i64: 8, 16>}, {pipeline_mode = #tpu.pipeline_mode<synchronous>, transform_indices = @transform_7, window_bounds = array<i64: 1, 16>}, {transform_indices = @transform_8, window_bounds = array<i64: 2, 64, 16>}]} {
    %c0 = arith.constant 0 : index
    %c0_0 = arith.constant 0 : index
    %c0_1 = arith.constant 0 : index
    %c0_2 = arith.constant 0 : index
    %0 = vector.load %arg1[%c0, %c0_0, %c0_1, %c0_2] : memref<2x36x9x8xbf16, #tpu.memory_space<vmem>>, vector<2x36x9x8xbf16>
    %cst = arith.constant 0.000000e+00 : f32
    %1 = vector.broadcast %cst : f32 to vector<128x16xf32>
    %2 = vector.extract_strided_slice %0 {offsets = [0, 0, 0, 0], sizes = [2, 8, 8, 8], strides = [1, 1, 1, 1]} : vector<2x36x9x8xbf16> to vector<2x8x8x8xbf16>
    %3 = vector.shape_cast %2 : vector<2x8x8x8xbf16> to vector<128x8xbf16>
    %c0_3 = arith.constant 0 : index
    %c0_4 = arith.constant 0 : index
    %c0_5 = arith.constant 0 : index
    %4 = vector.load %arg3[%c0_3, %c0_4, %c0_5] : memref<9x8x16xbf16, #tpu.memory_space<vmem>>, vector<1x8x16xbf16>
    %5 = vector.shape_cast %4 : vector<1x8x16xbf16> to vector<8x16xbf16>
    %cst_6 = arith.constant dense<0.000000e+00> : vector<128x16xf32>
    %6 = tpu.matmul %3, %5, %cst_6 {dimension_numbers = #tpu.dot_dimension_numbers<[1], [0], [0], [1], [0, 0, 1, 1], [], []>} : vector<128x8xbf16>, vector<8x16xbf16>, vector<128x16xf32> -> vector<128x16xf32>
    %7 = arith.addf %1, %6 : vector<128x16xf32>
    %8 = vector.extract_strided_slice %0 {offsets = [0, 9, 0, 0], sizes = [2, 8, 8, 8], strides = [1, 1, 1, 1]} : vector<2x36x9x8xbf16> to vector<2x8x8x8xbf16>
    %9 = vector.shape_cast %8 : vector<2x8x8x8xbf16> to vector<128x8xbf16>
    %c1 = arith.constant 1 : index
    %c0_7 = arith.constant 0 : index
    %c0_8 = arith.constant 0 : index
    %10 = vector.load %arg3[%c1, %c0_7, %c0_8] : memref<9x8x16xbf16, #tpu.memory_space<vmem>>, vector<1x8x16xbf16>
    %11 = vector.shape_cast %10 : vector<1x8x16xbf16> to vector<8x16xbf16>
    %cst_9 = arith.constant dense<0.000000e+00> : vector<128x16xf32>
    %12 = tpu.matmul %9, %11, %cst_9 {dimension_numbers = #tpu.dot_dimension_numbers<[1], [0], [0], [1], [0, 0, 1, 1], [], []>} : vector<128x8xbf16>, vector<8x16xbf16>, vector<128x16xf32> -> vector<128x16xf32>
    %13 = arith.addf %7, %12 : vector<128x16xf32>
    %14 = vector.extract_strided_slice %0 {offsets = [0, 0, 1, 0], sizes = [2, 8, 8, 8], strides = [1, 1, 1, 1]} : vector<2x36x9x8xbf16> to vector<2x8x8x8xbf16>
    %15 = vector.shape_cast %14 : vector<2x8x8x8xbf16> to vector<128x8xbf16>
    %c2 = arith.constant 2 : index
    %c0_10 = arith.constant 0 : index
    %c0_11 = arith.constant 0 : index
    %16 = vector.load %arg3[%c2, %c0_10, %c0_11] : memref<9x8x16xbf16, #tpu.memory_space<vmem>>, vector<1x8x16xbf16>
    %17 = vector.shape_cast %16 : vector<1x8x16xbf16> to vector<8x16xbf16>
    %cst_12 = arith.constant dense<0.000000e+00> : vector<128x16xf32>
    %18 = tpu.matmul %15, %17, %cst_12 {dimension_numbers = #tpu.dot_dimension_numbers<[1], [0], [0], [1], [0, 0, 1, 1], [], []>} : vector<128x8xbf16>, vector<8x16xbf16>, vector<128x16xf32> -> vector<128x16xf32>
    %19 = arith.addf %13, %18 : vector<128x16xf32>
    %20 = vector.extract_strided_slice %0 {offsets = [0, 18, 0, 0], sizes = [2, 8, 8, 8], strides = [1, 1, 1, 1]} : vector<2x36x9x8xbf16> to vector<2x8x8x8xbf16>
    %21 = vector.shape_cast %20 : vector<2x8x8x8xbf16> to vector<128x8xbf16>
    %c3 = arith.constant 3 : index
    %c0_13 = arith.constant 0 : index
    %c0_14 = arith.constant 0 : index
    %22 = vector.load %arg3[%c3, %c0_13, %c0_14] : memref<9x8x16xbf16, #tpu.memory_space<vmem>>, vector<1x8x16xbf16>
    %23 = vector.shape_cast %22 : vector<1x8x16xbf16> to vector<8x16xbf16>
    %cst_15 = arith.constant dense<0.000000e+00> : vector<128x16xf32>
    %24 = tpu.matmul %21, %23, %cst_15 {dimension_numbers = #tpu.dot_dimension_numbers<[1], [0], [0], [1], [0, 0, 1, 1], [], []>} : vector<128x8xbf16>, vector<8x16xbf16>, vector<128x16xf32> -> vector<128x16xf32>
    %25 = arith.addf %19, %24 : vector<128x16xf32>
    %26 = vector.extract_strided_slice %0 {offsets = [0, 27, 0, 0], sizes = [2, 8, 8, 8], strides = [1, 1, 1, 1]} : vector<2x36x9x8xbf16> to vector<2x8x8x8xbf16>
    %27 = vector.shape_cast %26 : vector<2x8x8x8xbf16> to vector<128x8xbf16>
    %c4 = arith.constant 4 : index
    %c0_16 = arith.constant 0 : index
    %c0_17 = arith.constant 0 : index
    %28 = vector.load %arg3[%c4, %c0_16, %c0_17] : memref<9x8x16xbf16, #tpu.memory_space<vmem>>, vector<1x8x16xbf16>
    %29 = vector.shape_cast %28 : vector<1x8x16xbf16> to vector<8x16xbf16>
    %cst_18 = arith.constant dense<0.000000e+00> : vector<128x16xf32>
    %30 = tpu.matmul %27, %29, %cst_18 {dimension_numbers = #tpu.dot_dimension_numbers<[1], [0], [0], [1], [0, 0, 1, 1], [], []>} : vector<128x8xbf16>, vector<8x16xbf16>, vector<128x16xf32> -> vector<128x16xf32>
    %31 = arith.addf %25, %30 : vector<128x16xf32>
    %32 = vector.extract_strided_slice %0 {offsets = [0, 18, 1, 0], sizes = [2, 8, 8, 8], strides = [1, 1, 1, 1]} : vector<2x36x9x8xbf16> to vector<2x8x8x8xbf16>
    %33 = vector.shape_cast %32 : vector<2x8x8x8xbf16> to vector<128x8xbf16>
    %c5 = arith.constant 5 : index
    %c0_19 = arith.constant 0 : index
    %c0_20 = arith.constant 0 : index
    %34 = vector.load %arg3[%c5, %c0_19, %c0_20] : memref<9x8x16xbf16, #tpu.memory_space<vmem>>, vector<1x8x16xbf16>
    %35 = vector.shape_cast %34 : vector<1x8x16xbf16> to vector<8x16xbf16>
    %cst_21 = arith.constant dense<0.000000e+00> : vector<128x16xf32>
    %36 = tpu.matmul %33, %35, %cst_21 {dimension_numbers = #tpu.dot_dimension_numbers<[1], [0], [0], [1], [0, 0, 1, 1], [], []>} : vector<128x8xbf16>, vector<8x16xbf16>, vector<128x16xf32> -> vector<128x16xf32>
    %37 = arith.addf %31, %36 : vector<128x16xf32>
    %38 = vector.extract_strided_slice %0 {offsets = [0, 1, 0, 0], sizes = [2, 8, 8, 8], strides = [1, 1, 1, 1]} : vector<2x36x9x8xbf16> to vector<2x8x8x8xbf16>
    %39 = vector.shape_cast %38 : vector<2x8x8x8xbf16> to vector<128x8xbf16>
    %c6 = arith.constant 6 : index
    %c0_22 = arith.constant 0 : index
    %c0_23 = arith.constant 0 : index
    %40 = vector.load %arg3[%c6, %c0_22, %c0_23] : memref<9x8x16xbf16, #tpu.memory_space<vmem>>, vector<1x8x16xbf16>
    %41 = vector.shape_cast %40 : vector<1x8x16xbf16> to vector<8x16xbf16>
    %cst_24 = arith.constant dense<0.000000e+00> : vector<128x16xf32>
    %42 = tpu.matmul %39, %41, %cst_24 {dimension_numbers = #tpu.dot_dimension_numbers<[1], [0], [0], [1], [0, 0, 1, 1], [], []>} : vector<128x8xbf16>, vector<8x16xbf16>, vector<128x16xf32> -> vector<128x16xf32>
    %43 = arith.addf %37, %42 : vector<128x16xf32>
    %44 = vector.extract_strided_slice %0 {offsets = [0, 10, 0, 0], sizes = [2, 8, 8, 8], strides = [1, 1, 1, 1]} : vector<2x36x9x8xbf16> to vector<2x8x8x8xbf16>
    %45 = vector.shape_cast %44 : vector<2x8x8x8xbf16> to vector<128x8xbf16>
    %c7 = arith.constant 7 : index
    %c0_25 = arith.constant 0 : index
    %c0_26 = arith.constant 0 : index
    %46 = vector.load %arg3[%c7, %c0_25, %c0_26] : memref<9x8x16xbf16, #tpu.memory_space<vmem>>, vector<1x8x16xbf16>
    %47 = vector.shape_cast %46 : vector<1x8x16xbf16> to vector<8x16xbf16>
    %cst_27 = arith.constant dense<0.000000e+00> : vector<128x16xf32>
    %48 = tpu.matmul %45, %47, %cst_27 {dimension_numbers = #tpu.dot_dimension_numbers<[1], [0], [0], [1], [0, 0, 1, 1], [], []>} : vector<128x8xbf16>, vector<8x16xbf16>, vector<128x16xf32> -> vector<128x16xf32>
    %49 = arith.addf %43, %48 : vector<128x16xf32>
    %50 = vector.extract_strided_slice %0 {offsets = [0, 1, 1, 0], sizes = [2, 8, 8, 8], strides = [1, 1, 1, 1]} : vector<2x36x9x8xbf16> to vector<2x8x8x8xbf16>
    %51 = vector.shape_cast %50 : vector<2x8x8x8xbf16> to vector<128x8xbf16>
    %c8 = arith.constant 8 : index
    %c0_28 = arith.constant 0 : index
    %c0_29 = arith.constant 0 : index
    %52 = vector.load %arg3[%c8, %c0_28, %c0_29] : memref<9x8x16xbf16, #tpu.memory_space<vmem>>, vector<1x8x16xbf16>
    %53 = vector.shape_cast %52 : vector<1x8x16xbf16> to vector<8x16xbf16>
    %cst_30 = arith.constant dense<0.000000e+00> : vector<128x16xf32>
    %54 = tpu.matmul %51, %53, %cst_30 {dimension_numbers = #tpu.dot_dimension_numbers<[1], [0], [0], [1], [0, 0, 1, 1], [], []>} : vector<128x8xbf16>, vector<8x16xbf16>, vector<128x16xf32> -> vector<128x16xf32>
    %55 = arith.addf %49, %54 : vector<128x16xf32>
    %c0_31 = arith.constant 0 : index
    %c0_32 = arith.constant 0 : index
    %56 = vector.load %arg4[%c0_31, %c0_32] : memref<1x16xf32, #tpu.memory_space<vmem>>, vector<1x16xf32>
    %57 = vector.broadcast %56 : vector<1x16xf32> to vector<128x16xf32>
    %58 = arith.addf %55, %57 : vector<128x16xf32>
    %cst_33 = arith.constant 0.000000e+00 : f32
    %59 = vector.broadcast %cst_33 : f32 to vector<128x16xf32>
    %60 = arith.maximumf %58, %59 : vector<128x16xf32>
    %cst_34 = arith.constant 0.000000e+00 : f32
    %61 = vector.broadcast %cst_34 : f32 to vector<2x1x10x16xf32>
    %cst_35 = arith.constant 0.000000e+00 : f32
    %62 = vector.broadcast %cst_35 : f32 to vector<2x10x1x16xf32>
    %c0_36 = arith.constant 0 : index
    %c0_37 = arith.constant 0 : index
    %c0_38 = arith.constant 0 : index
    %c0_39 = arith.constant 0 : index
    %63 = vector.load %arg10[%c0_36, %c0_37, %c0_38, %c0_39] : memref<2x10x10x16xf32, #tpu.memory_space<vmem>>, vector<2x1x10x16xf32>
    tpu.vector_store %arg10[%c0_36, %c0_37, %c0_38, %c0_39], %61 {strides = array<i32>} : memref<2x10x10x16xf32, #tpu.memory_space<vmem>>, vector<2x1x10x16xf32>,
    %c0_40 = arith.constant 0 : index
    %c9 = arith.constant 9 : index
    %c0_41 = arith.constant 0 : index
    %c0_42 = arith.constant 0 : index
    %64 = vector.load %arg10[%c0_40, %c9, %c0_41, %c0_42] : memref<2x10x10x16xf32, #tpu.memory_space<vmem>>, vector<2x1x10x16xf32>
    tpu.vector_store %arg10[%c0_40, %c9, %c0_41, %c0_42], %61 {strides = array<i32>} : memref<2x10x10x16xf32, #tpu.memory_space<vmem>>, vector<2x1x10x16xf32>,
    %c0_43 = arith.constant 0 : index
    %c0_44 = arith.constant 0 : index
    %c0_45 = arith.constant 0 : index
    %c0_46 = arith.constant 0 : index
    %65 = vector.load %arg10[%c0_43, %c0_44, %c0_45, %c0_46] : memref<2x10x10x16xf32, #tpu.memory_space<vmem>>, vector<2x10x1x16xf32>
    tpu.vector_store %arg10[%c0_43, %c0_44, %c0_45, %c0_46], %62 {strides = array<i32>} : memref<2x10x10x16xf32, #tpu.memory_space<vmem>>, vector<2x10x1x16xf32>,
    %c0_47 = arith.constant 0 : index
    %c0_48 = arith.constant 0 : index
    %c9_49 = arith.constant 9 : index
    %c0_50 = arith.constant 0 : index
    %66 = vector.load %arg10[%c0_47, %c0_48, %c9_49, %c0_50] : memref<2x10x10x16xf32, #tpu.memory_space<vmem>>, vector<2x10x1x16xf32>
    tpu.vector_store %arg10[%c0_47, %c0_48, %c9_49, %c0_50], %62 {strides = array<i32>} : memref<2x10x10x16xf32, #tpu.memory_space<vmem>>, vector<2x10x1x16xf32>,
    %67 = vector.shape_cast %60 : vector<128x16xf32> to vector<2x8x8x16xf32>
    %c0_51 = arith.constant 0 : index
    %c1_52 = arith.constant 1 : index
    %c1_53 = arith.constant 1 : index
    %c0_54 = arith.constant 0 : index
    %68 = vector.load %arg10[%c0_51, %c1_52, %c1_53, %c0_54] : memref<2x10x10x16xf32, #tpu.memory_space<vmem>>, vector<2x8x8x16xf32>
    tpu.vector_store %arg10[%c0_51, %c1_52, %c1_53, %c0_54], %67 {strides = array<i32>} : memref<2x10x10x16xf32, #tpu.memory_space<vmem>>, vector<2x8x8x16xf32>,
    %c0_55 = arith.constant 0 : index
    %c0_56 = arith.constant 0 : index
    %c0_57 = arith.constant 0 : index
    %c0_58 = arith.constant 0 : index
    %69 = vector.load %arg10[%c0_55, %c0_56, %c0_57, %c0_58] : memref<2x10x10x16xf32, #tpu.memory_space<vmem>>, vector<2x10x10x16xf32>
    %70 = arith.truncf %69 : vector<2x10x10x16xf32> to vector<2x10x10x16xbf16>
    %cst_59 = arith.constant 0.000000e+00 : f32
    %71 = vector.broadcast %cst_59 : f32 to vector<128x16xf32>
    %72 = vector.extract_strided_slice %70 {offsets = [0, 0, 0, 0], sizes = [2, 8, 8, 16], strides = [1, 1, 1, 1]} : vector<2x10x10x16xbf16> to vector<2x8x8x16xbf16>
    %73 = vector.shape_cast %72 : vector<2x8x8x16xbf16> to vector<128x16xbf16>
    %c0_60 = arith.constant 0 : index
    %c0_61 = arith.constant 0 : index
    %c0_62 = arith.constant 0 : index
    %74 = vector.load %arg5[%c0_60, %c0_61, %c0_62] : memref<9x16x16xbf16, #tpu.memory_space<vmem>>, vector<1x16x16xbf16>
    %75 = vector.shape_cast %74 : vector<1x16x16xbf16> to vector<16x16xbf16>
    %cst_63 = arith.constant dense<0.000000e+00> : vector<128x16xf32>
    %76 = tpu.matmul %73, %75, %cst_63 {dimension_numbers = #tpu.dot_dimension_numbers<[1], [0], [0], [1], [0, 0, 1, 1], [], []>} : vector<128x16xbf16>, vector<16x16xbf16>, vector<128x16xf32> -> vector<128x16xf32>
    %77 = arith.addf %71, %76 : vector<128x16xf32>
    %78 = vector.extract_strided_slice %70 {offsets = [0, 0, 1, 0], sizes = [2, 8, 8, 16], strides = [1, 1, 1, 1]} : vector<2x10x10x16xbf16> to vector<2x8x8x16xbf16>
    %79 = vector.shape_cast %78 : vector<2x8x8x16xbf16> to vector<128x16xbf16>
    %c1_64 = arith.constant 1 : index
    %c0_65 = arith.constant 0 : index
    %c0_66 = arith.constant 0 : index
    %80 = vector.load %arg5[%c1_64, %c0_65, %c0_66] : memref<9x16x16xbf16, #tpu.memory_space<vmem>>, vector<1x16x16xbf16>
    %81 = vector.shape_cast %80 : vector<1x16x16xbf16> to vector<16x16xbf16>
    %cst_67 = arith.constant dense<0.000000e+00> : vector<128x16xf32>
    %82 = tpu.matmul %79, %81, %cst_67 {dimension_numbers = #tpu.dot_dimension_numbers<[1], [0], [0], [1], [0, 0, 1, 1], [], []>} : vector<128x16xbf16>, vector<16x16xbf16>, vector<128x16xf32> -> vector<128x16xf32>
    %83 = arith.addf %77, %82 : vector<128x16xf32>
    %84 = vector.extract_strided_slice %70 {offsets = [0, 0, 2, 0], sizes = [2, 8, 8, 16], strides = [1, 1, 1, 1]} : vector<2x10x10x16xbf16> to vector<2x8x8x16xbf16>
    %85 = vector.shape_cast %84 : vector<2x8x8x16xbf16> to vector<128x16xbf16>
    %c2_68 = arith.constant 2 : index
    %c0_69 = arith.constant 0 : index
    %c0_70 = arith.constant 0 : index
    %86 = vector.load %arg5[%c2_68, %c0_69, %c0_70] : memref<9x16x16xbf16, #tpu.memory_space<vmem>>, vector<1x16x16xbf16>
    %87 = vector.shape_cast %86 : vector<1x16x16xbf16> to vector<16x16xbf16>
    %cst_71 = arith.constant dense<0.000000e+00> : vector<128x16xf32>
    %88 = tpu.matmul %85, %87, %cst_71 {dimension_numbers = #tpu.dot_dimension_numbers<[1], [0], [0], [1], [0, 0, 1, 1], [], []>} : vector<128x16xbf16>, vector<16x16xbf16>, vector<128x16xf32> -> vector<128x16xf32>
    %89 = arith.addf %83, %88 : vector<128x16xf32>
    %90 = vector.extract_strided_slice %70 {offsets = [0, 1, 0, 0], sizes = [2, 8, 8, 16], strides = [1, 1, 1, 1]} : vector<2x10x10x16xbf16> to vector<2x8x8x16xbf16>
    %91 = vector.shape_cast %90 : vector<2x8x8x16xbf16> to vector<128x16xbf16>
    %c3_72 = arith.constant 3 : index
    %c0_73 = arith.constant 0 : index
    %c0_74 = arith.constant 0 : index
    %92 = vector.load %arg5[%c3_72, %c0_73, %c0_74] : memref<9x16x16xbf16, #tpu.memory_space<vmem>>, vector<1x16x16xbf16>
    %93 = vector.shape_cast %92 : vector<1x16x16xbf16> to vector<16x16xbf16>
    %cst_75 = arith.constant dense<0.000000e+00> : vector<128x16xf32>
    %94 = tpu.matmul %91, %93, %cst_75 {dimension_numbers = #tpu.dot_dimension_numbers<[1], [0], [0], [1], [0, 0, 1, 1], [], []>} : vector<128x16xbf16>, vector<16x16xbf16>, vector<128x16xf32> -> vector<128x16xf32>
    %95 = arith.addf %89, %94 : vector<128x16xf32>
    %96 = vector.extract_strided_slice %70 {offsets = [0, 1, 1, 0], sizes = [2, 8, 8, 16], strides = [1, 1, 1, 1]} : vector<2x10x10x16xbf16> to vector<2x8x8x16xbf16>
    %97 = vector.shape_cast %96 : vector<2x8x8x16xbf16> to vector<128x16xbf16>
    %c4_76 = arith.constant 4 : index
    %c0_77 = arith.constant 0 : index
    %c0_78 = arith.constant 0 : index
    %98 = vector.load %arg5[%c4_76, %c0_77, %c0_78] : memref<9x16x16xbf16, #tpu.memory_space<vmem>>, vector<1x16x16xbf16>
    %99 = vector.shape_cast %98 : vector<1x16x16xbf16> to vector<16x16xbf16>
    %cst_79 = arith.constant dense<0.000000e+00> : vector<128x16xf32>
    %100 = tpu.matmul %97, %99, %cst_79 {dimension_numbers = #tpu.dot_dimension_numbers<[1], [0], [0], [1], [0, 0, 1, 1], [], []>} : vector<128x16xbf16>, vector<16x16xbf16>, vector<128x16xf32> -> vector<128x16xf32>
    %101 = arith.addf %95, %100 : vector<128x16xf32>
    %102 = vector.extract_strided_slice %70 {offsets = [0, 1, 2, 0], sizes = [2, 8, 8, 16], strides = [1, 1, 1, 1]} : vector<2x10x10x16xbf16> to vector<2x8x8x16xbf16>
    %103 = vector.shape_cast %102 : vector<2x8x8x16xbf16> to vector<128x16xbf16>
    %c5_80 = arith.constant 5 : index
    %c0_81 = arith.constant 0 : index
    %c0_82 = arith.constant 0 : index
    %104 = vector.load %arg5[%c5_80, %c0_81, %c0_82] : memref<9x16x16xbf16, #tpu.memory_space<vmem>>, vector<1x16x16xbf16>
    %105 = vector.shape_cast %104 : vector<1x16x16xbf16> to vector<16x16xbf16>
    %cst_83 = arith.constant dense<0.000000e+00> : vector<128x16xf32>
    %106 = tpu.matmul %103, %105, %cst_83 {dimension_numbers = #tpu.dot_dimension_numbers<[1], [0], [0], [1], [0, 0, 1, 1], [], []>} : vector<128x16xbf16>, vector<16x16xbf16>, vector<128x16xf32> -> vector<128x16xf32>
    %107 = arith.addf %101, %106 : vector<128x16xf32>
    %108 = vector.extract_strided_slice %70 {offsets = [0, 2, 0, 0], sizes = [2, 8, 8, 16], strides = [1, 1, 1, 1]} : vector<2x10x10x16xbf16> to vector<2x8x8x16xbf16>
    %109 = vector.shape_cast %108 : vector<2x8x8x16xbf16> to vector<128x16xbf16>
    %c6_84 = arith.constant 6 : index
    %c0_85 = arith.constant 0 : index
    %c0_86 = arith.constant 0 : index
    %110 = vector.load %arg5[%c6_84, %c0_85, %c0_86] : memref<9x16x16xbf16, #tpu.memory_space<vmem>>, vector<1x16x16xbf16>
    %111 = vector.shape_cast %110 : vector<1x16x16xbf16> to vector<16x16xbf16>
    %cst_87 = arith.constant dense<0.000000e+00> : vector<128x16xf32>
    %112 = tpu.matmul %109, %111, %cst_87 {dimension_numbers = #tpu.dot_dimension_numbers<[1], [0], [0], [1], [0, 0, 1, 1], [], []>} : vector<128x16xbf16>, vector<16x16xbf16>, vector<128x16xf32> -> vector<128x16xf32>
    %113 = arith.addf %107, %112 : vector<128x16xf32>
    %114 = vector.extract_strided_slice %70 {offsets = [0, 2, 1, 0], sizes = [2, 8, 8, 16], strides = [1, 1, 1, 1]} : vector<2x10x10x16xbf16> to vector<2x8x8x16xbf16>
    %115 = vector.shape_cast %114 : vector<2x8x8x16xbf16> to vector<128x16xbf16>
    %c7_88 = arith.constant 7 : index
    %c0_89 = arith.constant 0 : index
    %c0_90 = arith.constant 0 : index
    %116 = vector.load %arg5[%c7_88, %c0_89, %c0_90] : memref<9x16x16xbf16, #tpu.memory_space<vmem>>, vector<1x16x16xbf16>
    %117 = vector.shape_cast %116 : vector<1x16x16xbf16> to vector<16x16xbf16>
    %cst_91 = arith.constant dense<0.000000e+00> : vector<128x16xf32>
    %118 = tpu.matmul %115, %117, %cst_91 {dimension_numbers = #tpu.dot_dimension_numbers<[1], [0], [0], [1], [0, 0, 1, 1], [], []>} : vector<128x16xbf16>, vector<16x16xbf16>, vector<128x16xf32> -> vector<128x16xf32>
    %119 = arith.addf %113, %118 : vector<128x16xf32>
    %120 = vector.extract_strided_slice %70 {offsets = [0, 2, 2, 0], sizes = [2, 8, 8, 16], strides = [1, 1, 1, 1]} : vector<2x10x10x16xbf16> to vector<2x8x8x16xbf16>
    %121 = vector.shape_cast %120 : vector<2x8x8x16xbf16> to vector<128x16xbf16>
    %c8_92 = arith.constant 8 : index
    %c0_93 = arith.constant 0 : index
    %c0_94 = arith.constant 0 : index
    %122 = vector.load %arg5[%c8_92, %c0_93, %c0_94] : memref<9x16x16xbf16, #tpu.memory_space<vmem>>, vector<1x16x16xbf16>
    %123 = vector.shape_cast %122 : vector<1x16x16xbf16> to vector<16x16xbf16>
    %cst_95 = arith.constant dense<0.000000e+00> : vector<128x16xf32>
    %124 = tpu.matmul %121, %123, %cst_95 {dimension_numbers = #tpu.dot_dimension_numbers<[1], [0], [0], [1], [0, 0, 1, 1], [], []>} : vector<128x16xbf16>, vector<16x16xbf16>, vector<128x16xf32> -> vector<128x16xf32>
    %125 = arith.addf %119, %124 : vector<128x16xf32>
    %c0_96 = arith.constant 0 : index
    %c0_97 = arith.constant 0 : index
    %126 = vector.load %arg6[%c0_96, %c0_97] : memref<1x16xf32, #tpu.memory_space<vmem>>, vector<1x16xf32>
    %127 = vector.broadcast %126 : vector<1x16xf32> to vector<128x16xf32>
    %128 = arith.addf %125, %127 : vector<128x16xf32>
    %c0_98 = arith.constant 0 : index
    %c0_99 = arith.constant 0 : index
    %c0_100 = arith.constant 0 : index
    %129 = vector.load %arg2[%c0_98, %c0_99, %c0_100] : memref<2x64x8xbf16, #tpu.memory_space<vmem>>, vector<2x64x8xbf16>
    %130 = vector.shape_cast %129 : vector<2x64x8xbf16> to vector<128x8xbf16>
    %c0_101 = arith.constant 0 : index
    %c0_102 = arith.constant 0 : index
    %131 = vector.load %arg7[%c0_101, %c0_102] : memref<8x16xbf16, #tpu.memory_space<vmem>>, vector<8x16xbf16>
    %cst_103 = arith.constant dense<0.000000e+00> : vector<128x16xf32>
    %132 = tpu.matmul %130, %131, %cst_103 {dimension_numbers = #tpu.dot_dimension_numbers<[1], [0], [0], [1], [0, 0, 1, 1], [], []>} : vector<128x8xbf16>, vector<8x16xbf16>, vector<128x16xf32> -> vector<128x16xf32>
    %c0_104 = arith.constant 0 : index
    %c0_105 = arith.constant 0 : index
    %133 = vector.load %arg8[%c0_104, %c0_105] : memref<1x16xf32, #tpu.memory_space<vmem>>, vector<1x16xf32>
    %134 = vector.broadcast %133 : vector<1x16xf32> to vector<128x16xf32>
    %135 = arith.addf %132, %134 : vector<128x16xf32>
    %136 = arith.addf %128, %135 : vector<128x16xf32>
    %137 = vector.shape_cast %136 : vector<128x16xf32> to vector<2x64x16xf32>
    %c0_106 = arith.constant 0 : index
    %c0_107 = arith.constant 0 : index
    %c0_108 = arith.constant 0 : index
    %138 = vector.load %arg9[%c0_106, %c0_107, %c0_108] : memref<2x64x16xf32, #tpu.memory_space<vmem>>, vector<2x64x16xf32>
    tpu.vector_store %arg9[%c0_106, %c0_107, %c0_108], %137 {strides = array<i32>} : memref<2x64x16xf32, #tpu.memory_space<vmem>>, vector<2x64x16xf32>,
    return
  }
  func.func @transform_0(%arg0: i32) -> (i32, i32, i32, i32) {
    %c0_i32 = arith.constant 0 : i32
    %c0_i32_0 = arith.constant 0 : i32
    %c0_i32_1 = arith.constant 0 : i32
    %c0_i32_2 = arith.constant 0 : i32
    return %arg0, %c0_i32, %c0_i32_0, %c0_i32_1 : i32, i32, i32, i32
  }
  func.func @transform_1(%arg0: i32) -> (i32, i32, i32) {
    %c0_i32 = arith.constant 0 : i32
    %c0_i32_0 = arith.constant 0 : i32
    %c0_i32_1 = arith.constant 0 : i32
    return %arg0, %c0_i32, %c0_i32_0 : i32, i32, i32
  }
  func.func @transform_2(%arg0: i32) -> (i32, i32, i32) {
    %c0_i32 = arith.constant 0 : i32
    %c0_i32_0 = arith.constant 0 : i32
    %c0_i32_1 = arith.constant 0 : i32
    %c0_i32_2 = arith.constant 0 : i32
    return %c0_i32, %c0_i32_0, %c0_i32_1 : i32, i32, i32
  }
  func.func @transform_3(%arg0: i32) -> (i32, i32) {
    %c0_i32 = arith.constant 0 : i32
    %c0_i32_0 = arith.constant 0 : i32
    %c0_i32_1 = arith.constant 0 : i32
    return %c0_i32, %c0_i32_0 : i32, i32
  }
  func.func @transform_4(%arg0: i32) -> (i32, i32, i32) {
    %c0_i32 = arith.constant 0 : i32
    %c0_i32_0 = arith.constant 0 : i32
    %c0_i32_1 = arith.constant 0 : i32
    %c0_i32_2 = arith.constant 0 : i32
    return %c0_i32, %c0_i32_0, %c0_i32_1 : i32, i32, i32
  }
  func.func @transform_5(%arg0: i32) -> (i32, i32) {
    %c0_i32 = arith.constant 0 : i32
    %c0_i32_0 = arith.constant 0 : i32
    %c0_i32_1 = arith.constant 0 : i32
    return %c0_i32, %c0_i32_0 : i32, i32
  }
  func.func @transform_6(%arg0: i32) -> (i32, i32) {
    %c0_i32 = arith.constant 0 : i32
    %c0_i32_0 = arith.constant 0 : i32
    %c0_i32_1 = arith.constant 0 : i32
    return %c0_i32, %c0_i32_0 : i32, i32
  }
  func.func @transform_7(%arg0: i32) -> (i32, i32) {
    %c0_i32 = arith.constant 0 : i32
    %c0_i32_0 = arith.constant 0 : i32
    %c0_i32_1 = arith.constant 0 : i32
    return %c0_i32, %c0_i32_0 : i32, i32
  }
  func.func @transform_8(%arg0: i32) -> (i32, i32, i32) {
    %c0_i32 = arith.constant 0 : i32
    %c0_i32_0 = arith.constant 0 : i32
    %c0_i32_1 = arith.constant 0 : i32
    return %arg0, %c0_i32, %c0_i32_0 : i32, i32, i32
  }
}

</mosaic_0001>

<bundles_post_ra>
// kernel: block_forward.1
= control target key start
LH: loop header
LB: loop body
LE: loop exit
PB: predicated region body
PF: predicated region fallthrough
CT: control target
= control target key end

     0   :  { %vm201_vm0 = vcmask 1043456   ;;  %vm176_vm1 = vcmask 64512   ;;  %vm370_vm2 = vsmask.f32 3328  ;;  %vm371_vm3 = vsmask.f32 7440  ;;  %s5688_s0 = inlined_call_operand.vmem [shape: bf16[2,36,9,8], index: 0, kind: input, shape index: {}]   ;;  %s5689_s1 = inlined_call_operand.vmem [shape: bf16[2,64,8], index: 1, kind: input, shape index: {}]   ;;  %s5690_s2 = inlined_call_operand.vmem [shape: bf16[9,8,16], index: 2, kind: input, shape index: {}]   ;;  %s5691_s3 = inlined_call_operand.vmem [shape: f32[1,16], index: 3, kind: input, shape index: {}]   ;;  %s5692_s4 = inlined_call_operand.vmem [shape: bf16[9,16,16], index: 4, kind: input, shape index: {}]   ;;  %s5693_s5 = inlined_call_operand.vmem [shape: f32[1,16], index: 5, kind: input, shape index: {}]   ;;  %s5694_s6 = inlined_call_operand.vmem [shape: bf16[8,16], index: 6, kind: input, shape index: {}]   ;;  %s5695_s7 = inlined_call_operand.vmem [shape: f32[1,16], index: 7, kind: input, shape index: {}]   ;;  %s5696_s8 = inlined_call_operand.hbm [shape: f32[2,64,16], index: 8, kind: output, shape index: {}]  }
   0x1   :  { %v3373_v0 = vld [vmem:[%s5690_s2 + $0x4] sm:$0xf]  ;;  %v133_v1 = vld [vmem:[%s5690_s2] sm:$0xf]  ;;  %v49_v4 = vld [vmem:[%s5688_s0 + $0x48] sm:$0xf] }
   0x2   :  { %v203_v2 = vsel %vm201_vm0, %v3373_v0, 0  ;;  %v319_v3 = vsel %vm201_vm0, %v133_v1, 0  ;;  %v50_v5 = vld [vmem:[%s5688_s0 + $0x50] sm:$0xf]  ;;  %v152_v6 = vunpack.c.l.b16 %v49_v4  ;;  %v3837_v8 = vld [vmem:[%s5688_s0 + $0x188] sm:$0xf]  ;;  %vm3888_vm4 = vmor %vm370_vm2, %vm371_vm3 }
   0x3   :  { %212 = vmatpush.bf16.msra.mxu0 %v203_v2  ;;  %3734 = vmatpush.bf16.msra.mxu3 %v203_v2  ;;  %v153_v7 = vunpack.c.l.b16 %v50_v5  ;;  %5738 = vst [vmem:[#allocation6_spill] sm:$0xff] %v3837_v8  ;;  %v3842_v9 = vld [vmem:[%s5688_s0 + $0x190] sm:$0xf]  ;;  %v31_v10 = vld [vmem:[%s5688_s0] sm:$0xf]  ;;  %v5700_v11 = vunpack.c.l.b16 %v3837_v8 }
   0x4   :  { %5739 = vst [vmem:[#allocation7_spill] sm:$0xff] %v3842_v9  ;;  %328 = vmatpush.bf16.msra.mxu1 %v319_v3  ;;  %v5699_v12 = vunpack.c.l.b16 %v3842_v9  ;;  %v3852_v13 = vld [vmem:[%s5688_s0 + $0x8] sm:$0xf]  ;;  %v270_v14 = vunpack.c.l.b16 %v31_v10  ;;  %v374_v15 = vshrl.u32 %v31_v10, 16  ;;  %v377_v19 = vshll.u32 %v31_v10, 16 }
   0x5   :  { %v3390_v16 = vld [vmem:[%s5690_s2 + $0x8] sm:$0xf]  ;;  %v168_v17 = vpack.c.b16 %v153_v7, %v152_v6  ;;  %v5718_v18 = vunpack.c.l.b16 %v3852_v13  ;;  %v388_v20 = vshrl.u32 %v3852_v13, 16  ;;  %v3440_v21 = vld [vmem:[%s5690_s2 + $0x10] sm:$0xf]  ;;  %v391_v25 = vshll.u32 %v3852_v13, 16 }
   0x6   :  { %v32_v22 = vld [vmem:[%s5688_s0 + $0x4] sm:$0x1]  ;;  %v174_v23 = vpack.c.b16 %v5699_v12, %v5700_v11  ;;  %v376_v24 = vrot.slane %v374_v15, 4  ;;  %v648_v26 = vsel %vm201_vm0, %v3390_v16, 0  ;;  %v34_v27 = vld [vmem:[%s5688_s0 + $0xc] sm:$0x1] }
   0x7   :  { %3735 = vmatpush.bf16.msrb.mxu3 %v319_v3  ;;  %3374 = vmatmul.msk.bf16.vlgmr.msra.gmra.mxu0 %vm176_vm1, %v168_v17  ;;  %v286_v28 = vpack.c.b16 %v5718_v18, %v270_v14  ;;  %v379_v29 = vrot.slane %v377_v19, 5  ;;  %v390_v30 = vrot.slane %v388_v20, 4  ;;  %v916_v31 = vsel %vm201_vm0, %v3440_v21, 0  ;;  %v51_v32 = vld [vmem:[%s5688_s0 + $0x58] sm:$0xf] }
   0x8   :  { %657 = vmatpush.bf16.msra.mxu2 %v648_v26  ;;  %3380 = vmatmul.msk.bf16.vlgmr.msra.gmra.mxu3 %vm176_vm1, %v174_v23  ;;  %v393_v33 = vrot.slane %v391_v25, 5  ;;  %v383_v34 = vshll.u32 %v32_v22, 16  ;;  %v397_v36 = vshll.u32 %v34_v27, 16  ;;  %v3886_v37 = vld [vmem:[%s5688_s0 + $0x60] sm:$0xf]  ;;  %v154_v38 = vunpack.c.l.b16 %v51_v32 }
   0x9   :  { %925 = vmatpush.bf16.msrb.mxu0 %v916_v31  ;;  %3382 = vmatmul.msk.bf16.vlgmr.msra.gmra.mxu1 %vm176_vm1, %v286_v28  ;;  %v380_v35 = vor.u32 %v379_v29, %v376_v24  ;;  %v3895_v42 = vld [vmem:[%s5688_s0 + $0x198] sm:$0xf]  ;;  %v3900_v43 = vld [vmem:[%s5688_s0 + $0x10] sm:$0xf]  ;;  %v3907_v47 = vld [vmem:[%s5688_s0 + $0x1a0] sm:$0xf]  ;;  %v5705_v50 = vunpack.c.l.b16 %v3886_v37 }
   0xa   :  { %v385_v40 = vrot.slane %v383_v34, 5  ;;  %v394_v41 = vor.u32 %v393_v33, %v390_v30  ;;  %5742 = vst [vmem:[#allocation8_spill] sm:$0xff] %v3895_v42  ;;  %v399_v45 = vrot.slane %v397_v36, 5  ;;  %v3902_v46 = vpack.c.b16 %v154_v38, %v153_v7  ;;  %v3912_v48 = vld [vmem:[%s5688_s0 + $0x18] sm:$0xf] }
   0xb   :  { %3736 = vmatpush.bf16.msra.mxu3 %v648_v26  ;;  %v381_v44 = vrot.slane %v380_v35, 4  ;;  %5743 = vst [vmem:[#allocation9_spill] sm:$0xff] %v3907_v47  ;;  %v5698_v52 = vunpack.c.l.b16 %v3895_v42  ;;  %v402_v53 = vshrl.u32 %v3900_v43, 16  ;;  %v405_v54 = vshll.u32 %v3900_v43, 16  ;;  %v36_v55 = vld [vmem:[%s5688_s0 + $0x14] sm:$0x1] }
   0xc   :  { %v395_v49 = vrot.slane %v394_v41, 4  ;;  %v38_v56 = vld [vmem:[%s5688_s0 + $0x1c] sm:$0x1]  ;;  %v5697_v59 = vunpack.c.l.b16 %v3907_v47  ;;  %v416_v60 = vshrl.u32 %v3912_v48, 16  ;;  %v419_v0 = vshll.u32 %v3912_v48, 16 }
   0xd   :  { %v386_v51 = vsel %vm3888_vm4, %v381_v44, %v385_v40  ;;  %v404_v62 = vrot.slane %v402_v53, 4  ;;  %v407_v63 = vrot.slane %v405_v54, 5  ;;  %v5717_v1 = vunpack.c.l.b16 %v3900_v43  ;;  %v3946_v21 = vld [vmem:[%s5688_s0 + $0x20] sm:$0xf] }
   0xe   :  { %v400_v57 = vsel %vm3888_vm4, %v395_v49, %v399_v45  ;;  %v599_v58 = vunpack.c.l.b16 %v386_v51  ;;  %v418_v2 = vrot.slane %v416_v60, 4  ;;  %v411_v3 = vshll.u32 %v36_v55, 16 }
   0xf   :  { %v3930_v61 = vunpack.c.l.b16 %v400_v57  ;;  %v425_v4 = vshll.u32 %v38_v56, 16  ;;  %v5716_v6 = vunpack.c.l.b16 %v3912_v48  ;;  %v421_v7 = vrot.slane %v419_v0, 5 }
  0x10   :  { %v408_v10 = vor.u32 %v407_v63, %v404_v62  ;;  %v413_v14 = vrot.slane %v411_v3, 5  ;;  %v169_v15 = vpack.c.b16 %v5705_v50, %v154_v38  ;;  %v175_v19 = vpack.c.b16 %v5697_v59, %v5698_v52 }
  0x11   :  { %v615_v5 = vpack.c.b16 %v3930_v61, %v599_v58  ;;  %v422_v17 = vor.u32 %v421_v7, %v418_v2  ;;  %v427_v20 = vrot.slane %v425_v4, 5 }
  0x12   :  { %v409_v16 = vrot.slane %v408_v10, 4 }
  0x13   :  { %3391 = vmatmul.msk.bf16.vlgmr.msra.gmra.mxu2 %vm176_vm1, %v615_v5 }
  0x14   :  { %13 = vsyncpa [#allocation4], 0  ;;  %v287_v22 = vpack.c.b16 %v5716_v6, %v5717_v1  ;;  %v414_v23 = vsel %vm3888_vm4, %v409_v16, %v413_v14  ;;  %v423_v24 = vrot.slane %v422_v17, 4  ;;  %v3957_v25 = vld [vmem:[%s5688_s0 + $0x28] sm:$0xf]  ;;  %v430_v27 = vshrl.u32 %v3946_v21, 16 }
  0x15   :  { %v3959_v26 = vunpack.c.l.b16 %v414_v23  ;;  %v433_v28 = vshll.u32 %v3946_v21, 16  ;;  %v444_v31 = vshrl.u32 %v3957_v25, 16  ;;  %v447_v32 = vshll.u32 %v3957_v25, 16  ;;  %v3977_v34 = vld [vmem:[%s5688_s0 + $0x68] sm:$0xf]  ;;  %s3361_s26 = sshll.u32 %s5696_s8, 4  ;;  %s3362_s26 = int_to_ptr.hbm [resolvable:$true] %s3361_s26 }
  0x16   :  { %v428_v29 = vsel %vm3888_vm4, %v423_v24, %v427_v20  ;;  %v432_v35 = vrot.slane %v430_v27, 4  ;;  %v3982_v38 = vld [vmem:[%s5688_s0 + $0x70] sm:$0xf]  ;;  %v40_v44 = vld [vmem:[%s5688_s0 + $0x24] sm:$0x1]  ;;  %v5704_v53 = vunpack.c.l.b16 %v3977_v34  ;;  %v5715_v0 = vunpack.c.l.b16 %v3946_v21  ;;  %s3773_s27 = smov 128  }
  0x17   :  { %3375 = vmatmul.msk.bf16.gmra.mxu0 %vm176_vm1, %v169_v15  ;;  %v3972_v33 = vunpack.c.l.b16 %v428_v29  ;;  %v435_v36 = vrot.slane %v433_v28, 5  ;;  %v446_v40 = vrot.slane %v444_v31, 4  ;;  %v449_v41 = vrot.slane %v447_v32, 5  ;;  %v3990_v45 = vld [vmem:[%s5688_s0 + $0x140] sm:$0xf]  ;;  %s3774_s28 = smov 8  }
  0x18   :  { %3381 = vmatmul.msk.bf16.gmra.mxu3 %vm176_vm1, %v175_v19  ;;  %v3995_v49 = vld [vmem:[%s5688_s0 + $0x148] sm:$0xf]  ;;  %v42_v51 = vld [vmem:[%s5688_s0 + $0x2c] sm:$0x1]  ;;  %v5703_v55 = vunpack.c.l.b16 %v3982_v38  ;;  %v439_v57 = vshll.u32 %v40_v44, 16  ;;  %v5709_v58 = vunpack.c.l.b16 %v3990_v45  ;;  %v5712_v2 = vunpack.c.l.b16 %v3957_v25 }
  0x19   :  { %3383 = vmatmul.msk.bf16.gmra.mxu1 %vm176_vm1, %v287_v22  ;;  %v616_v54 = vpack.c.b16 %v3972_v33, %v3959_v26  ;;  %v436_v56 = vor.u32 %v435_v36, %v432_v35  ;;  %v5708_v60 = vunpack.c.l.b16 %v3995_v49  ;;  %v450_v62 = vor.u32 %v449_v41, %v446_v40  ;;  %v4020_v15 = vld [vmem:[%s5688_s0 + $0x30] sm:$0xf]  ;;  %v4029_v17 = vld [vmem:[%s5688_s0 + $0x38] sm:$0xf]  ;;  %v3399_v35 = vld [vmem:[%s5690_s2 + $0xc] sm:$0xf] }
  0x1a   :  { %v453_v63 = vshll.u32 %v42_v51, 16  ;;  %v170_v3 = vpack.c.b16 %v5703_v55, %v5704_v53  ;;  %v441_v5 = vrot.slane %v439_v57, 5  ;;  %v288_v16 = vpack.c.b16 %v5712_v2, %v5715_v0  ;;  %v4054_v40 = vld [vmem:[%s5688_s0 + $0x78] sm:$0xf]  ;;  %v4059_v41 = vld [vmem:[%s5688_s0 + $0x80] sm:$0xf] }
  0x1b   :  { %v437_v4 = vrot.slane %v436_v56, 4  ;;  %v292_v7 = vpack.c.b16 %v5708_v60, %v5709_v58  ;;  %v451_v10 = vrot.slane %v450_v62, 4  ;;  %v458_v20 = vshrl.u32 %v4020_v15, 16  ;;  %v4064_v44 = vld [vmem:[%s5688_s0 + $0x150] sm:$0xf] }
  0x1c   :  { %v455_v14 = vrot.slane %v453_v63, 5  ;;  %v461_v22 = vshll.u32 %v4020_v15, 16  ;;  %v542_v23 = vshrl.u32 %v3990_v45, 16  ;;  %v472_v27 = vshrl.u32 %v4029_v17, 16  ;;  %v4071_v57 = vld [vmem:[%s5688_s0 + $0x158] sm:$0xf] }
  0x1d   :  { %v442_v19 = vsel %vm3888_vm4, %v437_v4, %v441_v5  ;;  %v475_v28 = vshll.u32 %v4029_v17, 16  ;;  %v545_v29 = vshll.u32 %v3990_v45, 16  ;;  %v556_v31 = vshrl.u32 %v3995_v49, 16  ;;  %v44_v5 = vld [vmem:[%s5688_s0 + $0x34] sm:$0x1] }
  0x1e   :  { %v456_v24 = vsel %vm3888_vm4, %v451_v10, %v455_v14  ;;  %v559_v32 = vshll.u32 %v3995_v49, 16  ;;  %v4049_v36 = vunpack.c.l.b16 %v442_v19  ;;  %v463_v56 = vrot.slane %v461_v22, 5  ;;  %v46_v19 = vld [vmem:[%s5688_s0 + $0x3c] sm:$0x1]  ;;  %v4100_v11 = vld [vmem:[%s5688_s0 + $0x128] sm:$0xf] }
  0x1f   :  { %v4066_v51 = vunpack.c.l.b16 %v456_v24  ;;  %v782_v62 = vsel %vm201_vm0, %v3399_v35, 0  ;;  %v544_v63 = vrot.slane %v542_v23, 4  ;;  %v477_v4 = vrot.slane %v475_v28, 5 }
  0x20   :  { %v558_v10 = vrot.slane %v556_v31, 4  ;;  %v561_v14 = vrot.slane %v559_v32, 5  ;;  %v5711_v22 = vunpack.c.l.b16 %v4020_v15  ;;  %v5710_v23 = vunpack.c.l.b16 %v4029_v17 }
  0x21   :  { %v5707_v24 = vunpack.c.l.b16 %v4064_v44  ;;  %v5706_v28 = vunpack.c.l.b16 %v4071_v57  ;;  %v467_v31 = vshll.u32 %v44_v5, 16  ;;  %v481_v35 = vshll.u32 %v46_v19, 16 }
  0x22   :  { %v562_v52 = vor.u32 %v561_v14, %v558_v10  ;;  %vm1705_vm5 = vcmask 130048   ;;  %vm1716_vm6 = vcmask 122880   ;;  %vm1707_vm7 = vcmask 123904  }
  0x23   :  { %3392 = vmatmul.msk.bf16.gmra.mxu2 %vm176_vm1, %v616_v54  ;;  %v460_v54 = vrot.slane %v458_v20, 4  ;;  %v5701_v20 = vunpack.c.l.b16 %v4059_v41  ;;  %v469_v5 = vrot.slane %v467_v31, 5  ;;  %v483_v10 = vrot.slane %v481_v35, 5 }
  0x24   :  { %v563_v50 = vrot.slane %v562_v52, 4  ;;  %v570_v52 = vshrl.u32 %v4064_v44, 16  ;;  %vm2321_vm8 = vcmask 1042432   ;;  %vm2322_vm9 = vcmask 1046532  }
  0x25   :  { %vm4947_vm10 = vmor %vm2321_vm8, %vm2322_vm9 }
  0x27   :  { %3376 = vmatmul.msk.bf16.gmra.mxu0 %vm176_vm1, %v170_v3  ;;  %v474_v3 = vrot.slane %v472_v27, 4  ;;  %v617_v27 = vpack.c.b16 %v4066_v51, %v4049_v36 }
  0x28   :  { %3388 = vmatmul.msk.bf16.vlgmr.msrb.gmra.mxu3 %vm176_vm1, %v292_v7  ;;  %v547_v7 = vrot.slane %v545_v29, 5  ;;  %v464_v29 = vor.u32 %v463_v56, %v460_v54  ;;  %v91_v54 = vld [vmem:[%s5688_s0 + $0x144] sm:$0x1]  ;;  %v93_v56 = vld [vmem:[%s5688_s0 + $0x14c] sm:$0x1] }
  0x29   :  { %3384 = vmatmul.msk.bf16.gmra.mxu1 %vm176_vm1, %v288_v16  ;;  %791 = vmatpush.bf16.msrb.mxu3 %v782_v62  ;;  %v5702_v16 = vunpack.c.l.b16 %v4054_v40  ;;  %v478_v32 = vor.u32 %v477_v4, %v474_v3  ;;  %v4091_v62 = vld [vmem:[%s5688_s0 + $0x120] sm:$0xf]  ;;  %v293_v3 = vpack.c.b16 %v5706_v28, %v5707_v24  ;;  %v565_v55 = vshll.u32 %v93_v56, 16 }
  0x2a   :  { %v548_v59 = vor.u32 %v547_v7, %v544_v63  ;;  %v289_v63 = vpack.c.b16 %v5710_v23, %v5711_v22  ;;  %v465_v4 = vrot.slane %v464_v29, 4  ;;  %v486_v14 = vshrl.u32 %v4091_v62, 16 }
  0x2b   :  { %v171_v12 = vpack.c.b16 %v5701_v20, %v5702_v16  ;;  %v479_v7 = vrot.slane %v478_v32, 4  ;;  %v489_v19 = vshll.u32 %v4091_v62, 16  ;;  %v503_v20 = vshll.u32 %v4100_v11, 16 }
  0x2c   :  { %v551_v16 = vshll.u32 %v91_v54, 16  ;;  %v549_v53 = vrot.slane %v548_v59, 4  ;;  %v470_v29 = vsel %vm3888_vm4, %v465_v4, %v469_v5  ;;  %v488_v32 = vrot.slane %v486_v14, 4 }
  0x2d   :  { %v484_v31 = vsel %vm3888_vm4, %v479_v7, %v483_v10  ;;  %v491_v35 = vrot.slane %v489_v19, 5  ;;  %v505_v28 = vrot.slane %v503_v20, 5  ;;  %v567_v56 = vrot.slane %v565_v55, 5  ;;  %v100_v55 = vld [vmem:[%s5688_s0 + $0x168] sm:$0xf] }
  0x2e   :  { %v553_v54 = vrot.slane %v551_v16, 5  ;;  %v573_v59 = vshll.u32 %v4064_v44, 16  ;;  %v587_v4 = vshll.u32 %v4071_v57, 16  ;;  %v4138_v5 = vunpack.c.l.b16 %v470_v29  ;;  %v4148_v20 = vld [vmem:[%s5688_s0 + $0x170] sm:$0xf] }
  0x2f   :  { %v4140_v16 = vunpack.c.l.b16 %v484_v31  ;;  %v492_v7 = vor.u32 %v491_v35, %v488_v32  ;;  %v568_v19 = vsel %vm3888_vm4, %v563_v50, %v567_v56  ;;  %v572_v31 = vrot.slane %v570_v52, 4  ;;  %v95_v32 = vld [vmem:[%s5688_s0 + $0x154] sm:$0x1]  ;;  %v97_v50 = vld [vmem:[%s5688_s0 + $0x15c] sm:$0x1] }
  0x30   :  { %v554_v14 = vsel %vm3888_vm4, %v549_v53, %v553_v54  ;;  %v575_v24 = vrot.slane %v573_v59, 5  ;;  %v589_v58 = vrot.slane %v587_v4, 5  ;;  %v160_v22 = vunpack.c.l.b16 %v100_v55 }
  0x31   :  { %v618_v23 = vpack.c.b16 %v4140_v16, %v4138_v5  ;;  %v5713_v2 = vunpack.c.l.b16 %v4148_v20  ;;  %v5714_v53 = vunpack.c.l.b16 %v4100_v11  ;;  %v4167_v35 = vunpack.c.l.b16 %v568_v19 }
  0x32   :  { %v493_v54 = vrot.slane %v492_v7, 4  ;;  %v576_v59 = vor.u32 %v575_v24, %v572_v31  ;;  %v4182_v24 = vld [vmem:[%s5688_s0 + $0x138] sm:$0xf] }
  0x33   :  { %3393 = vmatmul.msk.bf16.gmra.mxu2 %vm176_vm1, %v617_v27  ;;  %v500_v27 = vshrl.u32 %v4100_v11, 16  ;;  %5744 = vst [vmem:[#allocation10_spill] sm:$0xff] %v4167_v35  ;;  %v172_v55 = vpack.c.b16 %v5713_v2, %v160_v22  ;;  %v528_v31 = vshrl.u32 %v4182_v24, 16  ;;  %v89_v2 = vld [vmem:[%s5688_s0 + $0x13c] sm:$0x1] }
  0x35   :  { %v502_v30 = vrot.slane %v500_v27, 4 }
  0x37   :  { %3377 = vmatmul.msk.bf16.gmra.mxu0 %vm176_vm1, %v171_v12  ;;  %v83_v12 = vld [vmem:[%s5688_s0 + $0x124] sm:$0x1]  ;;  %v506_v27 = vor.u32 %v505_v28, %v502_v30  ;;  %v278_v30 = vunpack.c.l.b16 %v4091_v62  ;;  %v4165_v28 = vunpack.c.l.b16 %v554_v14  ;;  %v4177_v14 = vld [vmem:[%s5688_s0 + $0x130] sm:$0xf] }
  0x38   :  { %3389 = vmatmul.msk.bf16.gmra.mxu3 %vm176_vm1, %v293_v3  ;;  %v584_v3 = vshrl.u32 %v4071_v57, 16  ;;  %v495_v10 = vshll.u32 %v83_v12, 16 }
  0x39   :  { %3385 = vmatmul.msk.bf16.gmra.mxu1 %vm176_vm1, %v289_v63  ;;  %v85_v63 = vld [vmem:[%s5688_s0 + $0x12c] sm:$0x1]  ;;  %v507_v12 = vrot.slane %v506_v27, 4  ;;  %v621_v62 = vpack.c.b16 %v4167_v35, %v4165_v28  ;;  %v514_v27 = vshrl.u32 %v4177_v14, 16 }
  0x3a   :  { %v509_v29 = vshll.u32 %v85_v63, 16  ;;  %v586_v60 = vrot.slane %v584_v3, 4  ;;  %v497_v56 = vrot.slane %v495_v10, 5  ;;  %v579_v3 = vshll.u32 %v95_v32, 16 }
  0x3b   :  { %v593_v63 = vshll.u32 %v97_v50, 16  ;;  %v531_v32 = vshll.u32 %v4182_v24, 16  ;;  %v3499_v50 = vld [vmem:[%s5690_s2 + $0x1c] sm:$0xf] }
  0x3c   :  { %v511_v52 = vrot.slane %v509_v29, 5  ;;  %v590_v4 = vor.u32 %v589_v58, %v586_v60  ;;  %v290_v58 = vpack.c.b16 %v5714_v53, %v278_v30  ;;  %v498_v60 = vsel %vm3888_vm4, %v493_v54, %v497_v56  ;;  %v3490_v30 = vld [vmem:[%s5690_s2 + $0x18] sm:$0xf]  ;;  %v3481_v54 = vld [vmem:[%s5690_s2 + $0x14] sm:$0xf] }
  0x3d   :  { %v581_v7 = vrot.slane %v579_v3, 5  ;;  %v595_v19 = vrot.slane %v593_v63, 5  ;;  %v517_v29 = vshll.u32 %v4177_v14, 16  ;;  %v1470_v56 = vsel %vm201_vm0, %v3499_v50, 0 }
  0x3e   :  { %v512_v22 = vsel %vm3888_vm4, %v507_v12, %v511_v52  ;;  %v591_v10 = vrot.slane %v590_v4, 4  ;;  %v1364_v12 = vsel %vm201_vm0, %v3490_v30, 0  ;;  %v1258_v52 = vsel %vm201_vm0, %v3481_v54, 0 }
  0x3f   :  { %v607_v3 = vunpack.c.l.b16 %v498_v60  ;;  %v4212_v4 = vunpack.c.l.b16 %v512_v22  ;;  %1373 = vmatpush.bf16.msrb.mxu2 %v1364_v12  ;;  %v4229_v60 = vld [vmem:[%s5688_s0 + $0x180] sm:$0xf]  ;;  %1267 = vmatpush.bf16.msrb.mxu1 %v1258_v52  ;;  %v516_v30 = vrot.slane %v514_v27, 4  ;;  %v519_v54 = vrot.slane %v517_v29, 5  ;;  %v59_v27 = vld [vmem:[%s5688_s0 + $0x94] sm:$0x1] }
  0x40   :  { %5745 = vst [vmem:[#allocation11_spill] sm:$0xff] %v4229_v60  ;;  %v596_v50 = vsel %vm3888_vm4, %v591_v10, %v595_v19  ;;  %v533_v12 = vrot.slane %v531_v32, 5  ;;  %v5721_v29 = vunpack.c.l.b16 %v4177_v14 }
  0x41   :  { %v619_v10 = vpack.c.b16 %v4212_v4, %v607_v3  ;;  %v4248_v52 = vunpack.c.l.b16 %v596_v50 }
  0x43   :  { %3394 = vmatmul.msk.bf16.gmra.mxu2 %vm176_vm1, %v618_v23  ;;  %v577_v23 = vrot.slane %v576_v59, 4  ;;  %v3508_v59 = vld [vmem:[%s5690_s2 + $0x20] sm:$0xf]  ;;  %5747 = vst [vmem:[#allocation13_spill] sm:$0xff] %v4248_v52 }
  0x44   :  { %v1602_v63 = vsel %vm201_vm0, %v3508_v59, 0  ;;  %v87_v59 = vld [vmem:[%s5688_s0 + $0x134] sm:$0x1] }
  0x45   :  { %v582_v22 = vsel %vm3888_vm4, %v577_v23, %v581_v7  ;;  %1611 = vmatpush.bf16.msra.mxu0 %v1602_v63  ;;  %v520_v63 = vor.u32 %v519_v54, %v516_v30  ;;  %v523_v6 = vshll.u32 %v87_v59, 16 }
  0x46   :  { %v4246_v32 = vunpack.c.l.b16 %v582_v22  ;;  %v5748_v22 = vunpack.c.l.b16 %v4229_v60 }
  0x47   :  { %3378 = vmatmul.msk.bf16.gmra.mxu0 %vm176_vm1, %v172_v55  ;;  %v58_v55 = vld [vmem:[%s5688_s0 + $0x90] sm:$0xf]  ;;  %v521_v30 = vrot.slane %v520_v63, 4  ;;  %v525_v54 = vrot.slane %v523_v6, 5 }
  0x48   :  { %3397 = vmatmul.msk.bf16.vlgmr.msra.gmra.mxu3 %vm176_vm1, %v621_v62  ;;  %v60_v62 = vld [vmem:[%s5688_s0 + $0x98] sm:$0xf]  ;;  %v984_v53 = vshrl.u32 %v58_v55, 16  ;;  %v987_v0 = vshll.u32 %v58_v55, 16  ;;  %5746 = vst [vmem:[#allocation12_spill] sm:$0xff] %v4246_v32  ;;  %v537_v55 = vshll.u32 %v89_v2, 16 }
  0x49   :  { %3386 = vmatmul.msk.bf16.gmra.mxu1 %vm176_vm1, %v290_v58  ;;  %1479 = vmatpush.bf16.msra.mxu3 %v1470_v56  ;;  %v4224_v58 = vld [vmem:[%s5688_s0 + $0x178] sm:$0xf]  ;;  %v530_v56 = vrot.slane %v528_v31, 4  ;;  %v998_v23 = vshrl.u32 %v60_v62, 16  ;;  %v1001_v7 = vshll.u32 %v60_v62, 16 }
  0x4a   :  { %v5720_v19 = vunpack.c.l.b16 %v4224_v58  ;;  %v986_v18 = vrot.slane %v984_v53, 4  ;;  %v989_v62 = vrot.slane %v987_v0, 5  ;;  %v61_v31 = vld [vmem:[%s5688_s0 + $0x9c] sm:$0x1]  ;;  %v5749_v0 = vunpack.c.l.b16 %v4182_v24 }
  0x4b   :  { %v534_v1 = vor.u32 %v533_v12, %v530_v56  ;;  %v1000_v47 = vrot.slane %v998_v23, 4  ;;  %v1003_v3 = vrot.slane %v1001_v7, 5  ;;  %v622_v53 = vpack.c.b16 %v4248_v52, %v4246_v32 }
  0x4c   :  { %v173_v50 = vpack.c.b16 %v5748_v22, %v5720_v19  ;;  %v291_v2 = vpack.c.b16 %v5749_v0, %v5721_v29  ;;  %v539_v12 = vrot.slane %v537_v55, 5  ;;  %v990_v59 = vor.u32 %v989_v62, %v986_v18 }
  0x4d   :  { %v535_v56 = vrot.slane %v534_v1, 4  ;;  %v993_v23 = vshll.u32 %v59_v27, 16  ;;  %v1004_v7 = vor.u32 %v1003_v3, %v1000_v47  ;;  %v526_v22 = vsel %vm3888_vm4, %v521_v30, %v525_v54  ;;  %v62_v27 = vld [vmem:[%s5688_s0 + $0xa0] sm:$0xf] }
  0x4e   :  { %v991_v63 = vrot.slane %v990_v59, 4  ;;  %v4274_v18 = vunpack.c.l.b16 %v526_v22  ;;  %v3402_v59 = vld [vmem:[%s5688_s0 + $0x90] sm:$0xf] }
  0x4f   :  { %v540_v0 = vsel %vm3888_vm4, %v535_v56, %v539_v12  ;;  %v995_v6 = vrot.slane %v993_v23, 5  ;;  %v1005_v1 = vrot.slane %v1004_v7, 4  ;;  %v3443_v56 = vld [vmem:[%s5688_s0 + $0xd8] sm:$0xf]  ;;  %v3705_v12 = vld [vmem:[%s5688_s0 + $0xdc] sm:$0xf0] }
  0x50   :  { %v4276_v47 = vunpack.c.l.b16 %v540_v0  ;;  %v3701_v23 = vld [vmem:[%s5688_s0 + $0x94] sm:$0xf0] }
  0x51   :  { %v996_v62 = vsel %vm3888_vm4, %v991_v63, %v995_v6 }
  0x52   :  { %v620_v54 = vpack.c.b16 %v4276_v47, %v4274_v18  ;;  %v1209_v7 = vunpack.c.l.b16 %v996_v62 }
  0x53   :  { %3395 = vmatmul.msk.bf16.gmra.mxu2 %vm176_vm1, %v619_v10  ;;  %v1007_v10 = vshll.u32 %v61_v31, 16  ;;  %v64_v31 = vld [vmem:[%s5688_s0 + $0xa8] sm:$0xf] }
  0x54   :  { %v1029_v30 = vshll.u32 %v64_v31, 16 }
  0x55   :  { %v1009_v55 = vrot.slane %v1007_v10, 5 }
  0x56   :  { %v1031_v6 = vrot.slane %v1029_v30, 5 }
  0x57   :  { %3379 = vmatmul.msk.bf16.gmra.mxu0 %vm176_vm1, %v173_v50  ;;  %v1010_v3 = vsel %vm3888_vm4, %v1005_v1, %v1009_v55  ;;  %v1012_v50 = vshrl.u32 %v62_v27, 16  ;;  %v3444_v1 = vor.u32 %v3705_v12, %v3443_v56  ;;  %v63_v55 = vld [vmem:[%s5688_s0 + $0xa4] sm:$0x1] }
  0x58   :  { %3398 = vmatmul.msk.bf16.gmra.mxu3 %vm176_vm1, %v622_v53  ;;  %v1026_v53 = vshrl.u32 %v64_v31, 16  ;;  %v1210_v10 = vunpack.c.l.b16 %v1010_v3  ;;  %v3403_v31 = vor.u32 %v3701_v23, %v3402_v59  ;;  %v1021_v62 = vshll.u32 %v63_v55, 16  ;;  %v3447_v55 = vld [vmem:[%s5688_s0 + $0xe8] sm:$0xf] }
  0x59   :  { %3387 = vmatmul.msk.bf16.gmra.mxu1 %vm176_vm1, %v291_v2  ;;  %v1015_v2 = vshll.u32 %v62_v27, 16  ;;  %v1014_v22 = vrot.slane %v1012_v50, 4  ;;  %v65_v27 = vld [vmem:[%s5688_s0 + $0xac] sm:$0x1] }
  0x5a   :  { %v1028_v63 = vrot.slane %v1026_v53, 4  ;;  %v1225_v19 = vpack.c.b16 %v1210_v10, %v1209_v7  ;;  %v1035_v50 = vshll.u32 %v65_v27, 16  ;;  %v68_v53 = vld [vmem:[%s5688_s0 + $0xb8] sm:$0xf]  ;;  %v3706_v27 = vld [vmem:[%s5688_s0 + $0xec] sm:$0xf0] }
  0x5b   :  { %v1017_v0 = vrot.slane %v1015_v2, 5  ;;  %v66_v2 = vld [vmem:[%s5688_s0 + $0xb0] sm:$0xf]  ;;  %v1054_v7 = vshrl.u32 %v68_v53, 16  ;;  %v1057_v10 = vshll.u32 %v68_v53, 16 }
  0x5c   :  { %v1032_v3 = vor.u32 %v1031_v6, %v1028_v63  ;;  %v1037_v12 = vrot.slane %v1035_v50, 5  ;;  %v1040_v59 = vshrl.u32 %v66_v2, 16  ;;  %v1043_v23 = vshll.u32 %v66_v2, 16  ;;  %v67_v2 = vld [vmem:[%s5688_s0 + $0xb4] sm:$0x1] }
  0x5d   :  { %v1018_v29 = vor.u32 %v1017_v0, %v1014_v22  ;;  %v5750_v0 = vunpack.c.l.b16 %v3852_v13  ;;  %v5751_v63 = vunpack.c.l.b16 %v3900_v43  ;;  %v1056_v43 = vrot.slane %v1054_v7, 4  ;;  %v69_v53 = vld [vmem:[%s5688_s0 + $0xbc] sm:$0x1] }
  0x5e   :  { %v1033_v56 = vrot.slane %v1032_v3, 4  ;;  %v1042_v13 = vrot.slane %v1040_v59, 4 }
  0x5f   :  { %v1019_v30 = vrot.slane %v1018_v29, 4  ;;  %v1331_v6 = vpack.c.b16 %v5751_v63, %v5750_v0  ;;  %v3406_v29 = vld [vmem:[%s5688_s0 + $0xa0] sm:$0xf] }
  0x60   :  { %v70_v63 = vld [vmem:[%s5688_s0 + $0xc0] sm:$0xf] }
  0x63   :  { %3396 = vmatmul.msk.bf16.gmra.mxu2 %vm176_vm1, %v620_v54  ;;  %v1023_v54 = vrot.slane %v1021_v62, 5  ;;  %v1059_v62 = vrot.slane %v1057_v10, 5 }
  0x65   :  { %v1024_v22 = vsel %vm3888_vm4, %v1019_v30, %v1023_v54  ;;  %v3448_v54 = vor.u32 %v3706_v27, %v3447_v55  ;;  %v1060_v59 = vor.u32 %v1059_v62, %v1056_v43  ;;  %v1068_v55 = vshrl.u32 %v70_v63, 16 }
  0x66   :  { %v1211_v3 = vunpack.c.l.b16 %v1024_v22  ;;  %v1071_v27 = vshll.u32 %v70_v63, 16  ;;  %v5752_v43 = vunpack.c.l.b16 %v3912_v48  ;;  %v5753_v62 = vunpack.c.l.b16 %v3946_v21  ;;  %v3703_v48 = vld [vmem:[%s5688_s0 + $0xb4] sm:$0xf0] }
  0x67   :  { %3473 = vmatmul.msk.bf16.vlgmr.msrb.gmra.mxu0 %vm176_vm1, %v3444_v1  ;;  %v3702_v1 = vld [vmem:[%s5688_s0 + $0xa4] sm:$0xf0]  ;;  %v1070_v21 = vrot.slane %v1068_v55, 4 }
  0x68   :  { %3432 = vmatmul.msk.bf16.vlgmr.msrb.gmra.mxu3 %vm176_vm1, %v3403_v31  ;;  %v1045_v31 = vrot.slane %v1043_v23, 5  ;;  %v3407_v30 = vor.u32 %v3702_v1, %v3406_v29  ;;  %v1063_v23 = vshll.u32 %v69_v53, 16  ;;  %v3707_v53 = vld [vmem:[%s5688_s0 + $0xfc] sm:$0xf0] }
  0x69   :  { %3482 = vmatmul.msk.bf16.vlgmr.msrb.gmra.mxu1 %vm176_vm1, %v1225_v19  ;;  %v1038_v19 = vsel %vm3888_vm4, %v1033_v56, %v1037_v12  ;;  %v1049_v12 = vshll.u32 %v67_v2, 16  ;;  %v3451_v2 = vld [vmem:[%s5688_s0 + $0xf8] sm:$0xf] }
  0x6a   :  { %v1212_v50 = vunpack.c.l.b16 %v1038_v19  ;;  %v1046_v56 = vor.u32 %v1045_v31, %v1042_v13  ;;  %v1061_v19 = vrot.slane %v1060_v59, 4  ;;  %v1065_v0 = vrot.slane %v1063_v23, 5  ;;  %v71_v23 = vld [vmem:[%s5688_s0 + $0xc4] sm:$0x1] }
  0x6b   :  { %v1051_v22 = vrot.slane %v1049_v12, 5 }
  0x6c   :  { %v1226_v7 = vpack.c.b16 %v1212_v50, %v1211_v3  ;;  %v1047_v10 = vrot.slane %v1046_v56, 4  ;;  %v1066_v1 = vsel %vm3888_vm4, %v1061_v19, %v1065_v0  ;;  %v1332_v3 = vpack.c.b16 %v5753_v62, %v5752_v43  ;;  %v3410_v50 = vld [vmem:[%s5688_s0 + $0xb0] sm:$0xf] }
  0x6d   :  { %v1073_v56 = vrot.slane %v1071_v27, 5  ;;  %v3411_v19 = vor.u32 %v3703_v48, %v3410_v50  ;;  %v109_v50 = vld [vmem:[%s5688_s0 + $0x1b0] sm:$0xf] }
  0x6e   :  { %v1052_v29 = vsel %vm3888_vm4, %v1047_v10, %v1051_v22  ;;  %v3452_v10 = vor.u32 %v3707_v53, %v3451_v2  ;;  %v111_v2 = vld [vmem:[%s5688_s0 + $0x1b8] sm:$0xf] }
  0x6f   :  { %v1074_v63 = vor.u32 %v1073_v56, %v1070_v21  ;;  %v1096_v21 = vshrl.u32 %v109_v50, 16  ;;  %v1099_v56 = vshll.u32 %v109_v50, 16  ;;  %v112_v50 = vld [vmem:[%s5688_s0 + $0x1bc] sm:$0x1] }
  0x73   :  { %3491 = vmatmul.msk.bf16.vlgmr.msrb.gmra.mxu2 %vm176_vm1, %v1331_v6  ;;  %v72_v6 = vld [vmem:[%s5688_s0 + $0xc8] sm:$0xf] }
  0x74   :  { %v1082_v13 = vshrl.u32 %v72_v6, 16  ;;  %v1085_v31 = vshll.u32 %v72_v6, 16  ;;  %v1077_v6 = vshll.u32 %v71_v23, 16 }
  0x76   :  { %v1084_v12 = vrot.slane %v1082_v13, 4  ;;  %v1087_v59 = vrot.slane %v1085_v31, 5  ;;  %v1075_v13 = vrot.slane %v1074_v63, 4  ;;  %v1079_v31 = vrot.slane %v1077_v6, 5  ;;  %v3414_v63 = vld [vmem:[%s5688_s0 + $0xc0] sm:$0xf] }
  0x77   :  { %3474 = vmatmul.msk.bf16.gmra.mxu0 %vm176_vm1, %v3448_v54  ;;  %v1214_v54 = vunpack.c.l.b16 %v1066_v1  ;;  %v3704_v6 = vld [vmem:[%s5688_s0 + $0xc4] sm:$0xf0] }
  0x78   :  { %3433 = vmatmul.msk.bf16.gmra.mxu3 %vm176_vm1, %v3407_v30  ;;  %v1213_v30 = vunpack.c.l.b16 %v1052_v29  ;;  %v1088_v29 = vor.u32 %v1087_v59, %v1084_v12  ;;  %v1110_v12 = vshrl.u32 %v111_v2, 16  ;;  %v1113_v59 = vshll.u32 %v111_v2, 16 }
  0x79   :  { %3483 = vmatmul.msk.bf16.gmra.mxu1 %vm176_vm1, %v1226_v7  ;;  %v73_v7 = vld [vmem:[%s5688_s0 + $0xcc] sm:$0x1] }
  0x7a   :  { %v1227_v0 = vpack.c.b16 %v1214_v54, %v1213_v30  ;;  %v1091_v1 = vshll.u32 %v73_v7, 16  ;;  %v1089_v43 = vrot.slane %v1088_v29, 4  ;;  %v1080_v30 = vsel %vm3888_vm4, %v1075_v13, %v1079_v31 }
  0x7b   :  { %v5754_v7 = vunpack.c.l.b16 %v3957_v25  ;;  %v1215_v25 = vunpack.c.l.b16 %v1080_v30  ;;  %v1115_v13 = vrot.slane %v1113_v59, 5  ;;  %v1119_v59 = vshll.u32 %v112_v50, 16 }
  0x7c   :  { %v1093_v62 = vrot.slane %v1091_v1, 5  ;;  %v1101_v1 = vrot.slane %v1099_v56, 5 }
  0x7e   :  { %v1094_v54 = vsel %vm3888_vm4, %v1089_v43, %v1093_v62  ;;  %v110_v62 = vld [vmem:[%s5688_s0 + $0x1b4] sm:$0x1] }
  0x7f   :  { %v1216_v29 = vunpack.c.l.b16 %v1094_v54  ;;  %v1105_v56 = vshll.u32 %v110_v62, 16 }
  0x81   :  { %v1228_v30 = vpack.c.b16 %v1216_v29, %v1215_v25  ;;  %v1121_v25 = vrot.slane %v1119_v59, 5  ;;  %v3709_v59 = vld [vmem:[%s5688_s0 + $0x1b4] sm:$0xf0] }
  0x83   :  { %3492 = vmatmul.msk.bf16.gmra.mxu2 %vm176_vm1, %v1332_v3 }
  0x84   :  { %v214_v22 = vpop.f32.mrf.mxu0 }
  0x86   :  { %v330_v55 = vpop.f32.mrf.mxu1 }
  0x87   :  { %v331_v27 = vadd.f32 %v330_v55, %v214_v22  ;;  %3475 = vmatmul.msk.bf16.gmra.mxu0 %vm176_vm1, %v3452_v10  ;;  %v5755_v10 = vunpack.c.l.b16 %v4020_v15  ;;  %v1098_v15 = vrot.slane %v1096_v21, 4  ;;  %v1112_v55 = vrot.slane %v1110_v12, 4 }
  0x88   :  { %3434 = vmatmul.msk.bf16.gmra.mxu3 %vm176_vm1, %v3411_v19  ;;  %v3455_v19 = vld [vmem:[%s5688_s0 + $0x108] sm:$0xf] }
  0x89   :  { %3484 = vmatmul.msk.bf16.gmra.mxu1 %vm176_vm1, %v1227_v0  ;;  %v1333_v22 = vpack.c.b16 %v5755_v10, %v5754_v7  ;;  %v3708_v0 = vld [vmem:[%s5688_s0 + $0x10c] sm:$0xf0]  ;;  %v1102_v21 = vor.u32 %v1101_v1, %v1098_v15  ;;  %v1116_v12 = vor.u32 %v1115_v13, %v1112_v55 }
  0x8a   :  { %v3456_v43 = vor.u32 %v3708_v0, %v3455_v19  ;;  %v113_v19 = vld [vmem:[%s5688_s0 + $0x1c0] sm:$0xf] }
  0x8b   :  { %v4384_v3 = vpop.f32.mrf.mxu3  ;;  %v1103_v0 = vrot.slane %v1102_v21, 4  ;;  %v1124_v55 = vshrl.u32 %v113_v19, 16  ;;  %v1127_v13 = vshll.u32 %v113_v19, 16  ;;  %v5756_v21 = vunpack.c.l.b16 %v4029_v17  ;;  %v3459_v19 = vld [vmem:[%s5688_s0 + $0x1f8] sm:$0xf] }
  0x8c   :  { %v216_v53 = vpop.f32.mrf.mxu0 }
  0x8e   :  { %v332_v48 = vpop.f32.mrf.mxu1 }
  0x8f   :  { %v333_v23 = vadd.f32 %v332_v48, %v216_v53  ;;  %v3415_v53 = vor.u32 %v3704_v6, %v3414_v63  ;;  %v1107_v63 = vrot.slane %v1105_v56, 5  ;;  %v1117_v6 = vrot.slane %v1116_v12, 4  ;;  %v3418_v12 = vld [vmem:[%s5688_s0 + $0x1b0] sm:$0xf] }
  0x93   :  { %3493 = vmatmul.msk.bf16.gmra.mxu2 %vm176_vm1, %v1333_v22  ;;  %v4413_v31 = vpop.f32.mrf.mxu3  ;;  %v4428_v22 = vld [vmem:[%s5688_s0 + $0x40] sm:$0xf] }
  0x94   :  { %v219_v2 = vpop.f32.mrf.mxu0  ;;  %v1329_v15 = vunpack.c.l.b16 %v4428_v22 }
  0x96   :  { %v659_v54 = vpop.f32.mrf.mxu2  ;;  %v335_v48 = vpop.f32.mrf.mxu1  ;;  %v1334_v56 = vpack.c.b16 %v1329_v15, %v5756_v21  ;;  %v114_v15 = vld [vmem:[%s5688_s0 + $0x1c4] sm:$0x1] }
  0x97   :  { %v4421_v7 = vadd.f32 %v659_v54, %v331_v27  ;;  %v336_v10 = vadd.f32 %v335_v48, %v219_v2  ;;  %3476 = vmatmul.msk.bf16.gmra.mxu0 %vm176_vm1, %v3456_v43  ;;  %v115_v27 = vld [vmem:[%s5688_s0 + $0x1c8] sm:$0xf] }
  0x98   :  { %3435 = vmatmul.msk.bf16.gmra.mxu3 %vm176_vm1, %v3415_v53  ;;  %v1138_v43 = vshrl.u32 %v115_v27, 16  ;;  %v1141_v62 = vshll.u32 %v115_v27, 16  ;;  %v1108_v53 = vsel %vm3888_vm4, %v1103_v0, %v1107_v63  ;;  %v1126_v27 = vrot.slane %v1124_v55, 4 }
  0x99   :  { %3485 = vmatmul.msk.bf16.gmra.mxu1 %vm176_vm1, %v1228_v30  ;;  %v1122_v30 = vsel %vm3888_vm4, %v1117_v6, %v1121_v25  ;;  %v1129_v0 = vrot.slane %v1127_v13, 5  ;;  %v1217_v6 = vunpack.c.l.b16 %v1108_v53 }
  0x9a   :  { %v1140_v17 = vrot.slane %v1138_v43, 4  ;;  %v1143_v63 = vrot.slane %v1141_v62, 5  ;;  %v1218_v25 = vunpack.c.l.b16 %v1122_v30  ;;  %v1133_v43 = vshll.u32 %v114_v15, 16 }
  0x9b   :  { %v4437_v29 = vpop.f32.mrf.mxu3  ;;  %v1130_v13 = vor.u32 %v1129_v0, %v1126_v27 }
  0x9c   :  { %v221_v1 = vpop.f32.mrf.mxu0  ;;  %v1144_v62 = vor.u32 %v1143_v63, %v1140_v17  ;;  %v1229_v30 = vpack.c.b16 %v1218_v25, %v1217_v6  ;;  %v1135_v35 = vrot.slane %v1133_v43, 5 }
  0x9e   :  { %v661_v50 = vpop.f32.mrf.mxu2  ;;  %v337_v2 = vpop.f32.mrf.mxu1  ;;  %v1145_v8 = vrot.slane %v1144_v62, 4 }
  0x9f   :  { %v4444_v54 = vadd.f32 %v661_v50, %v333_v23  ;;  %v338_v48 = vadd.f32 %v337_v2, %v221_v1  ;;  %v3713_v23 = vld [vmem:[%s5688_s0 + $0x1fc] sm:$0xf0]  ;;  %v116_v1 = vld [vmem:[%s5688_s0 + $0x1cc] sm:$0x1]  ;;  %v3419_v2 = vor.u32 %v3709_v59, %v3418_v12  ;;  %v117_v59 = vld [vmem:[%s5688_s0 + $0x1d0] sm:$0xf] }
  0xa0   :  { %v3460_v21 = vor.u32 %v3713_v23, %v3459_v19  ;;  %v1147_v53 = vshll.u32 %v116_v1, 16  ;;  %v1152_v0 = vshrl.u32 %v117_v59, 16  ;;  %v1155_v17 = vshll.u32 %v117_v59, 16 }
  0xa2   :  { %v1149_v12 = vrot.slane %v1147_v53, 5  ;;  %v1157_v43 = vrot.slane %v1155_v17, 5 }
  0xa3   :  { %3494 = vmatmul.msk.bf16.gmra.mxu2 %vm176_vm1, %v1334_v56  ;;  %v4467_v50 = vpop.f32.mrf.mxu3  ;;  %v1131_v56 = vrot.slane %v1130_v13, 4 }
  0xa4   :  { %v224_v55 = vpop.f32.mrf.mxu0  ;;  %v1150_v27 = vsel %vm3888_vm4, %v1145_v8, %v1149_v12  ;;  %v3463_v8 = vld [vmem:[%s5688_s0 + $0x208] sm:$0xf] }
  0xa5   :  { %v1136_v23 = vsel %vm3888_vm4, %v1131_v56, %v1135_v35  ;;  %v3422_v35 = vld [vmem:[%s5688_s0 + $0x1c0] sm:$0xf]  ;;  %v120_v56 = vld [vmem:[%s5688_s0 + $0x1dc] sm:$0x1] }
  0xa6   :  { %v664_v52 = vpop.f32.mrf.mxu2  ;;  %v340_v42 = vpop.f32.mrf.mxu1  ;;  %v1219_v13 = vunpack.c.l.b16 %v1136_v23 }
  0xa7   :  { %v4469_v9 = vadd.f32 %v664_v52, %v336_v10  ;;  %v341_v32 = vadd.f32 %v340_v42, %v224_v55  ;;  %3477 = vmatmul.msk.bf16.gmra.mxu0 %vm176_vm1, %v3460_v21  ;;  %v119_v52 = vld [vmem:[%s5688_s0 + $0x1d8] sm:$0xf]  ;;  %v3714_v55 = vld [vmem:[%s5688_s0 + $0x20c] sm:$0xf0] }
  0xa8   :  { %3436 = vmatmul.msk.bf16.gmra.mxu3 %vm176_vm1, %v3419_v2  ;;  %v1166_v63 = vshrl.u32 %v119_v52, 16  ;;  %v1169_v6 = vshll.u32 %v119_v52, 16  ;;  %v5758_v2 = vunpack.c.l.b16 %v4177_v14  ;;  %v1154_v14 = vrot.slane %v1152_v0, 4 }
  0xa9   :  { %3486 = vmatmul.msk.bf16.gmra.mxu1 %vm176_vm1, %v1229_v30  ;;  %v118_v30 = vld [vmem:[%s5688_s0 + $0x1d4] sm:$0x1]  ;;  %v3464_v59 = vor.u32 %v3714_v55, %v3463_v8 }
  0xaa   :  { %v1168_v62 = vrot.slane %v1166_v63, 4  ;;  %v1171_v53 = vrot.slane %v1169_v6, 5  ;;  %v1158_v0 = vor.u32 %v1157_v43, %v1154_v14  ;;  %v1161_v17 = vshll.u32 %v118_v30, 16 }
  0xab   :  { %v360_v10 = vpop.f32.mrf.mxu3  ;;  %v1175_v6 = vshll.u32 %v120_v56, 16 }
  0xac   :  { %v4481_v42 = vadd.f32 %v360_v10, %v4384_v3  ;;  %v4483_v19 = vpop.f32.mrf.mxu0  ;;  %v5757_v3 = vunpack.c.l.b16 %v4100_v11  ;;  %v3710_v11 = vld [vmem:[%s5688_s0 + $0x1c4] sm:$0xf0]  ;;  %v1172_v63 = vor.u32 %v1171_v53, %v1168_v62 }
  0xad   :  { %v3423_v23 = vor.u32 %v3710_v11, %v3422_v35  ;;  %v1177_v35 = vrot.slane %v1175_v6, 5 }
  0xae   :  { %v666_v25 = vpop.f32.mrf.mxu2  ;;  %v4489_v15 = vpop.f32.mrf.mxu1  ;;  %v1335_v21 = vpack.c.b16 %v5758_v2, %v5757_v3  ;;  %v1173_v8 = vrot.slane %v1172_v63, 4  ;;  %v3711_v63 = vld [vmem:[%s5688_s0 + $0x1d4] sm:$0xf0] }
  0xaf   :  { %v4491_v1 = vadd.f32 %v666_v25, %v338_v48  ;;  %v1220_v48 = vunpack.c.l.b16 %v1150_v27 }
  0xb0   :  { %v1178_v43 = vsel %vm3888_vm4, %v1173_v8, %v1177_v35  ;;  %v122_v35 = vld [vmem:[%s5688_s0 + $0x1e4] sm:$0x1] }
  0xb1   :  { %v1230_v27 = vpack.c.b16 %v1220_v48, %v1219_v13  ;;  %v121_v13 = vld [vmem:[%s5688_s0 + $0x1e0] sm:$0xf]  ;;  %v1222_v6 = vunpack.c.l.b16 %v1178_v43 }
  0xb2   :  { %v1180_v30 = vshrl.u32 %v121_v13, 16  ;;  %v1183_v56 = vshll.u32 %v121_v13, 16 }
  0xb3   :  { %3495 = vmatmul.msk.bf16.gmra.mxu2 %vm176_vm1, %v1335_v21  ;;  %v362_v12 = vpop.f32.mrf.mxu3  ;;  %v1163_v21 = vrot.slane %v1161_v17, 5  ;;  %v3426_v17 = vld [vmem:[%s5688_s0 + $0x1d0] sm:$0xf] }
  0xb4   :  { %v4517_v52 = vadd.f32 %v362_v12, %v4413_v31  ;;  %v229_v10 = vpop.f32.mrf.mxu0  ;;  %v1159_v31 = vrot.slane %v1158_v0, 4  ;;  %v3715_v0 = vld [vmem:[%s5688_s0 + $0x21c] sm:$0xf0] }
  0xb6   :  { %v669_v25 = vpop.f32.mrf.mxu2  ;;  %v345_v3 = vpop.f32.mrf.mxu1  ;;  %v1164_v14 = vsel %vm3888_vm4, %v1159_v31, %v1163_v21 }
  0xb7   :  { %v4519_v2 = vadd.f32 %v669_v25, %v341_v32  ;;  %v346_v60 = vadd.f32 %v345_v3, %v229_v10  ;;  %3478 = vmatmul.msk.bf16.gmra.mxu0 %vm176_vm1, %v3464_v59  ;;  %v123_v32 = vld [vmem:[%s5688_s0 + $0x1e8] sm:$0xf]  ;;  %v5759_v10 = vunpack.c.l.b16 %v4182_v24  ;;  %v1221_v24 = vunpack.c.l.b16 %v1164_v14 }
  0xb8   :  { %3437 = vmatmul.msk.bf16.gmra.mxu3 %vm176_vm1, %v3423_v23  ;;  %v1194_v12 = vshrl.u32 %v123_v32, 16  ;;  %v1197_v59 = vshll.u32 %v123_v32, 16  ;;  %v1185_v25 = vrot.slane %v1183_v56, 5  ;;  %v3427_v14 = vor.u32 %v3711_v63, %v3426_v17 }
  0xb9   :  { %3487 = vmatmul.msk.bf16.gmra.mxu1 %vm176_vm1, %v1230_v27  ;;  %v3467_v27 = vld [vmem:[%s5688_s0 + $0x218] sm:$0xf]  ;;  %v1231_v43 = vpack.c.b16 %v1222_v6, %v1221_v24 }
  0xba   :  { %v1196_v3 = vrot.slane %v1194_v12, 4  ;;  %v1199_v31 = vrot.slane %v1197_v59, 5  ;;  %v3468_v8 = vor.u32 %v3715_v0, %v3467_v27  ;;  %v1189_v59 = vshll.u32 %v122_v35, 16 }
  0xbb   :  { %v365_v55 = vpop.f32.mrf.mxu3 }
  0xbc   :  { %v4531_v48 = vadd.f32 %v365_v55, %v4437_v29  ;;  %v4533_v11 = vpop.f32.mrf.mxu0  ;;  %v5760_v29 = vunpack.c.l.b16 %v3990_v45  ;;  %v1182_v45 = vrot.slane %v1180_v30, 4  ;;  %v124_v55 = vld [vmem:[%s5688_s0 + $0x1ec] sm:$0x1] }
  0xbe   :  { %v4539_v62 = vpop.f32.mrf.mxu2  ;;  %v4541_v53 = vpop.f32.mrf.mxu1  ;;  %v1336_v23 = vpack.c.b16 %v5760_v29, %v5759_v10  ;;  %v1186_v12 = vor.u32 %v1185_v25, %v1182_v45  ;;  %v1200_v10 = vor.u32 %v1199_v31, %v1196_v3  ;;  %v1203_v29 = vshll.u32 %v124_v55, 16  ;;  %v3716_v55 = vld [vmem:[%s5688_s0 + $0x22c] sm:$0xf0] }
  0xbf   :  { %v5761_v31 = vunpack.c.l.b16 %v3995_v49 }
  0xc0   :  { %v1187_v0 = vrot.slane %v1186_v12, 4  ;;  %v1205_v17 = vrot.slane %v1203_v29, 5 }
  0xc3   :  { %3496 = vmatmul.msk.bf16.gmra.mxu2 %vm176_vm1, %v1336_v23  ;;  %v367_v21 = vpop.f32.mrf.mxu3 }
  0xc4   :  { %v368_v13 = vadd.f32 %v367_v21, %v4467_v50  ;;  %v234_v32 = vpop.f32.mrf.mxu0  ;;  %v1191_v50 = vrot.slane %v1189_v59, 5  ;;  %v1201_v21 = vrot.slane %v1200_v10, 4 }
  0xc6   :  { %v674_v30 = vpop.f32.mrf.mxu2  ;;  %v350_v56 = vpop.f32.mrf.mxu1  ;;  %v1192_v25 = vsel %vm3888_vm4, %v1187_v0, %v1191_v50  ;;  %v1206_v3 = vsel %vm3888_vm4, %v1201_v21, %v1205_v17  ;;  %v4612_v17 = vld [vmem:[%s5688_s0 + $0x160] sm:$0xf] }
  0xc7   :  { %v4567_v23 = vadd.f32 %v674_v30, %v346_v60  ;;  %v351_v27 = vadd.f32 %v350_v56, %v234_v32  ;;  %3479 = vmatmul.msk.bf16.gmra.mxu0 %vm176_vm1, %v3468_v8  ;;  %v5762_v8 = vunpack.c.l.b16 %v4064_v44  ;;  %v3430_v32 = vld [vmem:[%s5688_s0 + $0x1e0] sm:$0xf]  ;;  %v1223_v49 = vunpack.c.l.b16 %v1192_v25 }
  0xc8   :  { %3438 = vmatmul.msk.bf16.gmra.mxu3 %vm176_vm1, %v3427_v14  ;;  %v3712_v14 = vld [vmem:[%s5688_s0 + $0x1e4] sm:$0xf0] }
  0xc9   :  { %3488 = vmatmul.msk.bf16.gmra.mxu1 %vm176_vm1, %v1231_v43  ;;  %v1337_v35 = vpack.c.b16 %v5762_v8, %v5761_v31  ;;  %v1224_v43 = vunpack.c.l.b16 %v1206_v3  ;;  %v3431_v59 = vor.u32 %v3712_v14, %v3430_v32  ;;  %v5763_v31 = vunpack.c.l.b16 %v4071_v57  ;;  %v3717_v57 = vld [vmem:[%s5692_s4] sm:$0xff] }
  0xca   :  { %2263 = vmatpush.bf16.msra.mxu2 %v3717_v57 }
  0xcb   :  { %v689_v63 = vpop.f32.mrf.mxu3  ;;  %v1232_v10 = vpack.c.b16 %v1224_v43, %v1223_v49 }
  0xcc   :  { %v4573_v24 = vadd.f32 %v689_v63, %v4481_v42  ;;  %v4575_v6 = vpop.f32.mrf.mxu0  ;;  %v3471_v42 = vld [vmem:[%s5688_s0 + $0x228] sm:$0xf]  ;;  %v1330_v63 = vunpack.c.l.b16 %v4612_v17 }
  0xcd   :  { %v3472_v30 = vor.u32 %v3716_v55, %v3471_v42 }
  0xce   :  { %v4577_v45 = vpop.f32.mrf.mxu2  ;;  %v4579_v60 = vpop.f32.mrf.mxu1  ;;  %v1338_v8 = vpack.c.b16 %v1330_v63, %v5763_v31 }
  0xd3   :  { %3497 = vmatmul.msk.bf16.gmra.mxu2 %vm176_vm1, %v1337_v35  ;;  %v691_v44 = vpop.f32.mrf.mxu3 }
  0xd4   :  { %v4603_v56 = vadd.f32 %v691_v44, %v4517_v52  ;;  %v239_v12 = vpop.f32.mrf.mxu0  ;;  %v3718_v44 = vld [vmem:[%s5692_s4 + $0x8] sm:$0xff] }
  0xd5   :  { %2144 = vmatpush.bf16.msra.mxu1 %v3718_v44 }
  0xd6   :  { %v679_v29 = vpop.f32.mrf.mxu2  ;;  %v355_v0 = vpop.f32.mrf.mxu1 }
  0xd7   :  { %v4605_v50 = vadd.f32 %v679_v29, %v351_v27  ;;  %v356_v21 = vadd.f32 %v355_v0, %v239_v12  ;;  %3480 = vmatmul.msk.bf16.gmra.mxu0 %vm176_vm1, %v3472_v30 }
  0xd8   :  { %3439 = vmatmul.msk.bf16.gmra.mxu3 %vm176_vm1, %v3431_v59  ;;  %v5765_v59 = vunpack.c.l.b16 %v3886_v37 }
  0xd9   :  { %3489 = vmatmul.msk.bf16.gmra.mxu1 %vm176_vm1, %v1232_v10  ;;  %v5766_v10 = vunpack.c.l.b16 %v3977_v34  ;;  %v48_v34 = vld [vmem:[%s5688_s0 + $0x44] sm:$0x1] }
  0xda   :  { %v1547_v57 = vshll.u32 %v48_v34, 16 }
  0xdb   :  { %v694_v52 = vpop.f32.mrf.mxu3 }
  0xdc   :  { %v4617_v25 = vadd.f32 %v694_v52, %v4531_v48  ;;  %v4619_v27 = vpop.f32.mrf.mxu0  ;;  %v5764_v48 = vpack.c.b16 %v3959_v26, %v3930_v61  ;;  %v1541_v52 = vshll.u32 %v4428_v22, 16 }
  0xde   :  { %v4621_v3 = vpop.f32.mrf.mxu2  ;;  %v1543_v63 = vrot.slane %v1541_v52, 5 }
  0xe3   :  { %3498 = vmatmul.msk.bf16.gmra.mxu2 %vm176_vm1, %v1338_v8  ;;  %v696_v35 = vpop.f32.mrf.mxu3  ;;  %v1571_v8 = vpack.c.b16 %v4138_v5, %v4066_v51 }
  0xe4   :  { %v4626_v42 = vadd.f32 %v696_v35, %v368_v13  ;;  %v927_v55 = vpop.f32.mrf.mxu0 }
  0xe6   :  { %v684_v32 = vpop.f32.mrf.mxu2 }
  0xe7   :  { %v4628_v14 = vadd.f32 %v684_v32, %v356_v21  ;;  %3509 = vmatmul.msk.bf16.vlgmr.msra.gmra.mxu0 %vm176_vm1, %v5764_v48  ;;  %v1538_v21 = vshrl.u32 %v4428_v22, 16  ;;  %v5767_v22 = vunpack.c.l.b16 %v3982_v38  ;;  %v57_v38 = vld [vmem:[%s5688_s0 + $0x88] sm:$0xf] }
  0xe8   :  { %3500 = vmatmul.msk.bf16.vlgmr.msra.gmra.mxu3 %vm176_vm1, %v3902_v46  ;;  %v1570_v46 = vpack.c.b16 %v4049_v36, %v3972_v33 }
  0xe9   :  { %v1540_v37 = vrot.slane %v1538_v21, 4 }
  0xeb   :  { %v793_v49 = vpop.f32.mrf.mxu3  ;;  %v1544_v35 = vor.u32 %v1543_v63, %v1540_v37 }
  0xec   :  { %v833_v13 = vadd.f32 %v793_v49, %v4421_v7  ;;  %v929_v43 = vpop.f32.mrf.mxu0  ;;  %v1438_v7 = vpack.c.b16 %v5766_v10, %v5765_v59 }
  0xee   :  { %v4643_v30 = vadd.f32 %v927_v55, %v833_v13  ;;  %v1545_v13 = vrot.slane %v1544_v35, 4 }
  0xf3   :  { %v795_v61 = vpop.f32.mrf.mxu3 }
  0xf4   :  { %v834_v26 = vadd.f32 %v795_v61, %v4444_v54  ;;  %v932_v12 = vpop.f32.mrf.mxu0 }
  0xf6   :  { %v4652_v29 = vadd.f32 %v929_v43, %v834_v26  ;;  %v1549_v43 = vrot.slane %v1547_v57, 5  ;;  %v1435_v26 = vunpack.c.l.b16 %v57_v38  ;;  %v5774_v57 = vld [vmem:[#allocation6_spill] sm:$0xff] }
  0xf7   :  { %3510 = vmatmul.msk.bf16.gmra.mxu0 %vm176_vm1, %v1570_v46  ;;  %v343_v46 = vadd.f32 %v4489_v15, %v4483_v19 }
  0xf8   :  { %3501 = vmatmul.msk.bf16.gmra.mxu3 %vm176_vm1, %v1438_v7 }
  0xfb   :  { %v798_v0 = vpop.f32.mrf.mxu3 }
  0xfc   :  { %v835_v33 = vadd.f32 %v798_v0, %v4469_v9  ;;  %v934_v36 = vpop.f32.mrf.mxu0  ;;  %v5768_v9 = vunpack.c.l.b16 %v4054_v40  ;;  %v5769_v0 = vunpack.c.l.b16 %v4059_v41  ;;  %v1573_v41 = vpack.c.b16 %v4274_v18, %v4212_v4  ;;  %v4714_v4 = vpop.f32.mrf.mxu2 }
  0xfe   :  { %v4659_v54 = vadd.f32 %v932_v12, %v835_v33  ;;  %v1439_v48 = vpack.c.b16 %v5768_v9, %v5767_v22  ;;  %v704_v12 = vadd.f32 %v4539_v62, %v343_v46  ;;  %v1440_v21 = vpack.c.b16 %v1435_v26, %v5769_v0  ;;  %v5772_v9 = vld [vmem:[#allocation11_spill] sm:$0xff] }
 0x103   :  { %v800_v31 = vpop.f32.mrf.mxu3 }
 0x104   :  { %v836_v55 = vadd.f32 %v800_v31, %v4491_v1  ;;  %v937_v32 = vpop.f32.mrf.mxu0  ;;  %v1550_v1 = vsel %vm3888_vm4, %v1545_v13, %v1549_v43  ;;  %v5770_v31 = vunpack.c.l.b16 %v4148_v20  ;;  %v5775_v13 = vunpack.c.l.b16 %v5774_v57  ;;  %v5782_v57 = vld [vmem:[#allocation13_spill] sm:$0xff] }
 0x105   :  { %v1567_v61 = vunpack.c.l.b16 %v1550_v1 }
 0x106   :  { %v4671_v49 = vadd.f32 %v934_v36, %v836_v55 }
 0x107   :  { %3511 = vmatmul.msk.bf16.gmra.mxu0 %vm176_vm1, %v1571_v8  ;;  %v5771_v8 = vunpack.c.l.b16 %v4224_v58 }
 0x108   :  { %3502 = vmatmul.msk.bf16.gmra.mxu3 %vm176_vm1, %v1439_v48  ;;  %v5773_v48 = vunpack.c.l.b16 %v5772_v9 }
 0x109   :  { %v1441_v35 = vpack.c.b16 %v5771_v8, %v5770_v31 }
 0x10a   :  { %v1442_v43 = vpack.c.b16 %v5775_v13, %v5773_v48 }
 0x10b   :  { %v803_v44 = vpop.f32.mrf.mxu3 }
 0x10c   :  { %v837_v51 = vadd.f32 %v803_v44, %v4519_v2  ;;  %v939_v5 = vpop.f32.mrf.mxu0  ;;  %v1572_v2 = vpack.c.b16 %v1567_v61, %v4140_v16  ;;  %v348_v16 = vadd.f32 %v4541_v53, %v4533_v11  ;;  %v4709_v11 = vpop.f32.mrf.mxu1 }
 0x10e   :  { %v4681_v40 = vadd.f32 %v937_v32, %v837_v51  ;;  %v706_v62 = vadd.f32 %v4577_v45, %v348_v16  ;;  %v1574_v32 = vpack.c.b16 %v4165_v28, %v4276_v47  ;;  %v1552_v51 = vshrl.u32 %v4612_v17, 16 }
 0x110   :  { %v1554_v61 = vrot.slane %v1552_v51, 4 }
 0x113   :  { %v805_v59 = vpop.f32.mrf.mxu3 }
 0x114   :  { %v838_v10 = vadd.f32 %v805_v59, %v704_v12  ;;  %v942_v7 = vpop.f32.mrf.mxu0  ;;  %v4718_v20 = vpop.f32.mrf.mxu1  ;;  %v99_v12 = vld [vmem:[%s5688_s0 + $0x164] sm:$0x1] }
 0x115   :  { %v1561_v16 = vshll.u32 %v99_v12, 16 }
 0x116   :  { %v4689_v52 = vadd.f32 %v939_v5, %v838_v10  ;;  %v1555_v5 = vshll.u32 %v4612_v17, 16  ;;  %v5777_v17 = vld [vmem:[#allocation12_spill] sm:$0xff] }
 0x117   :  { %3512 = vmatmul.msk.bf16.gmra.mxu0 %vm176_vm1, %v1572_v2  ;;  %v5776_v2 = vld [vmem:[#allocation10_spill] sm:$0xff] }
 0x118   :  { %3503 = vmatmul.msk.bf16.gmra.mxu3 %vm176_vm1, %v1440_v21  ;;  %v1557_v46 = vrot.slane %v1555_v5, 5  ;;  %v1575_v10 = vpack.c.b16 %v5777_v17, %v5776_v2  ;;  %v5780_v21 = vld [vmem:[#allocation8_spill] sm:$0xff] }
 0x11b   :  { %v808_v33 = vpop.f32.mrf.mxu3 }
 0x11c   :  { %v839_v19 = vadd.f32 %v808_v33, %v4567_v23  ;;  %v944_v15 = vpop.f32.mrf.mxu0  ;;  %v4737_v47 = vpop.f32.mrf.mxu1  ;;  %v5781_v33 = vunpack.c.l.b16 %v5780_v21  ;;  %v1309_v21 = vadd.f32 %v4718_v20, %v4643_v30  ;;  %v4851_v30 = vld [vmem:[%s5691_s3] ss:$0 sm:$0xff] }
 0x11e   :  { %v4694_v36 = vadd.f32 %v942_v7, %v839_v19  ;;  %v5778_v7 = vld [vmem:[#allocation7_spill] sm:$0xff] }
 0x11f   :  { %v5779_v0 = vunpack.c.l.b16 %v5778_v7 }
 0x121   :  { %v1443_v19 = vpack.c.b16 %v5781_v33, %v5779_v0 }
 0x123   :  { %v810_v37 = vpop.f32.mrf.mxu3 }
 0x124   :  { %v840_v63 = vadd.f32 %v810_v37, %v706_v62  ;;  %v947_v34 = vpop.f32.mrf.mxu0  ;;  %v4754_v62 = vpop.f32.mrf.mxu1 }
 0x126   :  { %v4705_v23 = vadd.f32 %v944_v15, %v840_v63  ;;  %v1558_v15 = vor.u32 %v1557_v46, %v1554_v61 }
 0x127   :  { %3513 = vmatmul.msk.bf16.gmra.mxu0 %vm176_vm1, %v1573_v41  ;;  %v1563_v41 = vrot.slane %v1561_v16, 5 }
 0x128   :  { %3504 = vmatmul.msk.bf16.gmra.mxu3 %vm176_vm1, %v1441_v35  ;;  %v1559_v37 = vrot.slane %v1558_v15, 4 }
 0x12a   :  { %v1564_v35 = vsel %vm3888_vm4, %v1559_v37, %v1563_v41  ;;  %v1310_v41 = vadd.f32 %v4737_v47, %v4652_v29 }
 0x12b   :  { %v813_v53 = vpop.f32.mrf.mxu3 }
 0x12c   :  { %v841_v45 = vadd.f32 %v813_v53, %v4605_v50  ;;  %v4712_v55 = vpop.f32.mrf.mxu0  ;;  %v4728_v50 = vpop.f32.mrf.mxu2  ;;  %v108_v53 = vld [vmem:[%s5688_s0 + $0x1a8] sm:$0xf] }
 0x12d   :  { %v4770_v9 = vpop.f32.mrf.mxu1 }
 0x12e   :  { %v4716_v18 = vadd.f32 %v947_v34, %v841_v45 }
 0x133   :  { %v4720_v58 = vpop.f32.mrf.mxu3 }
 0x134   :  { %v952_v22 = vpop.f32.mrf.mxu0  ;;  %v4741_v26 = vpop.f32.mrf.mxu2 }
 0x135   :  { %v4793_v61 = vpop.f32.mrf.mxu1 }
 0x137   :  { %3514 = vmatmul.msk.bf16.gmra.mxu0 %vm176_vm1, %v1574_v32  ;;  %v1568_v32 = vunpack.c.l.b16 %v1564_v35  ;;  %v3722_v35 = vld [vmem:[%s5692_s4 + $0x28] sm:$0xff] }
 0x138   :  { %3505 = vmatmul.msk.bf16.gmra.mxu3 %vm176_vm1, %v1442_v43  ;;  %v5783_v43 = vld [vmem:[#allocation9_spill] sm:$0xff]  ;;  %2816 = vmatpush.bf16.msrb.mxu2 %v3722_v35 }
 0x13b   :  { %v818_v44 = vpop.f32.mrf.mxu3 }
 0x13c   :  { %v843_v1 = vadd.f32 %v818_v44, %v4628_v14  ;;  %v4735_v28 = vpop.f32.mrf.mxu0  ;;  %v4758_v63 = vpop.f32.mrf.mxu2  ;;  %v5784_v44 = vunpack.c.l.b16 %v5783_v43 }
 0x13d   :  { %v4827_v0 = vpop.f32.mrf.mxu1 }
 0x13e   :  { %v4739_v38 = vadd.f32 %v952_v22, %v843_v1  ;;  %v1436_v22 = vunpack.c.l.b16 %v108_v53  ;;  %v3771_v1 = vmov 0.0   ;;  %v1416_v53 = vadd.f32 %v4741_v26, %v1310_v41  ;;  %v3721_v26 = vld [vmem:[%s5692_s4 + $0x20] sm:$0xff] }
 0x13f   :  { %1706 = vst.msk [vmem:[#allocation2] sm:$0xff] %vm1705_vm5, %v3771_v1  ;;  %2698 = vmatpush.bf16.msrb.mxu1 %v3721_v26 }
 0x140   :  { %v1444_v51 = vpack.c.b16 %v1436_v22, %v5784_v44  ;;  %1717 = vst.msk [vmem:[#allocation2] sm:$0x1] %vm1716_vm6, %v3771_v1  ;;  %v1311_v44 = vadd.f32 %v4754_v62, %v4659_v54 }
 0x141   :  { %1718 = vst.msk [vmem:[#allocation2 + $0x10] sm:$0x1] %vm1716_vm6, %v3771_v1 }
 0x142   :  { %1709 = vst.msk [vmem:[#allocation2 + $0xa0] sm:$0xff] %vm1705_vm5, %v3771_v1 }
 0x143   :  { %v4746_v59 = vpop.f32.mrf.mxu3  ;;  %1712 = vst.msk [vmem:[#allocation2 + $0x90] sm:$0xff] %vm1705_vm5, %v3771_v1 }
 0x144   :  { %v957_v14 = vpop.f32.mrf.mxu0  ;;  %v4777_v5 = vpop.f32.mrf.mxu2  ;;  %1714 = vst.msk [vmem:[#allocation2 + $0x130] sm:$0xff] %vm1705_vm5, %v3771_v1 }
 0x145   :  { %1719 = vst.msk [vmem:[#allocation2 + $0x20] sm:$0x1] %vm1716_vm6, %v3771_v1  ;;  %v4859_v37 = vpop.f32.mrf.mxu1 }
 0x146   :  { %1720 = vst.msk [vmem:[#allocation2 + $0x30] sm:$0x1] %vm1716_vm6, %v3771_v1 }
 0x147   :  { %3515 = vmatmul.msk.bf16.gmra.mxu0 %vm176_vm1, %v1575_v10  ;;  %1721 = vst.msk [vmem:[#allocation2 + $0x40] sm:$0x1] %vm1716_vm6, %v3771_v1  ;;  %v1774_v29 = vld [vmem:[#allocation2] sm:$0xff] }
 0x148   :  { %3506 = vmatmul.msk.bf16.gmra.mxu3 %vm176_vm1, %v1443_v19  ;;  %1722 = vst.msk [vmem:[#allocation2 + $0x50] sm:$0x1] %vm1716_vm6, %v3771_v1  ;;  %v1415_v19 = vadd.f32 %v4728_v50, %v1309_v21 }
 0x149   :  { %1723 = vst.msk [vmem:[#allocation2 + $0x60] sm:$0x1] %vm1716_vm6, %v3771_v1 }
 0x14a   :  { %1724 = vst.msk [vmem:[#allocation2 + $0x70] sm:$0x1] %vm1716_vm6, %v3771_v1 }
 0x14b   :  { %v823_v34 = vpop.f32.mrf.mxu3  ;;  %1725 = vst.msk [vmem:[#allocation2 + $0x80] sm:$0x1] %vm1716_vm6, %v3771_v1 }
 0x14c   :  { %v845_v31 = vadd.f32 %v823_v34, %v4573_v24  ;;  %v4761_v8 = vpop.f32.mrf.mxu0  ;;  %v1576_v24 = vpack.c.b16 %v1568_v32, %v5782_v57  ;;  %v4808_v10 = vpop.f32.mrf.mxu2  ;;  %1728 = vst.msk [vmem:[#allocation2 + $0xb0] sm:$0x1] %vm1716_vm6, %v3771_v1 }
 0x14d   :  { %1729 = vst.msk [vmem:[#allocation2 + $0xc0] sm:$0x1] %vm1716_vm6, %v3771_v1 }
 0x14e   :  { %v4768_v45 = vadd.f32 %v957_v14, %v845_v31  ;;  %1730 = vst.msk [vmem:[#allocation2 + $0xd0] sm:$0x1] %vm1716_vm6, %v3771_v1  ;;  %v3720_v31 = vld [vmem:[%s5692_s4 + $0x18] sm:$0xff] }
 0x14f   :  { %1731 = vst.msk [vmem:[#allocation2 + $0xe0] sm:$0x1] %vm1716_vm6, %v3771_v1  ;;  %2562 = vmatpush.bf16.msrb.mxu0 %v3720_v31 }
 0x150   :  { %1732 = vst.msk [vmem:[#allocation2 + $0xf0] sm:$0x1] %vm1716_vm6, %v3771_v1 }
 0x151   :  { %1733 = vst.msk [vmem:[#allocation2 + $0x100] sm:$0x1] %vm1716_vm6, %v3771_v1 }
 0x152   :  { %1734 = vst.msk [vmem:[#allocation2 + $0x110] sm:$0x1] %vm1716_vm6, %v3771_v1 }
 0x153   :  { %v4772_v48 = vpop.f32.mrf.mxu3  ;;  %1735 = vst.msk [vmem:[#allocation2 + $0x120] sm:$0x1] %vm1716_vm6, %v3771_v1 }
 0x154   :  { %v962_v13 = vpop.f32.mrf.mxu0  ;;  %v4839_v33 = vpop.f32.mrf.mxu2  ;;  %1738 = vst.msk [vmem:[#allocation2 + $0x19] sm:$0x1] %vm1716_vm6, %v3771_v1 }
 0x155   :  { %1739 = vst.msk [vmem:[#allocation2 + $0x29] sm:$0x1] %vm1716_vm6, %v3771_v1 }
 0x156   :  { %1740 = vst.msk [vmem:[#allocation2 + $0x39] sm:$0x1] %vm1716_vm6, %v3771_v1 }
 0x157   :  { %3516 = vmatmul.msk.bf16.gmra.mxu0 %vm176_vm1, %v1576_v24  ;;  %1741 = vst.msk [vmem:[#allocation2 + $0x49] sm:$0x1] %vm1716_vm6, %v3771_v1 }
 0x158   :  { %3507 = vmatmul.msk.bf16.gmra.mxu3 %vm176_vm1, %v1444_v51  ;;  %1742 = vst.msk [vmem:[#allocation2 + $0x59] sm:$0x1] %vm1716_vm6, %v3771_v1 }
 0x159   :  { %1743 = vst.msk [vmem:[#allocation2 + $0x69] sm:$0x1] %vm1716_vm6, %v3771_v1 }
 0x15a   :  { %1744 = vst.msk [vmem:[#allocation2 + $0x79] sm:$0x1] %vm1716_vm6, %v3771_v1 }
 0x15b   :  { %v828_v46 = vpop.f32.mrf.mxu3  ;;  %1745 = vst.msk [vmem:[#allocation2 + $0x89] sm:$0x1] %vm1716_vm6, %v3771_v1 }
 0x15c   :  { %v847_v12 = vadd.f32 %v828_v46, %v4617_v25  ;;  %v4798_v2 = vpop.f32.mrf.mxu0  ;;  %v3719_v25 = vld [vmem:[%s5692_s4 + $0x10] sm:$0xff]  ;;  %1748 = vst.msk [vmem:[#allocation2 + $0xb9] sm:$0x1] %vm1716_vm6, %v3771_v1  ;;  %v4879_v47 = vpop.f32.mrf.mxu2 }
 0x15d   :  { %2452 = vmatpush.bf16.msrb.mxu3 %v3719_v25  ;;  %1749 = vst.msk [vmem:[#allocation2 + $0xc9] sm:$0x1] %vm1716_vm6, %v3771_v1  ;;  %v4900_v46 = vpop.f32.mrf.mxu1 }
 0x15e   :  { %v4804_v17 = vadd.f32 %v962_v13, %v847_v12  ;;  %v4887_v13 = vpack.c.bf16 %v1774_v29, %v1774_v29  ;;  %1750 = vst.msk [vmem:[#allocation2 + $0xd9] sm:$0x1] %vm1716_vm6, %v3771_v1 }
 0x15f   :  { %1751 = vst.msk [vmem:[#allocation2 + $0xe9] sm:$0x1] %vm1716_vm6, %v3771_v1 }
 0x160   :  { %1752 = vst.msk [vmem:[#allocation2 + $0xf9] sm:$0x1] %vm1716_vm6, %v3771_v1  ;;  %v1857_v12 = vshrl.u32 %v4887_v13, 16  ;;  %v1860_v25 = vshll.u32 %v4887_v13, 16 }
 0x161   :  { %1753 = vst.msk [vmem:[#allocation2 + $0x109] sm:$0x1] %vm1716_vm6, %v3771_v1 }
 0x162   :  { %1754 = vst.msk [vmem:[#allocation2 + $0x119] sm:$0x1] %vm1716_vm6, %v3771_v1  ;;  %v1862_v31 = vrot.slane %v1860_v25, 5 }
 0x163   :  { %v4821_v14 = vpop.f32.mrf.mxu3  ;;  %1755 = vst.msk [vmem:[#allocation2 + $0x129] sm:$0x1] %vm1716_vm6, %v3771_v1 }
 0x164   :  { %v1613_v7 = vpop.f32.mrf.mxu0  ;;  %1726 = vst.msk [vmem:[#allocation2 + $0x90] sm:$0x1] %vm1716_vm6, %v3771_v1 }
 0x165   :  { %1727 = vst.msk [vmem:[#allocation2 + $0xa0] sm:$0x1] %vm1716_vm6, %v3771_v1  ;;  %v4938_v25 = vpop.f32.mrf.mxu1 }
 0x166   :  { %1736 = vst.msk [vmem:[#allocation2 + $0x130] sm:$0x1] %vm1716_vm6, %v3771_v1 }
 0x167   :  { %1708 = vst.msk [vmem:[#allocation2 + $0x8] sm:$0x3] %vm1707_vm7, %v3771_v1 }
 0x168   :  { %1737 = vst.msk [vmem:[#allocation2 + $0x9] sm:$0x1] %vm1716_vm6, %v3771_v1 }
 0x169   :  { %1710 = vst.msk [vmem:[#allocation2 + $0xa8] sm:$0x3] %vm1707_vm7, %v3771_v1 }
 0x16a   :  { %1713 = vst.msk [vmem:[#allocation2 + $0x98] sm:$0x3] %vm1707_vm7, %v3771_v1 }
 0x16b   :  { %v1481_v15 = vpop.f32.mrf.mxu3  ;;  %1715 = vst.msk [vmem:[#allocation2 + $0x138] sm:$0x3] %vm1707_vm7, %v3771_v1 }
 0x16c   :  { %v1521_v16 = vadd.f32 %v1481_v15, %v1415_v19  ;;  %v1615_v20 = vpop.f32.mrf.mxu0  ;;  %1746 = vst.msk [vmem:[#allocation2 + $0x99] sm:$0x1] %vm1716_vm6, %v3771_v1 }
 0x16d   :  { %1747 = vst.msk [vmem:[#allocation2 + $0xa9] sm:$0x1] %vm1716_vm6, %v3771_v1 }
 0x16e   :  { %v1653_v50 = vadd.f32 %v1613_v7, %v1521_v16  ;;  %v1417_v7 = vadd.f32 %v4758_v63, %v1311_v44  ;;  %v4915_v63 = vpop.f32.mrf.mxu2  ;;  %1756 = vst.msk [vmem:[#allocation2 + $0x139] sm:$0x1] %vm1716_vm6, %v3771_v1 }
 0x170   :  { %v1673_v34 = vadd.f32 %v4851_v30, %v1653_v50  ;;  %v2202_v50 = vunpack.c.l.b16 %v4887_v13 }
 0x172   :  { %v1689_v32 = vmax.f32 %v1673_v34, 0.0  ;;  %v1859_v34 = vrot.slane %v1857_v12, 4 }
 0x173   :  { %v1483_v22 = vpop.f32.mrf.mxu3 }
 0x174   :  { %1758 = vst.msk [vmem:[#allocation2 + $0x11] sm:$0xff] %vm1705_vm5, %v1689_v32  ;;  %v1522_v57 = vadd.f32 %v1483_v22, %v1416_v53  ;;  %v1618_v24 = vpop.f32.mrf.mxu0  ;;  %v1312_v32 = vadd.f32 %v4770_v9, %v4671_v49 }
 0x176   :  { %v1654_v43 = vadd.f32 %v1615_v20, %v1522_v57  ;;  %v1418_v44 = vadd.f32 %v4777_v5, %v1312_v32  ;;  %v1313_v5 = vadd.f32 %v4793_v61, %v4681_v40 }
 0x178   :  { %v1674_v51 = vadd.f32 %v4851_v30, %v1654_v43 }
 0x17a   :  { %v1690_v21 = vmax.f32 %v1674_v51, 0.0 }
 0x17b   :  { %v1486_v54 = vpop.f32.mrf.mxu3  ;;  %v1776_v62 = vld [vmem:[#allocation2 + $0x10] sm:$0xff]  ;;  %v1777_v19 = vld [vmem:[#allocation2 + $0x18] sm:$0x3] }
 0x17c   :  { %1759 = vst.msk [vmem:[#allocation2 + $0x21] sm:$0xff] %vm1705_vm5, %v1690_v21  ;;  %v1523_v15 = vadd.f32 %v1486_v54, %v1417_v7  ;;  %v1620_v16 = vpop.f32.mrf.mxu0  ;;  %v4912_v20 = vpack.c.bf16 %v1776_v62, %v1776_v62  ;;  %v1817_v41 = vpack.c.bf16 %v1777_v19, %v1777_v19 }
 0x17e   :  { %v1655_v35 = vadd.f32 %v1618_v24, %v1523_v15  ;;  %v2203_v53 = vunpack.c.l.b16 %v4912_v20  ;;  %v1871_v29 = vshrl.u32 %v4912_v20, 16  ;;  %v1874_v22 = vshll.u32 %v4912_v20, 16 }
 0x17f   :  { %v1863_v24 = vor.u32 %v1862_v31, %v1859_v34  ;;  %v1880_v43 = vshll.u32 %v1817_v41, 16  ;;  %v3544_v12 = vrot.slane %v4912_v20, 9  ;;  %v2330_v21 = vrot.slane %v1817_v41, 5 }
 0x180   :  { %v1675_v57 = vadd.f32 %v4851_v30, %v1655_v35  ;;  %v2218_v26 = vpack.c.b16 %v2203_v53, %v2202_v50  ;;  %v1873_v49 = vrot.slane %v1871_v29, 4  ;;  %v1876_v9 = vrot.slane %v1874_v22, 5 }
 0x181   :  { %v3543_v31 = vrot.slane %v4887_v13, 9  ;;  %v1864_v35 = vrot.slane %v1863_v24, 4  ;;  %v1882_v40 = vrot.slane %v1880_v43, 5  ;;  %v2331_v13 = vsel %vm4947_vm10, %v3544_v12, %v2330_v21 }
 0x182   :  { %v1691_v51 = vmax.f32 %v1675_v57, 0.0  ;;  %3535 = vmatmul.msk.bf16.vlgmr.msra.gmra.mxu2 %vm1705_vm5, %v2218_v26  ;;  %v1877_v62 = vor.u32 %v1876_v9, %v1873_v49  ;;  %v1419_v26 = vadd.f32 %v4808_v10, %v1313_v5  ;;  %v4957_v49 = vpop.f32.mrf.mxu2  ;;  %v1775_v9 = vld [vmem:[#allocation2 + $0x8] sm:$0x3] }
 0x183   :  { %v1488_v7 = vpop.f32.mrf.mxu3  ;;  %v1778_v54 = vld [vmem:[#allocation2 + $0x20] sm:$0xff]  ;;  %v1779_v19 = vld [vmem:[#allocation2 + $0x28] sm:$0x3] }
 0x184   :  { %1760 = vst.msk [vmem:[#allocation2 + $0x31] sm:$0xff] %vm1705_vm5, %v1691_v51  ;;  %v1524_v15 = vadd.f32 %v1488_v7, %v1418_v44  ;;  %v1623_v20 = vpop.f32.mrf.mxu0  ;;  %v1818_v41 = vpack.c.bf16 %v1778_v54, %v1778_v54  ;;  %v1819_v34 = vpack.c.bf16 %v1779_v19, %v1779_v19  ;;  %v1878_v32 = vrot.slane %v1877_v62, 4 }
 0x185   :  { %v1815_v44 = vpack.c.bf16 %v1775_v9, %v1775_v9 }
 0x186   :  { %v1656_v61 = vadd.f32 %v1620_v16, %v1524_v15  ;;  %v2204_v29 = vunpack.c.l.b16 %v1818_v41  ;;  %v3545_v22 = vrot.slane %v1818_v41, 9  ;;  %v2334_v57 = vrot.slane %v1819_v34, 5 }
 0x187   :  { %v1885_v24 = vshrl.u32 %v1818_v41, 16  ;;  %v1888_v43 = vshll.u32 %v1818_v41, 16  ;;  %v1883_v7 = vsel %vm3888_vm4, %v1878_v32, %v1882_v40  ;;  %v1894_v19 = vshll.u32 %v1819_v34, 16 }
 0x188   :  { %v1676_v16 = vadd.f32 %v4851_v30, %v1656_v61  ;;  %v2517_v51 = vpack.c.b16 %v2204_v29, %v2203_v53  ;;  %v4968_v10 = vsel %vm4947_vm10, %v3545_v22, %v2334_v57  ;;  %v2326_v21 = vrot.slane %v1815_v44, 5 }
 0x189   :  { %v1887_v54 = vrot.slane %v1885_v24, 4  ;;  %v1890_v62 = vrot.slane %v1888_v43, 5  ;;  %v1866_v1 = vshll.u32 %v1815_v44, 16  ;;  %v2393_v5 = vunpack.c.l.b16 %v4968_v10 }
 0x18a   :  { %v1692_v12 = vmax.f32 %v1676_v16, 0.0  ;;  %3579 = vmatmul.msk.bf16.vlgmr.msrb.gmra.mxu0 %vm1705_vm5, %v2517_v51  ;;  %v2392_v15 = vunpack.c.l.b16 %v2331_v13  ;;  %v4972_v53 = vunpack.c.l.b16 %v1883_v7  ;;  %v1896_v9 = vrot.slane %v1894_v19, 5  ;;  %v4977_v16 = vpop.f32.mrf.mxu1 }
 0x18b   :  { %v1491_v41 = vpop.f32.mrf.mxu3  ;;  %v1780_v61 = vld [vmem:[#allocation2 + $0x30] sm:$0xff]  ;;  %v1781_v32 = vld [vmem:[#allocation2 + $0x38] sm:$0x3]  ;;  %v1891_v40 = vor.u32 %v1890_v62, %v1887_v54  ;;  %v2327_v34 = vsel %vm4947_vm10, %v3543_v31, %v2326_v21  ;;  %v1868_v57 = vrot.slane %v1866_v1, 5  ;;  %v1314_v54 = vadd.f32 %v4827_v0, %v4689_v52 }
 0x18c   :  { %1761 = vst.msk [vmem:[#allocation2 + $0x41] sm:$0xff] %vm1705_vm5, %v1692_v12  ;;  %v1525_v22 = vadd.f32 %v1491_v41, %v1419_v26  ;;  %v1625_v24 = vpop.f32.mrf.mxu0  ;;  %v1820_v43 = vpack.c.bf16 %v1780_v61, %v1780_v61  ;;  %v2391_v44 = vunpack.c.l.b16 %v2327_v34  ;;  %v1821_v13 = vpack.c.bf16 %v1781_v32, %v1781_v32  ;;  %v4992_v34 = vpop.f32.mrf.mxu2 }
 0x18d   :  { %v4981_v51 = vpack.c.b16 %v2393_v5, %v2392_v15  ;;  %v1892_v7 = vrot.slane %v1891_v40, 4  ;;  %v1869_v31 = vsel %vm3888_vm4, %v1864_v35, %v1868_v57 }
 0x18e   :  { %v1657_v62 = vadd.f32 %v1623_v20, %v1525_v22  ;;  %v2205_v26 = vunpack.c.l.b16 %v1820_v43  ;;  %v2407_v19 = vpack.c.b16 %v2392_v15, %v2391_v44  ;;  %v2083_v12 = vunpack.c.l.b16 %v1869_v31 }
 0x18f   :  { %v3546_v21 = vrot.slane %v1820_v43, 9  ;;  %v1897_v1 = vsel %vm3888_vm4, %v1892_v7, %v1896_v9  ;;  %v1899_v32 = vshrl.u32 %v1820_v43, 16  ;;  %v1902_v40 = vshll.u32 %v1820_v43, 16 }
 0x190   :  { %v1677_v41 = vadd.f32 %v4851_v30, %v1657_v62  ;;  %v4990_v61 = vpack.c.b16 %v2205_v26, %v2204_v29  ;;  %3565 = vmatmul.msk.bf16.vlgmr.msrb.gmra.mxu3 %vm1705_vm5, %v2407_v19  ;;  %v2099_v52 = vpack.c.b16 %v4972_v53, %v2083_v12  ;;  %v2338_v0 = vrot.slane %v1821_v13, 5 }
 0x191   :  { %v1908_v20 = vshll.u32 %v1821_v13, 16  ;;  %v4996_v35 = vunpack.c.l.b16 %v1897_v1  ;;  %v1420_v15 = vadd.f32 %v4839_v33, %v1314_v54  ;;  %v1901_v29 = vrot.slane %v1899_v32, 4 }
 0x192   :  { %v1693_v22 = vmax.f32 %v1677_v41, 0.0  ;;  %3536 = vmatmul.msk.bf16.gmra.mxu2 %vm1705_vm5, %v4990_v61  ;;  %v1904_v9 = vrot.slane %v1902_v40, 5  ;;  %3523 = vmatmul.msk.bf16.vlgmr.msra.gmra.mxu1 %vm1705_vm5, %v2099_v52  ;;  %v353_v13 = vadd.f32 %v4579_v60, %v4575_v6  ;;  %v358_v19 = vadd.f32 %v4709_v11, %v4619_v27  ;;  %v5013_v60 = vpop.f32.mrf.mxu1 }
 0x193   :  { %v1493_v57 = vpop.f32.mrf.mxu3  ;;  %v1782_v43 = vld [vmem:[#allocation2 + $0x40] sm:$0xff]  ;;  %v1783_v7 = vld [vmem:[#allocation2 + $0x48] sm:$0x3]  ;;  %v2339_v12 = vsel %vm4947_vm10, %v3546_v21, %v2338_v0  ;;  %v1910_v1 = vrot.slane %v1908_v20, 5  ;;  %v1315_v6 = vadd.f32 %v4859_v37, %v4694_v36 }
 0x194   :  { %1762 = vst.msk [vmem:[#allocation2 + $0x51] sm:$0xff] %vm1705_vm5, %v1693_v22  ;;  %v1526_v33 = vadd.f32 %v1493_v57, %v1420_v15  ;;  %v1628_v54 = vpop.f32.mrf.mxu0  ;;  %v1822_v62 = vpack.c.bf16 %v1782_v43, %v1782_v43  ;;  %v1905_v31 = vor.u32 %v1904_v9, %v1901_v29  ;;  %v1823_v41 = vpack.c.bf16 %v1783_v7, %v1783_v7 }
 0x195   :  { %v2394_v27 = vunpack.c.l.b16 %v2339_v12  ;;  %v1421_v36 = vadd.f32 %v4879_v47, %v1315_v6 }
 0x196   :  { %v1658_v32 = vadd.f32 %v1625_v24, %v1526_v33  ;;  %v2206_v40 = vunpack.c.l.b16 %v1822_v62  ;;  %v1906_v52 = vrot.slane %v1905_v31, 4  ;;  %v3547_v44 = vrot.slane %v1822_v62, 9 }
 0x197   :  { %v2342_v15 = vrot.slane %v1823_v41, 5  ;;  %v1913_v22 = vshrl.u32 %v1822_v62, 16  ;;  %v1916_v29 = vshll.u32 %v1822_v62, 16  ;;  %v1922_v57 = vshll.u32 %v1823_v41, 16  ;;  %v5029_v62 = vpop.f32.mrf.mxu2 }
 0x198   :  { %v1678_v9 = vadd.f32 %v4851_v30, %v1658_v32  ;;  %v2518_v11 = vpack.c.b16 %v2206_v40, %v2205_v26  ;;  %v1911_v21 = vsel %vm3888_vm4, %v1906_v52, %v1910_v1  ;;  %v708_v26 = vadd.f32 %v4621_v3, %v353_v13 }
 0x199   :  { %v5020_v24 = vsel %vm4947_vm10, %v3547_v44, %v2342_v15  ;;  %v1915_v0 = vrot.slane %v1913_v22, 4  ;;  %v1918_v20 = vrot.slane %v1916_v29, 5  ;;  %v5024_v43 = vunpack.c.l.b16 %v1911_v21 }
 0x19a   :  { %v1694_v37 = vmax.f32 %v1678_v9, 0.0  ;;  %3580 = vmatmul.msk.bf16.gmra.mxu0 %vm1705_vm5, %v2518_v11  ;;  %v2395_v7 = vunpack.c.l.b16 %v5020_v24  ;;  %v710_v33 = vadd.f32 %v4714_v4, %v358_v19  ;;  %v842_v3 = vadd.f32 %v4720_v58, %v708_v26 }
 0x19b   :  { %v1496_v44 = vpop.f32.mrf.mxu3  ;;  %v1784_v31 = vld [vmem:[#allocation2 + $0x50] sm:$0xff]  ;;  %v1785_v12 = vld [vmem:[#allocation2 + $0x58] sm:$0x3]  ;;  %v1919_v1 = vor.u32 %v1918_v20, %v1915_v0  ;;  %v5039_v4 = vpack.c.b16 %v2394_v27, %v2393_v5  ;;  %v1924_v19 = vrot.slane %v1922_v57, 5  ;;  %v1316_v15 = vadd.f32 %v4900_v46, %v4705_v23  ;;  %v1296_v46 = vpop.f32.mrf.mxu1 }
 0x19c   :  { %1763 = vst.msk [vmem:[#allocation2 + $0x61] sm:$0xff] %vm1705_vm5, %v1694_v37  ;;  %v1527_v47 = vadd.f32 %v1496_v44, %v1421_v36  ;;  %v1630_v41 = vpop.f32.mrf.mxu0  ;;  %v1824_v32 = vpack.c.bf16 %v1784_v31, %v1784_v31  ;;  %v1825_v52 = vpack.c.bf16 %v1785_v12, %v1785_v12  ;;  %v5034_v6 = vpack.c.b16 %v2395_v7, %v2394_v27 }
 0x19d   :  { %v1920_v13 = vrot.slane %v1919_v1, 4  ;;  %v5045_v29 = vpack.c.b16 %v5024_v43, %v4996_v35  ;;  %v976_v23 = vadd.f32 %v4712_v55, %v842_v3  ;;  %v1422_v37 = vadd.f32 %v4915_v63, %v1316_v15 }
 0x19e   :  { %v1659_v22 = vadd.f32 %v1628_v54, %v1527_v47  ;;  %v2207_v9 = vunpack.c.l.b16 %v1824_v32  ;;  %v3548_v11 = vrot.slane %v1824_v32, 9  ;;  %v1927_v58 = vshrl.u32 %v1824_v32, 16 }
 0x19f   :  { %v1925_v21 = vsel %vm3888_vm4, %v1920_v13, %v1924_v19  ;;  %v1930_v0 = vshll.u32 %v1824_v32, 16  ;;  %v2346_v27 = vrot.slane %v1825_v52, 5  ;;  %v1936_v36 = vshll.u32 %v1825_v52, 16 }
 0x1a0   :  { %v1679_v10 = vadd.f32 %v4851_v30, %v1659_v22  ;;  %v5050_v5 = vpack.c.b16 %v2207_v9, %v2206_v40  ;;  %v5052_v20 = vunpack.c.l.b16 %v1925_v21  ;;  %3566 = vmatmul.msk.bf16.gmra.mxu3 %vm1705_vm5, %v5039_v4  ;;  %v1929_v54 = vrot.slane %v1927_v58, 4 }
 0x1a1   :  { %v1932_v57 = vrot.slane %v1930_v0, 5  ;;  %v1317_v44 = vadd.f32 %v4938_v25, %v4716_v18  ;;  %v844_v55 = vadd.f32 %v4746_v59, %v710_v33  ;;  %v2347_v52 = vsel %vm4947_vm10, %v3548_v11, %v2346_v27  ;;  %v1402_v25 = vpop.f32.mrf.mxu2 }
 0x1a2   :  { %v1695_v26 = vmax.f32 %v1679_v10, 0.0  ;;  %3537 = vmatmul.msk.bf16.gmra.mxu2 %vm1705_vm5, %v5050_v5  ;;  %3524 = vmatmul.msk.bf16.gmra.mxu1 %vm1705_vm5, %v5045_v29  ;;  %v1318_v18 = vadd.f32 %v4977_v16, %v976_v23  ;;  %v1319_v59 = vadd.f32 %v5013_v60, %v4739_v38  ;;  %v1938_v19 = vrot.slane %v1936_v36, 5 }
 0x1a3   :  { %v1498_v31 = vpop.f32.mrf.mxu3  ;;  %v1786_v12 = vld [vmem:[#allocation2 + $0x60] sm:$0xff]  ;;  %v1933_v1 = vor.u32 %v1932_v57, %v1929_v54  ;;  %v1787_v47 = vld [vmem:[#allocation2 + $0x68] sm:$0x3]  ;;  %v978_v0 = vadd.f32 %v4735_v28, %v844_v55  ;;  %v2396_v10 = vunpack.c.l.b16 %v2347_v52  ;;  %v1423_v28 = vadd.f32 %v4957_v49, %v1317_v44 }
 0x1a4   :  { %1764 = vst.msk [vmem:[#allocation2 + $0x71] sm:$0xff] %vm1705_vm5, %v1695_v26  ;;  %v1528_v63 = vadd.f32 %v1498_v31, %v1422_v37  ;;  %v1633_v32 = vpop.f32.mrf.mxu0  ;;  %v1826_v3 = vpack.c.bf16 %v1786_v12, %v1786_v12  ;;  %v1827_v13 = vpack.c.bf16 %v1787_v47, %v1787_v47  ;;  %v1424_v37 = vadd.f32 %v4992_v34, %v1318_v18  ;;  %v1299_v31 = vpop.f32.mrf.mxu1 }
 0x1a5   :  { %v1934_v33 = vrot.slane %v1933_v1, 4  ;;  %v1320_v55 = vadd.f32 %v1296_v46, %v978_v0  ;;  %v5095_v49 = vpack.c.b16 %v2396_v10, %v2395_v7 }
 0x1a6   :  { %v1660_v15 = vadd.f32 %v1630_v41, %v1528_v63  ;;  %v2208_v22 = vunpack.c.l.b16 %v1826_v3  ;;  %v3549_v21 = vrot.slane %v1826_v3, 9  ;;  %v2350_v58 = vrot.slane %v1827_v13, 5 }
 0x1a7   :  { %v1941_v54 = vshrl.u32 %v1826_v3, 16  ;;  %v1944_v57 = vshll.u32 %v1826_v3, 16  ;;  %v1939_v16 = vsel %vm3888_vm4, %v1934_v33, %v1938_v19  ;;  %v1950_v36 = vshll.u32 %v1827_v13, 16  ;;  %5787 = vst [vmem:[#allocation11_spill] sm:$0xff] %v5095_v49 }
 0x1a8   :  { %v1680_v11 = vadd.f32 %v4851_v30, %v1660_v15  ;;  %v2519_v27 = vpack.c.b16 %v2208_v22, %v2207_v9  ;;  %v5079_v38 = vsel %vm4947_vm10, %v3549_v21, %v2350_v58  ;;  %v5086_v9 = vadd.f32 %v5029_v62, %v1319_v59  ;;  %v1794_v59 = vld [vmem:[#allocation2 + $0xa0] sm:$0xff] }
 0x1a9   :  { %v2397_v60 = vunpack.c.l.b16 %v5079_v38  ;;  %v1943_v41 = vrot.slane %v1941_v54, 4  ;;  %v1946_v23 = vrot.slane %v1944_v57, 5  ;;  %v5088_v1 = vunpack.c.l.b16 %v1939_v16  ;;  %v1405_v24 = vpop.f32.mrf.mxu2 }
 0x1aa   :  { %v1696_v26 = vmax.f32 %v1680_v11, 0.0  ;;  %3581 = vmatmul.msk.bf16.gmra.mxu0 %vm1705_vm5, %v2519_v27  ;;  %v846_v3 = vadd.f32 %v4772_v48, %v4603_v56  ;;  %v1952_v18 = vrot.slane %v1950_v36, 5  ;;  %v5101_v19 = vadd.f32 %v1402_v25, %v1320_v55 }
 0x1ab   :  { %v1501_v12 = vpop.f32.mrf.mxu3  ;;  %v1788_v47 = vld [vmem:[#allocation2 + $0x70] sm:$0xff]  ;;  %v1789_v63 = vld [vmem:[#allocation2 + $0x78] sm:$0x3]  ;;  %v1947_v52 = vor.u32 %v1946_v23, %v1943_v41  ;;  %v5099_v33 = vpack.c.b16 %v2397_v60, %v2396_v10  ;;  %v1321_v56 = vadd.f32 %v1299_v31, %v4768_v45  ;;  %v5106_v7 = vpack.c.b16 %v5088_v1, %v5052_v20  ;;  %v1795_v45 = vld [vmem:[#allocation2 + $0xa8] sm:$0x3] }
 0x1ac   :  { %1765 = vst.msk [vmem:[#allocation2 + $0x81] sm:$0xff] %vm1705_vm5, %v1696_v26  ;;  %v1529_v34 = vadd.f32 %v1501_v12, %v1423_v28  ;;  %v1635_v62 = vpop.f32.mrf.mxu0  ;;  %v1828_v44 = vpack.c.bf16 %v1788_v47, %v1788_v47  ;;  %v1829_v46 = vpack.c.bf16 %v1789_v63, %v1789_v63  ;;  %v5115_v57 = vpack.c.bf16 %v1794_v59, %v1794_v59 }
 0x1ad   :  { %v1948_v13 = vrot.slane %v1947_v52, 4  ;;  %v5118_v11 = vadd.f32 %v4761_v8, %v846_v3  ;;  %v5122_v23 = vadd.f32 %v1405_v24, %v1321_v56  ;;  %v5128_v31 = vpack.c.bf16 %v1795_v45, %v1795_v45  ;;  %v1793_v45 = vld [vmem:[#allocation2 + $0x98] sm:$0x3] }
 0x1ae   :  { %v1661_v48 = vadd.f32 %v1633_v32, %v1529_v34  ;;  %v2209_v15 = vunpack.c.l.b16 %v1828_v44  ;;  %v1955_v58 = vshrl.u32 %v1828_v44, 16  ;;  %v1958_v0 = vshll.u32 %v1828_v44, 16  ;;  %v1792_v32 = vld [vmem:[#allocation2 + $0x90] sm:$0xff] }
 0x1af   :  { %v1953_v21 = vsel %vm3888_vm4, %v1948_v13, %v1952_v18  ;;  %v1964_v41 = vshll.u32 %v1829_v46, 16  ;;  %v2354_v28 = vrot.slane %v1829_v46, 5  ;;  %v5132_v63 = vpack.c.bf16 %v1792_v32, %v1792_v32 }
 0x1b0   :  { %v1681_v54 = vadd.f32 %v4851_v30, %v1661_v48  ;;  %v5111_v10 = vpack.c.b16 %v2209_v15, %v2208_v22  ;;  %v5113_v25 = vunpack.c.l.b16 %v1953_v21  ;;  %3567 = vmatmul.msk.bf16.gmra.mxu3 %vm1705_vm5, %v5095_v49  ;;  %v1957_v27 = vrot.slane %v1955_v58, 4 }
 0x1b1   :  { %v1960_v16 = vrot.slane %v1958_v0, 5  ;;  %v3550_v22 = vrot.slane %v1828_v44, 9  ;;  %v1969_v44 = vshrl.u32 %v5115_v57, 16  ;;  %v1972_v46 = vshll.u32 %v5115_v57, 16 }
 0x1b2   :  { %v1697_v36 = vmax.f32 %v1681_v54, 0.0  ;;  %3538 = vmatmul.msk.bf16.gmra.mxu2 %vm1705_vm5, %v5111_v10  ;;  %3525 = vmatmul.msk.bf16.gmra.mxu1 %vm1705_vm5, %v5106_v7  ;;  %v1966_v18 = vrot.slane %v1964_v41, 5  ;;  %v3551_v59 = vrot.slane %v5115_v57, 9  ;;  %v2358_v0 = vrot.slane %v5128_v31, 5 }
 0x1b3   :  { %v1503_v26 = vpop.f32.mrf.mxu3  ;;  %v1790_v8 = vld [vmem:[#allocation2 + $0x80] sm:$0xff]  ;;  %v1961_v55 = vor.u32 %v1960_v16, %v1957_v27  ;;  %v1791_v47 = vld [vmem:[#allocation2 + $0x88] sm:$0x3]  ;;  %v2355_v24 = vsel %vm4947_vm10, %v3550_v22, %v2354_v28  ;;  %v1971_v16 = vrot.slane %v1969_v44, 4  ;;  %v1974_v41 = vrot.slane %v1972_v46, 5 }
 0x1b4   :  { %1766 = vst.msk [vmem:[#allocation2 + $0xb1] sm:$0xff] %vm1705_vm5, %v1697_v36  ;;  %v1530_v52 = vadd.f32 %v1503_v26, %v1424_v37  ;;  %v1638_v3 = vpop.f32.mrf.mxu0  ;;  %v5135_v34 = vpack.c.bf16 %v1790_v8, %v1790_v8  ;;  %v1831_v56 = vpack.c.bf16 %v1791_v47, %v1791_v47  ;;  %v2398_v36 = vunpack.c.l.b16 %v2355_v24 }
 0x1b5   :  { %v1962_v13 = vrot.slane %v1961_v55, 4  ;;  %v2210_v46 = vunpack.c.l.b16 %v5115_v57 }
 0x1b6   :  { %v1662_v48 = vadd.f32 %v1635_v62, %v1530_v52  ;;  %v5729_v21 = vunpack.c.l.b16 %v5135_v34  ;;  %v3601_v37 = vrot.slane %v5135_v34, 9  ;;  %v2760_v54 = vrot.slane %v1831_v56, 5 }
 0x1b7   :  { %v1967_v58 = vsel %vm3888_vm4, %v1962_v13, %v1966_v18  ;;  %v2621_v32 = vshrl.u32 %v5135_v34, 16  ;;  %v2624_v26 = vshll.u32 %v5135_v34, 16  ;;  %v5160_v52 = vpack.c.bf16 %v1793_v45, %v1793_v45 }
 0x1b8   :  { %v1682_v27 = vadd.f32 %v4851_v30, %v1662_v48  ;;  %v2520_v62 = vpack.c.b16 %v5729_v21, %v2209_v15  ;;  %v5153_v22 = vsel %vm4947_vm10, %v3601_v37, %v2760_v54  ;;  %v5157_v55 = vunpack.c.l.b16 %v1967_v58 }
 0x1b9   :  { %v2623_v28 = vrot.slane %v2621_v32, 4  ;;  %v2769_v47 = vunpack.c.l.b16 %v5153_v22  ;;  %v5165_v18 = vsel %vm4947_vm10, %v3551_v59, %v2358_v0  ;;  %v2626_v48 = vrot.slane %v2624_v26, 5 }
 0x1ba   :  { %v1698_v8 = vmax.f32 %v1682_v27, 0.0  ;;  %3582 = vmatmul.msk.bf16.gmra.mxu0 %vm1705_vm5, %v2520_v62  ;;  %v2630_v24 = vshll.u32 %v1831_v56, 16  ;;  %v5175_v57 = vpack.c.b16 %v2398_v36, %v2397_v60  ;;  %v1975_v27 = vor.u32 %v1974_v41, %v1971_v16 }
 0x1bb   :  { %v1506_v15 = vpop.f32.mrf.mxu3  ;;  %v1796_v44 = vld [vmem:[#allocation2 + $0xb0] sm:$0xff]  ;;  %v1797_v13 = vld [vmem:[#allocation2 + $0xb8] sm:$0x3]  ;;  %v5171_v45 = vpack.c.b16 %v2769_v47, %v2398_v36  ;;  %v1978_v59 = vshll.u32 %v5128_v31, 16  ;;  %v2627_v0 = vor.u32 %v2626_v48, %v2623_v28  ;;  %v5180_v62 = vpack.c.b16 %v5157_v55, %v5113_v25 }
 0x1bc   :  { %1767 = vst.msk [vmem:[#allocation2 + $0xc1] sm:$0xff] %vm1705_vm5, %v1698_v8  ;;  %v1531_v37 = vadd.f32 %v1506_v15, %v5086_v9  ;;  %v1836_v58 = vpack.c.bf16 %v1796_v44, %v1796_v44  ;;  %v1837_v54 = vpack.c.bf16 %v1797_v13, %v1797_v13  ;;  %v1640_v32 = vpop.f32.mrf.mxu0  ;;  %v2632_v36 = vrot.slane %v2630_v24, 5 }
 0x1bd   :  { %5788 = vst [vmem:[#allocation6_spill] sm:$0xff] %v5175_v57  ;;  %v2628_v13 = vrot.slane %v2627_v0, 4  ;;  %v3645_v16 = vrot.slane %v5132_v63, 9  ;;  %v2399_v31 = vunpack.c.l.b16 %v5165_v18 }
 0x1be   :  { %v1663_v56 = vadd.f32 %v1638_v3, %v1531_v37  ;;  %v2211_v9 = vunpack.c.l.b16 %v1836_v58  ;;  %v3552_v26 = vrot.slane %v1836_v58, 9  ;;  %v2362_v8 = vrot.slane %v1837_v54, 5 }
 0x1bf   :  { %v1983_v15 = vshrl.u32 %v1836_v58, 16  ;;  %v1986_v44 = vshll.u32 %v1836_v58, 16  ;;  %v1992_v28 = vshll.u32 %v1837_v54, 16  ;;  %v1976_v37 = vrot.slane %v1975_v27, 4 }
 0x1c0   :  { %v1683_v38 = vadd.f32 %v4851_v30, %v1663_v56  ;;  %v2222_v60 = vpack.c.b16 %v2211_v9, %v2210_v46  ;;  %3568 = vmatmul.msk.bf16.gmra.mxu3 %vm1705_vm5, %v5175_v57  ;;  %v2633_v58 = vsel %vm3888_vm4, %v2628_v13, %v2632_v36  ;;  %v3076_v46 = vrot.slane %v5160_v52, 5 }
 0x1c1   :  { %v1985_v3 = vrot.slane %v1983_v15, 4  ;;  %v1988_v41 = vrot.slane %v1986_v44, 5  ;;  %v2363_v0 = vsel %vm4947_vm10, %v3552_v26, %v2362_v8  ;;  %v1980_v56 = vrot.slane %v1978_v59, 5 }
 0x1c2   :  { %v1699_v48 = vmax.f32 %v1683_v38, 0.0  ;;  %3539 = vmatmul.msk.bf16.gmra.mxu2 %vm1705_vm5, %v2222_v60  ;;  %3526 = vmatmul.msk.bf16.gmra.mxu1 %vm1705_vm5, %v5180_v62  ;;  %v5195_v44 = vunpack.c.l.b16 %v2633_v58  ;;  %v3077_v60 = vsel %vm4947_vm10, %v3645_v16, %v3076_v46  ;;  %v1994_v21 = vrot.slane %v1992_v28, 5  ;;  %v1301_v16 = vpop.f32.mrf.mxu1 }
 0x1c3   :  { %v1508_v24 = vpop.f32.mrf.mxu3  ;;  %v1798_v18 = vld [vmem:[#allocation2 + $0xc0] sm:$0xff]  ;;  %v1989_v15 = vor.u32 %v1988_v41, %v1985_v3  ;;  %v1799_v54 = vld [vmem:[#allocation2 + $0xc8] sm:$0x3]  ;;  %v3085_v8 = vunpack.c.l.b16 %v3077_v60  ;;  %v2400_v46 = vunpack.c.l.b16 %v2363_v0 }
 0x1c4   :  { %1768 = vst.msk [vmem:[#allocation2 + $0xd1] sm:$0xff] %vm1705_vm5, %v1699_v48  ;;  %v1532_v27 = vadd.f32 %v1508_v24, %v5101_v19  ;;  %v1838_v13 = vpack.c.bf16 %v1798_v18, %v1798_v18  ;;  %v1839_v38 = vpack.c.bf16 %v1799_v54, %v1799_v54  ;;  %v1643_v12 = vpop.f32.mrf.mxu0  ;;  %v1981_v48 = vsel %vm3888_vm4, %v1976_v37, %v1980_v56 }
 0x1c5   :  { %v1990_v36 = vrot.slane %v1989_v15, 4 }
 0x1c6   :  { %v1664_v59 = vadd.f32 %v1640_v32, %v1532_v27  ;;  %v2212_v3 = vunpack.c.l.b16 %v1838_v13  ;;  %v3553_v41 = vrot.slane %v1838_v13, 9  ;;  %v2366_v58 = vrot.slane %v1839_v38, 5 }
 0x1c7   :  { %v1995_v19 = vsel %vm3888_vm4, %v1990_v36, %v1994_v21  ;;  %v1997_v24 = vshrl.u32 %v1838_v13, 16  ;;  %v2000_v18 = vshll.u32 %v1838_v13, 16  ;;  %v2006_v26 = vshll.u32 %v1839_v38, 16 }
 0x1c8   :  { %v1684_v28 = vadd.f32 %v4851_v30, %v1664_v59  ;;  %v2521_v15 = vpack.c.b16 %v2212_v3, %v2211_v9  ;;  %v5210_v32 = vsel %vm4947_vm10, %v3553_v41, %v2366_v58  ;;  %v2091_v21 = vunpack.c.l.b16 %v1981_v48  ;;  %v1407_v9 = vpop.f32.mrf.mxu2 }
 0x1c9   :  { %v5730_v54 = vunpack.c.l.b16 %v5210_v32  ;;  %v1999_v27 = vrot.slane %v1997_v24, 4  ;;  %v2002_v60 = vrot.slane %v2000_v18, 5  ;;  %v5214_v56 = vunpack.c.l.b16 %v1995_v19 }
 0x1ca   :  { %v1700_v37 = vmax.f32 %v1684_v28, 0.0  ;;  %3583 = vmatmul.msk.bf16.gmra.mxu0 %vm1705_vm5, %v2521_v15  ;;  %v5218_v13 = vpack.c.b16 %v3085_v8, %v2769_v47  ;;  %v2411_v24 = vpack.c.b16 %v2400_v46, %v2399_v31  ;;  %v2008_v22 = vrot.slane %v2006_v26, 5 }
 0x1cb   :  { %v1511_v0 = vpop.f32.mrf.mxu3  ;;  %v1800_v36 = vld [vmem:[#allocation2 + $0xd0] sm:$0xff]  ;;  %v1801_v59 = vld [vmem:[#allocation2 + $0xd8] sm:$0x3]  ;;  %v2003_v41 = vor.u32 %v2002_v60, %v1999_v27  ;;  %v5222_v58 = vpack.c.b16 %v5730_v54, %v2400_v46  ;;  %v1322_v47 = vadd.f32 %v1301_v16, %v5118_v11  ;;  %v2103_v28 = vpack.c.b16 %v5214_v56, %v2091_v21  ;;  %v1304_v21 = vpop.f32.mrf.mxu1 }
 0x1cc   :  { %5789 = vst [vmem:[#allocation10_spill] sm:$0xff] %v5218_v13  ;;  %v1533_v38 = vadd.f32 %v1511_v0, %v5122_v23  ;;  %v1840_v48 = vpack.c.bf16 %v1800_v36, %v1800_v36  ;;  %v1841_v19 = vpack.c.bf16 %v1801_v59, %v1801_v59  ;;  %v1645_v11 = vpop.f32.mrf.mxu0 }
 0x1cd   :  { %1769 = vst.msk [vmem:[#allocation2 + $0xe1] sm:$0xff] %vm1705_vm5, %v1700_v37  ;;  %v2004_v18 = vrot.slane %v2003_v41, 4  ;;  %v1428_v46 = vadd.f32 %v1407_v9, %v1322_v47 }
 0x1ce   :  { %v1665_v8 = vadd.f32 %v1643_v12, %v1533_v38  ;;  %v2213_v15 = vunpack.c.l.b16 %v1840_v48  ;;  %v3554_v27 = vrot.slane %v1840_v48, 9  ;;  %v2011_v40 = vshrl.u32 %v1840_v48, 16 }
 0x1cf   :  { %v2009_v60 = vsel %vm3888_vm4, %v2004_v18, %v2008_v22  ;;  %v2014_v54 = vshll.u32 %v1840_v48, 16  ;;  %v2370_v0 = vrot.slane %v1841_v19, 5  ;;  %v2020_v16 = vshll.u32 %v1841_v19, 16 }
 0x1d0   :  { %v1685_v37 = vadd.f32 %v4851_v30, %v1665_v8  ;;  %v5231_v23 = vpack.c.b16 %v2213_v15, %v2212_v3  ;;  %v5233_v31 = vunpack.c.l.b16 %v2009_v60  ;;  %3569 = vmatmul.msk.bf16.gmra.mxu3 %vm1705_vm5, %v2411_v24  ;;  %v2013_v12 = vrot.slane %v2011_v40, 4  ;;  %v1410_v18 = vpop.f32.mrf.mxu2 }
 0x1d1   :  { %v2016_v26 = vrot.slane %v2014_v54, 5  ;;  %v2371_v54 = vsel %vm4947_vm10, %v3554_v27, %v2370_v0  ;;  %v1323_v24 = vadd.f32 %v1304_v21, %v4804_v17  ;;  %v2022_v47 = vrot.slane %v2020_v16, 5 }
 0x1d2   :  { %v1701_v36 = vmax.f32 %v1685_v37, 0.0  ;;  %3540 = vmatmul.msk.bf16.gmra.mxu2 %vm1705_vm5, %v5231_v23  ;;  %3527 = vmatmul.msk.bf16.gmra.mxu1 %vm1705_vm5, %v2103_v28 }
 0x1d3   :  { %v1513_v3 = vpop.f32.mrf.mxu3  ;;  %v2017_v38 = vor.u32 %v2016_v26, %v2013_v12  ;;  %v848_v12 = vadd.f32 %v4821_v14, %v4626_v42  ;;  %v2402_v26 = vunpack.c.l.b16 %v2371_v54 }
 0x1d4   :  { %v1802_v41 = vld [vmem:[#allocation2 + $0xe0] sm:$0xff]  ;;  %v1803_v48 = vld [vmem:[#allocation2 + $0xe8] sm:$0x3]  ;;  %1770 = vst.msk [vmem:[#allocation2 + $0xf1] sm:$0xff] %vm1705_vm5, %v1701_v36  ;;  %v1534_v40 = vadd.f32 %v1513_v3, %v1428_v46  ;;  %v1648_v14 = vpop.f32.mrf.mxu0 }
 0x1d5   :  { %v1842_v9 = vpack.c.bf16 %v1802_v41, %v1802_v41  ;;  %v1843_v19 = vpack.c.bf16 %v1803_v48, %v1803_v48  ;;  %v2018_v22 = vrot.slane %v2017_v38, 4  ;;  %v1429_v38 = vadd.f32 %v1410_v18, %v1323_v24 }
 0x1d6   :  { %v1666_v8 = vadd.f32 %v1645_v11, %v1534_v40 }
 0x1d7   :  { %v2214_v60 = vunpack.c.l.b16 %v1842_v9  ;;  %v3555_v28 = vrot.slane %v1842_v9, 9  ;;  %v2374_v37 = vrot.slane %v1843_v19, 5  ;;  %v2025_v36 = vshrl.u32 %v1842_v9, 16 }
 0x1d8   :  { %v2028_v46 = vshll.u32 %v1842_v9, 16  ;;  %v1686_v3 = vadd.f32 %v4851_v30, %v1666_v8  ;;  %v2023_v0 = vsel %vm3888_vm4, %v2018_v22, %v2022_v47  ;;  %v2034_v41 = vshll.u32 %v1843_v19, 16  ;;  %v1306_v47 = vpop.f32.mrf.mxu1 }
 0x1d9   :  { %v2522_v27 = vpack.c.b16 %v2214_v60, %v2213_v15  ;;  %v5252_v17 = vsel %vm4947_vm10, %v3555_v28, %v2374_v37  ;;  %v2027_v16 = vrot.slane %v2025_v36, 4  ;;  %v5256_v30 = vunpack.c.l.b16 %v2023_v0 }
 0x1da   :  { %v5731_v11 = vunpack.c.l.b16 %v5252_v17  ;;  %v2030_v21 = vrot.slane %v2028_v46, 5  ;;  %v1702_v42 = vmax.f32 %v1686_v3, 0.0  ;;  %v982_v22 = vadd.f32 %v4798_v2, %v848_v12 }
 0x1db   :  { %3584 = vmatmul.msk.bf16.gmra.mxu0 %vm1705_vm5, %v2522_v27  ;;  %v1516_v48 = vpop.f32.mrf.mxu3  ;;  %v1804_v15 = vld [vmem:[#allocation2 + $0xf0] sm:$0xff]  ;;  %v1805_v40 = vld [vmem:[#allocation2 + $0xf8] sm:$0x3]  ;;  %v5790_v8 = vunpack.c.l.b16 %v5210_v32  ;;  %v2036_v36 = vrot.slane %v2034_v41, 5  ;;  %v5270_v2 = vpack.c.b16 %v5256_v30, %v5233_v31  ;;  %v3744_v32 = vld [vmem:[%s5691_s3] ss:$0 sm:$0xff] }
 0x1dc   :  { %v2031_v54 = vor.u32 %v2030_v21, %v2027_v16  ;;  %v5260_v9 = vpack.c.b16 %v5731_v11, %v2402_v26  ;;  %1771 = vst.msk [vmem:[#allocation2 + $0x101] sm:$0xff] %vm1705_vm5, %v1702_v42  ;;  %v1535_v19 = vadd.f32 %v1516_v48, %v1429_v38  ;;  %v1844_v24 = vpack.c.bf16 %v1804_v15, %v1804_v15  ;;  %v1412_v16 = vpop.f32.mrf.mxu2  ;;  %v1812_v48 = vld [vmem:[#allocation2 + $0x130] sm:$0xff] }
 0x1dd   :  { %v1845_v18 = vpack.c.bf16 %v1805_v40, %v1805_v40  ;;  %v5266_v28 = vpack.c.b16 %v2402_v26, %v5790_v8  ;;  %v1324_v42 = vadd.f32 %v1306_v47, %v982_v22 }
 0x1de   :  { %v2032_v37 = vrot.slane %v2031_v54, 4  ;;  %v1667_v46 = vadd.f32 %v1648_v14, %v1535_v19  ;;  %v2215_v3 = vunpack.c.l.b16 %v1844_v24  ;;  %v3556_v27 = vrot.slane %v1844_v24, 9 }
 0x1df   :  { %5791 = vst [vmem:[#allocation12_spill] sm:$0xff] %v5266_v28  ;;  %v2378_v0 = vrot.slane %v1845_v18, 5  ;;  %v2039_v21 = vshrl.u32 %v1844_v24, 16  ;;  %v2042_v38 = vshll.u32 %v1844_v24, 16  ;;  %v2048_v54 = vshll.u32 %v1845_v18, 16  ;;  %v3723_v18 = vld [vmem:[%s5692_s4 + $0x30] sm:$0xff] }
 0x1e0   :  { %v2037_v12 = vsel %vm3888_vm4, %v2032_v37, %v2036_v36  ;;  %v1687_v26 = vadd.f32 %v3744_v32, %v1667_v46  ;;  %v5277_v41 = vpack.c.b16 %v2215_v3, %v2214_v60  ;;  %3570 = vmatmul.msk.bf16.gmra.mxu3 %vm1705_vm5, %v5266_v28  ;;  %v1430_v19 = vadd.f32 %v1412_v16, %v1324_v42 }
 0x1e1   :  { %v5279_v14 = vunpack.c.l.b16 %v2037_v12  ;;  %v2041_v15 = vrot.slane %v2039_v21, 4  ;;  %v2044_v40 = vrot.slane %v2042_v38, 5  ;;  %v2379_v22 = vsel %vm4947_vm10, %v3556_v27, %v2378_v0  ;;  %v1813_v12 = vld [vmem:[#allocation2 + $0x138] sm:$0x3]  ;;  %v1650_v21 = vpop.f32.mrf.mxu0  ;;  %2902 = vmatpush.bf16.msra.mxu3 %v3723_v18 }
 0x1e2   :  { %v1703_v8 = vmax.f32 %v1687_v26, 0.0  ;;  %3541 = vmatmul.msk.bf16.gmra.mxu2 %vm1705_vm5, %v5277_v41  ;;  %3528 = vmatmul.msk.bf16.gmra.mxu1 %vm1705_vm5, %v5270_v2  ;;  %v5294_v46 = vpack.c.bf16 %v1812_v48, %v1812_v48  ;;  %v2404_v38 = vunpack.c.l.b16 %v2379_v22  ;;  %v2050_v26 = vrot.slane %v2048_v54, 5 }
 0x1e3   :  { %v1518_v24 = vpop.f32.mrf.mxu3  ;;  %v1806_v47 = vld [vmem:[#allocation2 + $0x100] sm:$0xff]  ;;  %v2045_v37 = vor.u32 %v2044_v40, %v2041_v15  ;;  %v1807_v36 = vld [vmem:[#allocation2 + $0x108] sm:$0x3]  ;;  %v5297_v13 = vpack.c.bf16 %v1813_v12, %v1813_v12 }
 0x1e4   :  { %1772 = vst.msk [vmem:[#allocation2 + $0x111] sm:$0xff] %vm1705_vm5, %v1703_v8  ;;  %v1536_v16 = vadd.f32 %v1518_v24, %v1430_v19  ;;  %v1846_v27 = vpack.c.bf16 %v1806_v47, %v1806_v47  ;;  %v1847_v0 = vpack.c.bf16 %v1807_v36, %v1807_v36  ;;  %v3646_v48 = vrot.slane %v5294_v46, 9 }
 0x1e5   :  { %v2046_v42 = vrot.slane %v2045_v37, 4 }
 0x1e6   :  { %v1668_v60 = vadd.f32 %v1650_v21, %v1536_v16  ;;  %v2216_v15 = vunpack.c.l.b16 %v1846_v27  ;;  %v3557_v40 = vrot.slane %v1846_v27, 9  ;;  %v2382_v59 = vrot.slane %v1847_v0, 5 }
 0x1e7   :  { %v2053_v11 = vshrl.u32 %v1846_v27, 16  ;;  %v2056_v28 = vshll.u32 %v1846_v27, 16  ;;  %v2051_v24 = vsel %vm3888_vm4, %v2046_v42, %v2050_v26  ;;  %v2062_v36 = vshll.u32 %v1847_v0, 16 }
 0x1e8   :  { %v1688_v8 = vadd.f32 %v3744_v32, %v1668_v60  ;;  %v2523_v19 = vpack.c.b16 %v2216_v15, %v2215_v3  ;;  %v5304_v22 = vsel %vm4947_vm10, %v3557_v40, %v2382_v59  ;;  %v5308_v16 = vunpack.c.l.b16 %v2051_v24 }
 0x1e9   :  { %v5733_v54 = vunpack.c.l.b16 %v5304_v22  ;;  %v2055_v47 = vrot.slane %v2053_v11, 4  ;;  %v2058_v37 = vrot.slane %v2056_v28, 5  ;;  %v3080_v59 = vrot.slane %v5297_v13, 5 }
 0x1ea   :  { %v1704_v18 = vmax.f32 %v1688_v8, 0.0  ;;  %v5792_v11 = vunpack.c.l.b16 %v5252_v17  ;;  %v2064_v42 = vrot.slane %v2062_v36, 5 }
 0x1eb   :  { %3585 = vmatmul.msk.bf16.gmra.mxu0 %vm1705_vm5, %v2523_v19  ;;  %v1808_v27 = vld [vmem:[#allocation2 + $0x110] sm:$0xff]  ;;  %v1809_v32 = vld [vmem:[#allocation2 + $0x118] sm:$0x3]  ;;  %v2059_v3 = vor.u32 %v2058_v37, %v2055_v47  ;;  %v5312_v60 = vpack.c.b16 %v5733_v54, %v2404_v38  ;;  %v3081_v26 = vsel %vm4947_vm10, %v3646_v48, %v3080_v59  ;;  %v5324_v19 = vpack.c.b16 %v5308_v16, %v5279_v14 }
 0x1ec   :  { %1773 = vst.msk [vmem:[#allocation2 + $0x121] sm:$0xff] %vm1705_vm5, %v1704_v18  ;;  %v5318_v28 = vpack.c.b16 %v2404_v38, %v5792_v11  ;;  %v1848_v0 = vpack.c.bf16 %v1808_v27, %v1808_v27  ;;  %v1849_v12 = vpack.c.bf16 %v1809_v32, %v1809_v32  ;;  %v3724_v32 = vld [vmem:[%s5692_s4 + $0x38] sm:$0xff] }
 0x1ed   :  { %v2060_v21 = vrot.slane %v2059_v3, 4  ;;  %v3202_v3 = vld [vmem:[%s5694_s6] sm:$0xf]  ;;  %3014 = vmatpush.bf16.msra.mxu0 %v3724_v32 }
 0x1ee   :  { %5793 = vst [vmem:[#allocation7_spill] sm:$0xff] %v5318_v28  ;;  %v2217_v40 = vunpack.c.l.b16 %v1848_v0  ;;  %v2067_v8 = vshrl.u32 %v1848_v0, 16  ;;  %v2070_v47 = vshll.u32 %v1848_v0, 16  ;;  %v3558_v38 = vrot.slane %v1848_v0, 9 }
 0x1ef   :  { %v2065_v24 = vsel %vm3888_vm4, %v2060_v21, %v2064_v42  ;;  %v2386_v48 = vrot.slane %v1849_v12, 5  ;;  %v2076_v27 = vshll.u32 %v1849_v12, 16 }
 0x1f0   :  { %v5328_v17 = vpack.c.b16 %v2217_v40, %v2216_v15  ;;  %v2069_v37 = vrot.slane %v2067_v8, 4  ;;  %v5330_v18 = vunpack.c.l.b16 %v2065_v24  ;;  %3571 = vmatmul.msk.bf16.gmra.mxu3 %vm1705_vm5, %v5318_v28  ;;  %v2072_v36 = vrot.slane %v2070_v47, 5 }
 0x1f1   :  { %v3272_v15 = vsel %vm201_vm0, %v3202_v3, 0  ;;  %v2387_v8 = vsel %vm4947_vm10, %v3558_v38, %v2386_v48  ;;  %v2078_v47 = vrot.slane %v2076_v27, 5  ;;  %v3725_v3 = vld [vmem:[%s5692_s4 + $0x40] sm:$0xff] }
 0x1f2   :  { %3542 = vmatmul.msk.bf16.gmra.mxu2 %vm1705_vm5, %v5328_v17  ;;  %3529 = vmatmul.msk.bf16.gmra.mxu1 %vm1705_vm5, %v5324_v19  ;;  %v2073_v0 = vor.u32 %v2072_v36, %v2069_v37 }
 0x1f3   :  { %v1810_v11 = vld [vmem:[#allocation2 + $0x120] sm:$0xff]  ;;  %v1811_v12 = vld [vmem:[#allocation2 + $0x128] sm:$0x3]  ;;  %3281 = vmatpush.bf16.msra.mxu2 %v3272_v15  ;;  %3108 = vmatpush.bf16.msra.mxu1 %v3725_v3  ;;  %v3086_v15 = vunpack.c.l.b16 %v3081_v26 }
 0x1f4   :  { %v5347_v21 = vpack.c.bf16 %v1810_v11, %v1810_v11  ;;  %v1851_v42 = vpack.c.bf16 %v1811_v12, %v1811_v12  ;;  %v2074_v24 = vrot.slane %v2073_v0, 4  ;;  %v2406_v11 = vunpack.c.l.b16 %v2387_v8 }
 0x1f6   :  { %v5737_v59 = vunpack.c.l.b16 %v5347_v21  ;;  %v3602_v54 = vrot.slane %v5347_v21, 9  ;;  %v2764_v37 = vrot.slane %v1851_v42, 5  ;;  %v2635_v36 = vshrl.u32 %v5347_v21, 16 }
 0x1f7   :  { %v2638_v32 = vshll.u32 %v5347_v21, 16  ;;  %v2079_v48 = vsel %vm3888_vm4, %v2074_v24, %v2078_v47  ;;  %v2644_v57 = vshll.u32 %v1851_v42, 16 }
 0x1f8   :  { %v2524_v38 = vpack.c.b16 %v5737_v59, %v2217_v40  ;;  %v2765_v27 = vsel %vm4947_vm10, %v3602_v54, %v2764_v37  ;;  %v2637_v12 = vrot.slane %v2635_v36, 4  ;;  %v5365_v3 = vunpack.c.l.b16 %v2079_v48 }
 0x1f9   :  { %v2770_v0 = vunpack.c.l.b16 %v2765_v27  ;;  %v2640_v28 = vrot.slane %v2638_v32, 5  ;;  %v5794_v40 = vunpack.c.l.b16 %v5304_v22  ;;  %v2646_v50 = vrot.slane %v2644_v57, 5 }
 0x1fa   :  { %v5377_v54 = vpack.c.b16 %v5365_v3, %v5330_v18 }
 0x1fb   :  { %3586 = vmatmul.msk.bf16.gmra.mxu0 %vm1705_vm5, %v2524_v38  ;;  %v5367_v49 = vpack.c.b16 %v2770_v0, %v2406_v11  ;;  %v2641_v26 = vor.u32 %v2640_v28, %v2637_v12  ;;  %v5369_v8 = vpack.c.b16 %v3086_v15, %v2770_v0  ;;  %v5373_v59 = vpack.c.b16 %v2406_v11, %v5794_v40 }
 0x1fd   :  { %v2642_v24 = vrot.slane %v2641_v26, 4 }
 0x1ff   :  { %v2647_v42 = vsel %vm3888_vm4, %v2642_v24, %v2646_v50  ;;  %v2961_v50 = vshrl.u32 %v5132_v63, 16 }
 0x200   :  { %v5381_v47 = vunpack.c.l.b16 %v2647_v42  ;;  %3572 = vmatmul.msk.bf16.gmra.mxu3 %vm1705_vm5, %v5373_v59  ;;  %v2964_v42 = vshll.u32 %v5132_v63, 16 }
 0x202   :  { %3609 = vmatmul.msk.bf16.vlgmr.msrb.gmra.mxu2 %vm1705_vm5, %v4981_v51  ;;  %v2660_v22 = vpack.c.b16 %v5381_v47, %v5365_v3  ;;  %3530 = vmatmul.msk.bf16.gmra.mxu1 %vm1705_vm5, %v5377_v54  ;;  %v5795_v51 = vpack.c.b16 %v4996_v35, %v4972_v53 }
 0x205   :  { %v2265_v57 = vpop.f32.mrf.mxu2 }
 0x207   :  { %v2564_v28 = vpop.f32.mrf.mxu0 }
 0x20b   :  { %3637 = vmatmul.msk.bf16.vlgmr.msra.gmra.mxu0 %vm1705_vm5, %v5045_v29 }
 0x20d   :  { %v2267_v37 = vpop.f32.mrf.mxu2 }
 0x20f   :  { %v2566_v36 = vpop.f32.mrf.mxu0  ;;  %v2146_v32 = vpop.f32.mrf.mxu1 }
 0x210   :  { %3623 = vmatmul.msk.bf16.vlgmr.msra.gmra.mxu3 %vm1705_vm5, %v4990_v61  ;;  %v2266_v15 = vadd.f32 %v2265_v57, %v2146_v32  ;;  %v2966_v32 = vrot.slane %v2964_v42, 5 }
 0x212   :  { %3610 = vmatmul.msk.bf16.gmra.mxu2 %vm1705_vm5, %v5034_v6  ;;  %3593 = vmatmul.msk.bf16.vlgmr.msrb.gmra.mxu1 %vm1705_vm5, %v5795_v51 }
 0x213   :  { %v2454_v11 = vpop.f32.mrf.mxu3 }
 0x214   :  { %v2494_v38 = vadd.f32 %v2454_v11, %v2266_v15 }
 0x215   :  { %v2270_v48 = vpop.f32.mrf.mxu2 }
 0x216   :  { %v5401_v29 = vadd.f32 %v2564_v28, %v2494_v38 }
 0x217   :  { %v2569_v27 = vpop.f32.mrf.mxu0  ;;  %v2148_v0 = vpop.f32.mrf.mxu1 }
 0x218   :  { %v2268_v12 = vadd.f32 %v2267_v37, %v2148_v0 }
 0x21b   :  { %3638 = vmatmul.msk.bf16.gmra.mxu0 %vm1705_vm5, %v5106_v7  ;;  %v2456_v61 = vpop.f32.mrf.mxu3  ;;  %v5796_v7 = vpack.c.b16 %v5052_v20, %v5024_v43 }
 0x21c   :  { %v2495_v26 = vadd.f32 %v2456_v61, %v2268_v12 }
 0x21d   :  { %v2272_v40 = vpop.f32.mrf.mxu2 }
 0x21e   :  { %v5405_v24 = vadd.f32 %v2566_v36, %v2495_v26  ;;  %v2963_v36 = vrot.slane %v2961_v50, 4 }
 0x21f   :  { %v2571_v6 = vpop.f32.mrf.mxu0  ;;  %v2151_v53 = vpop.f32.mrf.mxu1 }
 0x220   :  { %3624 = vmatmul.msk.bf16.gmra.mxu3 %vm1705_vm5, %v5050_v5  ;;  %v2271_v35 = vadd.f32 %v2270_v48, %v2151_v53  ;;  %v2967_v38 = vor.u32 %v2966_v32, %v2963_v36  ;;  %v2970_v48 = vshll.u32 %v5160_v52, 16  ;;  %v5797_v52 = vpack.c.b16 %v5113_v25, %v5088_v1 }
 0x221   :  { %v5798_v25 = vunpack.c.l.b16 %v5135_v34 }
 0x222   :  { %3611 = vmatmul.msk.bf16.gmra.mxu2 %vm1705_vm5, %v5099_v33  ;;  %3594 = vmatmul.msk.bf16.gmra.mxu1 %vm1705_vm5, %v5796_v7  ;;  %v2968_v0 = vrot.slane %v2967_v38, 4  ;;  %v2972_v12 = vrot.slane %v2970_v48, 5  ;;  %v5799_v48 = vpack.c.b16 %v5195_v44, %v5157_v55 }
 0x223   :  { %v2459_v57 = vpop.f32.mrf.mxu3 }
 0x224   :  { %v2496_v28 = vadd.f32 %v2459_v57, %v2271_v35 }
 0x225   :  { %v2275_v37 = vpop.f32.mrf.mxu2 }
 0x226   :  { %v5417_v5 = vadd.f32 %v2569_v27, %v2496_v28 }
 0x227   :  { %v2574_v15 = vpop.f32.mrf.mxu0  ;;  %v2153_v51 = vpop.f32.mrf.mxu1 }
 0x228   :  { %v2273_v11 = vadd.f32 %v2272_v40, %v2153_v51  ;;  %v2973_v40 = vsel %vm3888_vm4, %v2968_v0, %v2972_v12 }
 0x229   :  { %v2991_v35 = vunpack.c.l.b16 %v2973_v40 }
 0x22b   :  { %3639 = vmatmul.msk.bf16.gmra.mxu0 %vm1705_vm5, %v5180_v62  ;;  %v2461_v33 = vpop.f32.mrf.mxu3  ;;  %v2993_v57 = vpack.c.b16 %v2991_v35, %v5195_v44 }
 0x22c   :  { %v2497_v43 = vadd.f32 %v2461_v33, %v2273_v11 }
 0x22d   :  { %v2277_v20 = vpop.f32.mrf.mxu2 }
 0x22e   :  { %v5422_v26 = vadd.f32 %v2571_v6, %v2497_v43 }
 0x22f   :  { %v2576_v61 = vpop.f32.mrf.mxu0  ;;  %v2156_v53 = vpop.f32.mrf.mxu1 }
 0x230   :  { %3625 = vmatmul.msk.bf16.gmra.mxu3 %vm1705_vm5, %v5111_v10  ;;  %v2276_v27 = vadd.f32 %v2275_v37, %v2156_v53 }
 0x232   :  { %3612 = vmatmul.msk.bf16.gmra.mxu2 %vm1705_vm5, %v5171_v45  ;;  %3595 = vmatmul.msk.bf16.gmra.mxu1 %vm1705_vm5, %v5797_v52  ;;  %v2879_v45 = vunpack.c.l.b16 %v5132_v63  ;;  %v5800_v52 = vpack.c.b16 %v5233_v31, %v5214_v56  ;;  %v2975_v31 = vshrl.u32 %v5294_v46, 16 }
 0x233   :  { %v2464_v62 = vpop.f32.mrf.mxu3 }
 0x234   :  { %v2498_v6 = vadd.f32 %v2464_v62, %v2276_v27  ;;  %v2881_v32 = vpack.c.b16 %v2879_v45, %v5798_v25 }
 0x235   :  { %v2280_v50 = vpop.f32.mrf.mxu2 }
 0x236   :  { %v5434_v7 = vadd.f32 %v2574_v15, %v2498_v6 }
 0x237   :  { %v2579_v42 = vpop.f32.mrf.mxu0  ;;  %v2158_v10 = vpop.f32.mrf.mxu1 }
 0x238   :  { %v2278_v28 = vadd.f32 %v2277_v20, %v2158_v10 }
 0x23b   :  { %3640 = vmatmul.msk.bf16.gmra.mxu0 %vm1705_vm5, %v2993_v57  ;;  %v2466_v37 = vpop.f32.mrf.mxu3 }
 0x23c   :  { %v2499_v36 = vadd.f32 %v2466_v37, %v2278_v28  ;;  %v2978_v37 = vshll.u32 %v5294_v46, 16 }
 0x23d   :  { %v2282_v1 = vpop.f32.mrf.mxu2 }
 0x23e   :  { %v5441_v11 = vadd.f32 %v2576_v61, %v2499_v36 }
 0x23f   :  { %v2581_v51 = vpop.f32.mrf.mxu0  ;;  %v2161_v38 = vpop.f32.mrf.mxu1 }
 0x240   :  { %3626 = vmatmul.msk.bf16.gmra.mxu3 %vm1705_vm5, %v2881_v32  ;;  %v2281_v15 = vadd.f32 %v2280_v50, %v2161_v38  ;;  %v2977_v32 = vrot.slane %v2975_v31, 4 }
 0x242   :  { %3613 = vmatmul.msk.bf16.gmra.mxu2 %vm1705_vm5, %v5222_v58  ;;  %3596 = vmatmul.msk.bf16.gmra.mxu1 %vm1705_vm5, %v5799_v48 }
 0x243   :  { %v2469_v63 = vpop.f32.mrf.mxu3 }
 0x244   :  { %v2500_v33 = vadd.f32 %v2469_v63, %v2281_v15 }
 0x245   :  { %v2285_v43 = vpop.f32.mrf.mxu2 }
 0x246   :  { %v5450_v34 = vadd.f32 %v2579_v42, %v2500_v33  ;;  %v2984_v33 = vshll.u32 %v5297_v13, 16  ;;  %v5802_v13 = vpack.c.b16 %v5330_v18, %v5308_v16  ;;  %v3726_v18 = vld [vmem:[%s5689_s1] sm:$0xff] }
 0x247   :  { %v2163_v20 = vpop.f32.mrf.mxu1  ;;  %v2584_v0 = vpop.f32.mrf.mxu0 }
 0x248   :  { %v2283_v12 = vadd.f32 %v2282_v1, %v2163_v20  ;;  %v2986_v20 = vrot.slane %v2984_v33, 5 }
 0x24b   :  { %3641 = vmatmul.msk.bf16.gmra.mxu0 %vm1705_vm5, %v5270_v2  ;;  %v2471_v61 = vpop.f32.mrf.mxu3 }
 0x24c   :  { %v2501_v53 = vadd.f32 %v2471_v61, %v2283_v12 }
 0x24d   :  { %v2287_v27 = vpop.f32.mrf.mxu2 }
 0x24e   :  { %v5454_v58 = vadd.f32 %v2581_v51, %v2501_v53  ;;  %v2980_v51 = vrot.slane %v2978_v37, 5 }
 0x24f   :  { %v2166_v40 = vpop.f32.mrf.mxu1  ;;  %v2586_v44 = vpop.f32.mrf.mxu0 }
 0x250   :  { %3627 = vmatmul.msk.bf16.gmra.mxu3 %vm1705_vm5, %v5231_v23  ;;  %v2286_v55 = vadd.f32 %v2285_v43, %v2166_v40  ;;  %v2981_v63 = vor.u32 %v2980_v51, %v2977_v32  ;;  %v3727_v51 = vld [vmem:[%s5689_s1 + $0x8] sm:$0xff] }
 0x252   :  { %3614 = vmatmul.msk.bf16.gmra.mxu2 %vm1705_vm5, %v5260_v9  ;;  %3597 = vmatmul.msk.bf16.gmra.mxu1 %vm1705_vm5, %v5800_v52  ;;  %v2982_v43 = vrot.slane %v2981_v63, 4 }
 0x253   :  { %v2474_v2 = vpop.f32.mrf.mxu3 }
 0x254   :  { %v2502_v62 = vadd.f32 %v2474_v2, %v2286_v55 }
 0x255   :  { %v2290_v35 = vpop.f32.mrf.mxu2 }
 0x256   :  { %v5464_v6 = vadd.f32 %v2584_v0, %v2502_v62 }
 0x257   :  { %v2168_v50 = vpop.f32.mrf.mxu1 }
 0x258   :  { %v2288_v42 = vadd.f32 %v2287_v27, %v2168_v50  ;;  %v2589_v10 = vpop.f32.mrf.mxu0  ;;  %v2987_v27 = vsel %vm3888_vm4, %v2982_v43, %v2986_v20  ;;  %v5804_v20 = vld [vmem:[#allocation11_spill] sm:$0xff] }
 0x259   :  { %v2992_v40 = vunpack.c.l.b16 %v2987_v27  ;;  %v3729_v27 = vld [vmem:[%s5689_s1 + $0x18] sm:$0xff] }
 0x25b   :  { %3642 = vmatmul.msk.bf16.gmra.mxu0 %vm1705_vm5, %v5324_v19  ;;  %v2476_v23 = vpop.f32.mrf.mxu3  ;;  %v5801_v19 = vpack.c.b16 %v5279_v14, %v5256_v30 }
 0x25c   :  { %v2503_v57 = vadd.f32 %v2476_v23, %v2288_v42  ;;  %v5803_v42 = vunpack.c.l.b16 %v5347_v21 }
 0x25d   :  { %v2292_v28 = vpop.f32.mrf.mxu2 }
 0x25e   :  { %v5468_v9 = vadd.f32 %v2586_v44, %v2503_v57 }
 0x25f   :  { %v2171_v45 = vpop.f32.mrf.mxu1 }
 0x260   :  { %3628 = vmatmul.msk.bf16.gmra.mxu3 %vm1705_vm5, %v5277_v41  ;;  %v2291_v56 = vadd.f32 %v2290_v35, %v2171_v45  ;;  %v2591_v38 = vpop.f32.mrf.mxu0 }
 0x262   :  { %3615 = vmatmul.msk.bf16.gmra.mxu2 %vm1705_vm5, %v5312_v60  ;;  %3598 = vmatmul.msk.bf16.gmra.mxu1 %vm1705_vm5, %v5801_v19 }
 0x263   :  { %v2479_v36 = vpop.f32.mrf.mxu3 }
 0x264   :  { %v2504_v1 = vadd.f32 %v2479_v36, %v2291_v56 }
 0x265   :  { %v2295_v25 = vpop.f32.mrf.mxu2 }
 0x266   :  { %v5480_v41 = vadd.f32 %v2589_v10, %v2504_v1 }
 0x267   :  { %v2173_v15 = vpop.f32.mrf.mxu1 }
 0x268   :  { %v2293_v48 = vadd.f32 %v2292_v28, %v2173_v15  ;;  %v2594_v12 = vpop.f32.mrf.mxu0 }
 0x26b   :  { %3643 = vmatmul.msk.bf16.gmra.mxu0 %vm1705_vm5, %v5377_v54  ;;  %v2481_v60 = vpop.f32.mrf.mxu3 }
 0x26c   :  { %v2505_v30 = vadd.f32 %v2481_v60, %v2293_v48 }
 0x26d   :  { %v2297_v14 = vpop.f32.mrf.mxu2 }
 0x26e   :  { %v5485_v0 = vadd.f32 %v2591_v38, %v2505_v30  ;;  %v3728_v30 = vld [vmem:[%s5689_s1 + $0x10] sm:$0xff] }
 0x26f   :  { %v2176_v61 = vpop.f32.mrf.mxu1 }
 0x270   :  { %3629 = vmatmul.msk.bf16.gmra.mxu3 %vm1705_vm5, %v5328_v17  ;;  %v2296_v53 = vadd.f32 %v2295_v25, %v2176_v61  ;;  %v2994_v17 = vpack.c.b16 %v2992_v40, %v5381_v47  ;;  %v2596_v39 = vpop.f32.mrf.mxu0  ;;  %v5805_v40 = vld [vmem:[#allocation6_spill] sm:$0xff] }
 0x272   :  { %3616 = vmatmul.msk.bf16.gmra.mxu2 %vm1705_vm5, %v5367_v49  ;;  %3599 = vmatmul.msk.bf16.gmra.mxu1 %vm1705_vm5, %v5802_v13  ;;  %v2880_v49 = vunpack.c.l.b16 %v5294_v46 }
 0x273   :  { %v2484_v54 = vpop.f32.mrf.mxu3 }
 0x274   :  { %v2506_v55 = vadd.f32 %v2484_v54, %v2296_v53  ;;  %v2882_v23 = vpack.c.b16 %v2880_v49, %v5803_v42 }
 0x275   :  { %v2300_v44 = vpop.f32.mrf.mxu2 }
 0x276   :  { %v5497_v52 = vadd.f32 %v2594_v12, %v2506_v55 }
 0x277   :  { %v2178_v2 = vpop.f32.mrf.mxu1 }
 0x278   :  { %v2298_v62 = vadd.f32 %v2297_v14, %v2178_v2  ;;  %v2599_v46 = vpop.f32.mrf.mxu0 }
 0x27b   :  { %3644 = vmatmul.msk.bf16.gmra.mxu0 %vm1705_vm5, %v2994_v17  ;;  %v2486_v35 = vpop.f32.mrf.mxu3 }
 0x27c   :  { %v2507_v50 = vadd.f32 %v2486_v35, %v2298_v62  ;;  %v3730_v62 = vld [vmem:[%s5689_s1 + $0x20] sm:$0xff] }
 0x27d   :  { %v2302_v16 = vpop.f32.mrf.mxu2  ;;  %v5806_v35 = vld [vmem:[#allocation10_spill] sm:$0xff] }
 0x27e   :  { %v5507_v10 = vadd.f32 %v2596_v39, %v2507_v50 }
 0x27f   :  { %v2181_v57 = vpop.f32.mrf.mxu1 }
 0x280   :  { %3630 = vmatmul.msk.bf16.gmra.mxu3 %vm1705_vm5, %v2882_v23  ;;  %v2301_v28 = vadd.f32 %v2300_v44, %v2181_v57  ;;  %v2601_v32 = vpop.f32.mrf.mxu0  ;;  %v3731_v23 = vld [vmem:[%s5689_s1 + $0x28] sm:$0xff] }
 0x282   :  { %3693 = vmatmul.msk.bf16.vlgmr.msra.gmra.mxu2 %vm176_vm1, %v3726_v18  ;;  %3600 = vmatmul.msk.bf16.gmra.mxu1 %vm1705_vm5, %v2660_v22 }
 0x283   :  { %v2489_v45 = vpop.f32.mrf.mxu3 }
 0x284   :  { %v2508_v56 = vadd.f32 %v2489_v45, %v2301_v28 }
 0x285   :  { %v2818_v31 = vpop.f32.mrf.mxu2 }
 0x286   :  { %v5515_v37 = vadd.f32 %v2599_v46, %v2508_v56  ;;  %v5807_v46 = vld [vmem:[#allocation12_spill] sm:$0xff] }
 0x287   :  { %v2183_v21 = vpop.f32.mrf.mxu1 }
 0x288   :  { %v2303_v19 = vadd.f32 %v2302_v16, %v2183_v21 }
 0x28b   :  { %v2491_v36 = vpop.f32.mrf.mxu3 }
 0x28c   :  { %v2509_v1 = vadd.f32 %v2491_v36, %v2303_v19  ;;  %v3732_v19 = vld [vmem:[%s5689_s1 + $0x30] sm:$0xff] }
 0x28d   :  { %v2820_v25 = vpop.f32.mrf.mxu2 }
 0x28e   :  { %v5520_v38 = vadd.f32 %v2601_v32, %v2509_v1 }
 0x28f   :  { %v2700_v3 = vpop.f32.mrf.mxu1 }
 0x290   :  { %v2740_v47 = vadd.f32 %v2700_v3, %v5401_v29 }
 0x292   :  { %3694 = vmatmul.msk.bf16.gmra.mxu2 %vm176_vm1, %v3727_v51  ;;  %v5524_v22 = vadd.f32 %v2818_v31, %v2740_v47  ;;  %3653 = vmatmul.msk.bf16.vlgmr.msra.gmra.mxu1 %vm1705_vm5, %v5039_v4 }
 0x293   :  { %v2904_v47 = vpop.f32.mrf.mxu3 }
 0x295   :  { %v2823_v15 = vpop.f32.mrf.mxu2 }
 0x297   :  { %v2702_v48 = vpop.f32.mrf.mxu1 }
 0x298   :  { %v2741_v63 = vadd.f32 %v2702_v48, %v5405_v24  ;;  %v3733_v48 = vld [vmem:[%s5689_s1 + $0x38] sm:$0xff] }
 0x29a   :  { %v5529_v33 = vadd.f32 %v2820_v25, %v2741_v63  ;;  %v5808_v25 = vld [vmem:[#allocation7_spill] sm:$0xff] }
 0x29d   :  { %v2825_v60 = vpop.f32.mrf.mxu2 }
 0x29f   :  { %v2705_v14 = vpop.f32.mrf.mxu1 }
 0x2a0   :  { %v2742_v29 = vadd.f32 %v2705_v14, %v5417_v5  ;;  %v2906_v14 = vpop.f32.mrf.mxu3 }
 0x2a2   :  { %3695 = vmatmul.msk.bf16.gmra.mxu2 %vm176_vm1, %v3728_v30  ;;  %v5536_v43 = vadd.f32 %v2823_v15, %v2742_v29  ;;  %3654 = vmatmul.msk.bf16.gmra.mxu1 %vm1705_vm5, %v5804_v20 }
 0x2a5   :  { %v2828_v4 = vpop.f32.mrf.mxu2 }
 0x2a7   :  { %v2707_v12 = vpop.f32.mrf.mxu1 }
 0x2a8   :  { %v2743_v24 = vadd.f32 %v2707_v12, %v5422_v26 }
 0x2aa   :  { %v5541_v61 = vadd.f32 %v2825_v60, %v2743_v24 }
 0x2ad   :  { %v2830_v53 = vpop.f32.mrf.mxu2 }
 0x2af   :  { %v2710_v13 = vpop.f32.mrf.mxu1 }
 0x2b0   :  { %v2744_v5 = vadd.f32 %v2710_v13, %v5434_v7 }
 0x2b2   :  { %3696 = vmatmul.msk.bf16.gmra.mxu2 %vm176_vm1, %v3729_v27  ;;  %v5548_v54 = vadd.f32 %v2828_v4, %v2744_v5  ;;  %3655 = vmatmul.msk.bf16.gmra.mxu1 %vm1705_vm5, %v5805_v40 }
 0x2b5   :  { %v2833_v55 = vpop.f32.mrf.mxu2 }
 0x2b7   :  { %v2712_v44 = vpop.f32.mrf.mxu1 }
 0x2b8   :  { %v2745_v26 = vadd.f32 %v2712_v44, %v5441_v11 }
 0x2ba   :  { %v5553_v2 = vadd.f32 %v2830_v53, %v2745_v26  ;;  %v2909_v53 = vpop.f32.mrf.mxu3 }
 0x2bd   :  { %v2835_v17 = vpop.f32.mrf.mxu2 }
 0x2bf   :  { %v2715_v39 = vpop.f32.mrf.mxu1 }
 0x2c0   :  { %v2746_v7 = vadd.f32 %v2715_v39, %v5450_v34 }
 0x2c2   :  { %3697 = vmatmul.msk.bf16.gmra.mxu2 %vm176_vm1, %v3730_v62  ;;  %v5560_v49 = vadd.f32 %v2833_v55, %v2746_v7  ;;  %3656 = vmatmul.msk.bf16.gmra.mxu1 %vm1705_vm5, %v5806_v35  ;;  %v2911_v44 = vpop.f32.mrf.mxu3 }
 0x2c5   :  { %v2838_v50 = vpop.f32.mrf.mxu2 }
 0x2c7   :  { %v2717_v16 = vpop.f32.mrf.mxu1 }
 0x2c8   :  { %v2747_v11 = vadd.f32 %v2717_v16, %v5454_v58 }
 0x2ca   :  { %v5565_v18 = vadd.f32 %v2835_v17, %v2747_v11  ;;  %v5615_v17 = vld [vmem:[%s5695_s7] ss:$0 sm:$0xff]  ;;  %v2914_v16 = vpop.f32.mrf.mxu3 }
 0x2cd   :  { %v2840_v42 = vpop.f32.mrf.mxu2 }
 0x2cf   :  { %v2720_v57 = vpop.f32.mrf.mxu1 }
 0x2d0   :  { %v2748_v34 = vadd.f32 %v2720_v57, %v5464_v6 }
 0x2d2   :  { %3698 = vmatmul.msk.bf16.gmra.mxu2 %vm176_vm1, %v3731_v23  ;;  %v5572_v28 = vadd.f32 %v2838_v50, %v2748_v34  ;;  %3657 = vmatmul.msk.bf16.gmra.mxu1 %vm1705_vm5, %v5807_v46 }
 0x2d5   :  { %v2843_v45 = vpop.f32.mrf.mxu2 }
 0x2d7   :  { %v2722_v56 = vpop.f32.mrf.mxu1 }
 0x2d8   :  { %v2749_v58 = vadd.f32 %v2722_v56, %v5468_v9 }
 0x2da   :  { %v5577_v31 = vadd.f32 %v2840_v42, %v2749_v58 }
 0x2dd   :  { %v2845_v21 = vpop.f32.mrf.mxu2 }
 0x2df   :  { %v2725_v36 = vpop.f32.mrf.mxu1 }
 0x2e0   :  { %v2750_v6 = vadd.f32 %v2725_v36, %v5480_v41  ;;  %v3016_v41 = vpop.f32.mrf.mxu0 }
 0x2e2   :  { %3699 = vmatmul.msk.bf16.gmra.mxu2 %vm176_vm1, %v3732_v19  ;;  %v5584_v1 = vadd.f32 %v2843_v45, %v2750_v6  ;;  %3658 = vmatmul.msk.bf16.gmra.mxu1 %vm1705_vm5, %v5808_v25  ;;  %v2946_v45 = vadd.f32 %v2909_v53, %v5536_v43 }
 0x2e5   :  { %v2848_v32 = vpop.f32.mrf.mxu2 }
 0x2e7   :  { %v2727_v51 = vpop.f32.mrf.mxu1 }
 0x2e8   :  { %v2751_v9 = vadd.f32 %v2727_v51, %v5485_v0  ;;  %v3018_v4 = vpop.f32.mrf.mxu0 }
 0x2ea   :  { %v5589_v3 = vadd.f32 %v2845_v21, %v2751_v9  ;;  %v2947_v9 = vadd.f32 %v2911_v44, %v5541_v61 }
 0x2ed   :  { %v2850_v15 = vpop.f32.mrf.mxu2 }
 0x2ef   :  { %v2730_v63 = vpop.f32.mrf.mxu1 }
 0x2f0   :  { %v2752_v60 = vadd.f32 %v2730_v63, %v5497_v52  ;;  %v3021_v5 = vpop.f32.mrf.mxu0 }
 0x2f1   :  { %v3058_v36 = vadd.f32 %v3021_v5, %v2946_v45 }
 0x2f2   :  { %3700 = vmatmul.msk.bf16.gmra.mxu2 %vm176_vm1, %v3733_v48  ;;  %v5596_v30 = vadd.f32 %v2848_v32, %v2752_v60  ;;  %3659 = vmatmul.msk.bf16.gmra.mxu1 %vm1705_vm5, %v5373_v59 }
 0x2f5   :  { %v2853_v0 = vpop.f32.mrf.mxu2 }
 0x2f7   :  { %v2732_v29 = vpop.f32.mrf.mxu1 }
 0x2f8   :  { %v2753_v20 = vadd.f32 %v2732_v29, %v5507_v10  ;;  %v2944_v10 = vadd.f32 %v2904_v47, %v5524_v22  ;;  %v3023_v62 = vpop.f32.mrf.mxu0  ;;  %v2945_v22 = vadd.f32 %v2906_v14, %v5529_v33  ;;  %v2916_v33 = vpop.f32.mrf.mxu3 }
 0x2f9   :  { %v3059_v48 = vadd.f32 %v3023_v62, %v2947_v9 }
 0x2fa   :  { %v5601_v12 = vadd.f32 %v2850_v15, %v2753_v20  ;;  %v3056_v39 = vadd.f32 %v3016_v41, %v2944_v10  ;;  %v3057_v23 = vadd.f32 %v3018_v4, %v2945_v22 }
 0x2fd   :  { %v2855_v24 = vpop.f32.mrf.mxu2 }
 0x2ff   :  { %v2735_v27 = vpop.f32.mrf.mxu1 }
 0x300   :  { %v2754_v52 = vadd.f32 %v2735_v27, %v5515_v37  ;;  %v3026_v57 = vpop.f32.mrf.mxu0  ;;  %v2919_v41 = vpop.f32.mrf.mxu3 }
 0x302   :  { %v5604_v13 = vadd.f32 %v2853_v0, %v2754_v52  ;;  %3660 = vmatmul.msk.bf16.gmra.mxu1 %vm1705_vm5, %v5369_v8  ;;  %v5620_v8 = vld [vmem:[%s5693_s5] ss:$0 sm:$0xff]  ;;  %v2948_v0 = vadd.f32 %v2914_v16, %v5548_v54  ;;  %s3772_s5 = smov [#allocation3]  }
 0x303   :  { %s3359_s7 = sshll.u32 %s3772_s5, 4  ;;  %s3360_s7 = int_to_ptr.vmem [resolvable:$true] %s3359_s7 }
 0x304   :  { %v3060_v61 = vadd.f32 %v3026_v57, %v2948_v0 }
 0x305   :  { %v3283_v59 = vpop.f32.mrf.mxu2 }
 0x307   :  { %v2737_v40 = vpop.f32.mrf.mxu1 }
 0x308   :  { %v2755_v55 = vadd.f32 %v2737_v40, %v5520_v38  ;;  %v3284_v38 = vadd.f32 %v5615_v17, %v3283_v59  ;;  %v3028_v51 = vpop.f32.mrf.mxu0  ;;  %v2921_v5 = vpop.f32.mrf.mxu3  ;;  %v2949_v59 = vadd.f32 %v2916_v33, %v5553_v2 }
 0x309   :  { %v2951_v57 = vadd.f32 %v2921_v5, %v5565_v18 }
 0x30a   :  { %v5610_v26 = vadd.f32 %v2855_v24, %v2755_v55  ;;  %v3061_v10 = vadd.f32 %v3028_v51, %v2949_v59 }
 0x30d   :  { %v3285_v37 = vpop.f32.mrf.mxu2 }
 0x30e   :  { %v3286_v56 = vadd.f32 %v5615_v17, %v3285_v37 }
 0x30f   :  { %v3110_v7 = vpop.f32.mrf.mxu1 }
 0x310   :  { %v3150_v35 = vadd.f32 %v3110_v7, %v3056_v39  ;;  %v3031_v20 = vpop.f32.mrf.mxu0  ;;  %v2950_v39 = vadd.f32 %v2919_v41, %v5560_v49 }
 0x312   :  { %v3170_v50 = vadd.f32 %v5620_v8, %v3150_v35  ;;  %v2924_v35 = vpop.f32.mrf.mxu3  ;;  %v3062_v2 = vadd.f32 %v3031_v20, %v2950_v39 }
 0x313   :  { %v2952_v33 = vadd.f32 %v2924_v35, %v5572_v28 }
 0x314   :  { %v3323_v11 = vadd.f32 %v3284_v38, %v3170_v50 }
 0x315   :  { %v3288_v42 = vpop.f32.mrf.mxu2 }
 0x316   :  { %3339 = vst.msk [vmem:[#allocation3] sm:$0xff] %vm1705_vm5, %v3323_v11  ;;  %v3289_v25 = vadd.f32 %v5615_v17, %v3288_v42 }
 0x317   :  { %v3112_v34 = vpop.f32.mrf.mxu1 }
 0x318   :  { %v3151_v46 = vadd.f32 %v3112_v34, %v3057_v23  ;;  %v3033_v44 = vpop.f32.mrf.mxu0 }
 0x31a   :  { %v3171_v58 = vadd.f32 %v5620_v8, %v3151_v46  ;;  %v2926_v45 = vpop.f32.mrf.mxu3 }
 0x31c   :  { %v3324_v21 = vadd.f32 %v3286_v56, %v3171_v58  ;;  %v3063_v56 = vadd.f32 %v3033_v44, %v2951_v57 }
 0x31d   :  { %v3290_v19 = vpop.f32.mrf.mxu2 }
 0x31e   :  { %3340 = vst.msk [vmem:[#allocation3 + $0x8] sm:$0xff] %vm1705_vm5, %v3324_v21  ;;  %v3291_v14 = vadd.f32 %v5615_v17, %v3290_v19 }
 0x31f   :  { %v3115_v6 = vpop.f32.mrf.mxu1 }
 0x320   :  { %v3152_v32 = vadd.f32 %v3115_v6, %v3058_v36  ;;  %v3036_v16 = vpop.f32.mrf.mxu0 }
 0x321   :  { %v3064_v18 = vadd.f32 %v3036_v16, %v2952_v33 }
 0x322   :  { %v3172_v47 = vadd.f32 %v5620_v8, %v3152_v32  ;;  %v2929_v51 = vpop.f32.mrf.mxu3 }
 0x323   :  { %v2954_v20 = vadd.f32 %v2929_v51, %v5584_v1 }
 0x324   :  { %v3325_v43 = vadd.f32 %v3289_v25, %v3172_v47 }
 0x325   :  { %v3293_v15 = vpop.f32.mrf.mxu2 }
 0x326   :  { %3341 = vst.msk [vmem:[#allocation3 + $0x10] sm:$0xff] %vm1705_vm5, %v3325_v43  ;;  %v3294_v27 = vadd.f32 %v5615_v17, %v3293_v15  ;;  %v2953_v15 = vadd.f32 %v2926_v45, %v5577_v31 }
 0x327   :  { %v3117_v63 = vpop.f32.mrf.mxu1 }
 0x328   :  { %v3153_v60 = vadd.f32 %v3117_v63, %v3059_v48  ;;  %v3038_v19 = vpop.f32.mrf.mxu0 }
 0x32a   :  { %v3173_v29 = vadd.f32 %v5620_v8, %v3153_v60  ;;  %v3065_v60 = vadd.f32 %v3038_v19, %v2953_v15 }
 0x32c   :  { %v3326_v4 = vadd.f32 %v3291_v14, %v3173_v29  ;;  %v2931_v29 = vpop.f32.mrf.mxu3 }
 0x32d   :  { %v3295_v24 = vpop.f32.mrf.mxu2 }
 0x32e   :  { %3342 = vst.msk [vmem:[#allocation3 + $0x18] sm:$0xff] %vm1705_vm5, %v3326_v4  ;;  %v3296_v7 = vadd.f32 %v5615_v17, %v3295_v24 }
 0x32f   :  { %v3120_v53 = vpop.f32.mrf.mxu1 }
 0x330   :  { %v3154_v52 = vadd.f32 %v3120_v53, %v3060_v61  ;;  %v3041_v41 = vpop.f32.mrf.mxu0 }
 0x331   :  { %v3066_v31 = vadd.f32 %v3041_v41, %v2954_v20 }
 0x332   :  { %v3174_v40 = vadd.f32 %v5620_v8, %v3154_v52 }
 0x334   :  { %v3327_v54 = vadd.f32 %v3294_v27, %v3174_v40  ;;  %v2955_v40 = vadd.f32 %v2931_v29, %v5589_v3 }
 0x335   :  { %v3298_v55 = vpop.f32.mrf.mxu2 }
 0x336   :  { %3343 = vst.msk [vmem:[#allocation3 + $0x20] sm:$0xff] %vm1705_vm5, %v3327_v54  ;;  %v3299_v42 = vadd.f32 %v5615_v17, %v3298_v55  ;;  %v2934_v55 = vpop.f32.mrf.mxu3 }
 0x337   :  { %v3122_v37 = vpop.f32.mrf.mxu1 }
 0x338   :  { %v3155_v62 = vadd.f32 %v3122_v37, %v3061_v10  ;;  %v3043_v53 = vpop.f32.mrf.mxu0 }
 0x339   :  { %v3067_v44 = vadd.f32 %v3043_v53, %v2955_v40 }
 0x33a   :  { %v3175_v38 = vadd.f32 %v5620_v8, %v3155_v62 }
 0x33c   :  { %v3328_v22 = vadd.f32 %v3296_v7, %v3175_v38  ;;  %v2956_v7 = vadd.f32 %v2934_v55, %v5596_v30 }
 0x33d   :  { %v3300_v50 = vpop.f32.mrf.mxu2 }
 0x33e   :  { %3344 = vst.msk [vmem:[#allocation3 + $0x28] sm:$0xff] %vm1705_vm5, %v3328_v22  ;;  %v3301_v36 = vadd.f32 %v5615_v17, %v3300_v50  ;;  %v2936_v50 = vpop.f32.mrf.mxu3 }
 0x33f   :  { %v3125_v11 = vpop.f32.mrf.mxu1 }
 0x340   :  { %v3156_v23 = vadd.f32 %v3125_v11, %v3062_v2  ;;  %v3046_v10 = vpop.f32.mrf.mxu0 }
 0x341   :  { %v3068_v3 = vadd.f32 %v3046_v10, %v2956_v7 }
 0x342   :  { %v3176_v34 = vadd.f32 %v5620_v8, %v3156_v23  ;;  %v2957_v23 = vadd.f32 %v2936_v50, %v5601_v12 }
 0x344   :  { %v3329_v49 = vadd.f32 %v3299_v42, %v3176_v34 }
 0x345   :  { %v3303_v46 = vpop.f32.mrf.mxu2 }
 0x346   :  { %3345 = vst.msk [vmem:[#allocation3 + $0x30] sm:$0xff] %vm1705_vm5, %v3329_v49  ;;  %v3304_v47 = vadd.f32 %v5615_v17, %v3303_v46  ;;  %v2939_v46 = vpop.f32.mrf.mxu3 }
 0x347   :  { %v3127_v58 = vpop.f32.mrf.mxu1 }
 0x348   :  { %v3157_v21 = vadd.f32 %v3127_v58, %v3063_v56  ;;  %v3048_v42 = vpop.f32.mrf.mxu0  ;;  %v2958_v58 = vadd.f32 %v2939_v46, %v5604_v13 }
 0x349   :  { %v3069_v49 = vadd.f32 %v3048_v42, %v2957_v23 }
 0x34a   :  { %v3177_v6 = vadd.f32 %v5620_v8, %v3157_v21 }
 0x34c   :  { %v3330_v25 = vadd.f32 %v3301_v36, %v3177_v6 }
 0x34d   :  { %v3305_v32 = vpop.f32.mrf.mxu2 }
 0x34e   :  { %3346 = vst.msk [vmem:[#allocation3 + $0x38] sm:$0xff] %vm1705_vm5, %v3330_v25  ;;  %v3306_v4 = vadd.f32 %v5615_v17, %v3305_v32  ;;  %v2941_v51 = vpop.f32.mrf.mxu3 }
 0x34f   :  { %v3130_v9 = vpop.f32.mrf.mxu1 }
 0x350   :  { %v3158_v43 = vadd.f32 %v3130_v9, %v3064_v18  ;;  %v3051_v33 = vpop.f32.mrf.mxu0  ;;  %v2959_v9 = vadd.f32 %v2941_v51, %v5610_v26 }
 0x351   :  { %v3070_v12 = vadd.f32 %v3051_v33, %v2958_v58 }
 0x352   :  { %v3178_v48 = vadd.f32 %v5620_v8, %v3158_v43 }
 0x354   :  { %v3331_v28 = vadd.f32 %v3304_v47, %v3178_v48 }
 0x355   :  { %v3308_v63 = vpop.f32.mrf.mxu2 }
 0x356   :  { %3347 = vst.msk [vmem:[#allocation3 + $0x40] sm:$0xff] %vm1705_vm5, %v3331_v28  ;;  %v3309_v5 = vadd.f32 %v5615_v17, %v3308_v63 }
 0x357   :  { %v3132_v0 = vpop.f32.mrf.mxu1 }
 0x358   :  { %v3159_v14 = vadd.f32 %v3132_v0, %v3065_v60  ;;  %v3053_v43 = vpop.f32.mrf.mxu0 }
 0x359   :  { %v3071_v15 = vadd.f32 %v3053_v43, %v2959_v9 }
 0x35a   :  { %v3179_v24 = vadd.f32 %v5620_v8, %v3159_v14 }
 0x35c   :  { %v3332_v61 = vadd.f32 %v3306_v4, %v3179_v24 }
 0x35d   :  { %v3310_v52 = vpop.f32.mrf.mxu2 }
 0x35e   :  { %3348 = vst.msk [vmem:[#allocation3 + $0x48] sm:$0xff] %vm1705_vm5, %v3332_v61  ;;  %v3311_v38 = vadd.f32 %v5615_v17, %v3310_v52 }
 0x35f   :  { %v3135_v27 = vpop.f32.mrf.mxu1 }
 0x360   :  { %v3160_v59 = vadd.f32 %v3135_v27, %v3066_v31 }
 0x362   :  { %v3180_v54 = vadd.f32 %v5620_v8, %v3160_v59 }
 0x364   :  { %v3333_v1 = vadd.f32 %v3309_v5, %v3180_v54 }
 0x365   :  { %v3313_v39 = vpop.f32.mrf.mxu2 }
 0x366   :  { %3349 = vst.msk [vmem:[#allocation3 + $0x50] sm:$0xff] %vm1705_vm5, %v3333_v1  ;;  %v3314_v16 = vadd.f32 %v5615_v17, %v3313_v39 }
 0x367   :  { %v3137_v37 = vpop.f32.mrf.mxu1 }
 0x368   :  { %v3161_v62 = vadd.f32 %v3137_v37, %v3067_v44 }
 0x36a   :  { %v3181_v35 = vadd.f32 %v5620_v8, %v3161_v62 }
 0x36c   :  { %v3334_v22 = vadd.f32 %v3311_v38, %v3181_v35 }
 0x36d   :  { %v3315_v34 = vpop.f32.mrf.mxu2 }
 0x36e   :  { %3350 = vst.msk [vmem:[#allocation3 + $0x58] sm:$0xff] %vm1705_vm5, %v3334_v22  ;;  %v3316_v21 = vadd.f32 %v5615_v17, %v3315_v34 }
 0x36f   :  { %v3140_v2 = vpop.f32.mrf.mxu1 }
 0x370   :  { %v3162_v11 = vadd.f32 %v3140_v2, %v3068_v3 }
 0x372   :  { %v3182_v57 = vadd.f32 %v5620_v8, %v3162_v11 }
 0x374   :  { %v3335_v30 = vadd.f32 %v3314_v16, %v3182_v57 }
 0x375   :  { %v3318_v6 = vpop.f32.mrf.mxu2 }
 0x376   :  { %3351 = vst.msk [vmem:[#allocation3 + $0x60] sm:$0xff] %vm1705_vm5, %v3335_v30  ;;  %v3319_v32 = vadd.f32 %v5615_v17, %v3318_v6 }
 0x377   :  { %v3142_v45 = vpop.f32.mrf.mxu1 }
 0x378   :  { %v3163_v56 = vadd.f32 %v3142_v45, %v3069_v49 }
 0x37a   :  { %v3183_v19 = vadd.f32 %v5620_v8, %v3163_v56 }
 0x37c   :  { %v3336_v36 = vadd.f32 %v3316_v21, %v3183_v19 }
 0x37d   :  { %v3320_v48 = vpop.f32.mrf.mxu2 }
 0x37e   :  { %3352 = vst.msk [vmem:[#allocation3 + $0x68] sm:$0xff] %vm1705_vm5, %v3336_v36  ;;  %v3321_v63 = vadd.f32 %v5615_v17, %v3320_v48 }
 0x37f   :  { %v3145_v25 = vpop.f32.mrf.mxu1 }
 0x380   :  { %v3164_v18 = vadd.f32 %v3145_v25, %v3070_v12 }
 0x382   :  { %v3184_v47 = vadd.f32 %v5620_v8, %v3164_v18 }
 0x384   :  { %v3337_v13 = vadd.f32 %v3319_v32, %v3184_v47 }
 0x386   :  { %3353 = vst.msk [vmem:[#allocation3 + $0x70] sm:$0xff] %vm1705_vm5, %v3337_v13 }
 0x387   :  { %v3147_v41 = vpop.f32.mrf.mxu1 }
 0x388   :  { %v3165_v28 = vadd.f32 %v3147_v41, %v3071_v15 }
 0x38a   :  { %v3185_v26 = vadd.f32 %v5620_v8, %v3165_v28 }
 0x38c   :  { %v3338_v60 = vadd.f32 %v3321_v63, %v3185_v26 }
 0x38e   :  { %3354 = vst.msk [vmem:[#allocation3 + $0x78] sm:$0xff] %vm1705_vm5, %v3338_v60 }
 0x38f   :  { %3367 = dma.vmem_to_hbm [thread:$0]  %s3360_s7, 2048, %s3362_s26, [#allocation4], %s3773_s27, %s3773_s27, %s3774_s28  }
 0x390   :  { %3769 = dma.done.wait [#allocation4], 2048  }
 0x391   :  { %3770 = vsyncadd [#allocation4], 4294965248 }
 0x392   :  { %3372 = vsyncpa [#allocation4], 1 }

</bundles_post_ra>
